<compile_context>
chip_gen: v7x
topology: tpu7x:2x2x1
jax: 0.10.0
libtpu: 0.0.40
codegen_flags: <defaults>
</compile_context>

<pallas_src>
import functools

import jax
import jax.numpy as jnp
import numpy as np
from jax.experimental import pallas as pl
from jax.experimental.pallas import tpu as pltpu

_MIN_GRID_BLOCKS = 8  # >= 4 blocks per TensorCore after "parallel" sharding on v7x


# --------------------------------------------------------------------------- #
# Attention head
# --------------------------------------------------------------------------- #
def _attention_kernel(h_ref, eo_ref, we_ref, v_ref, out_ref, *, scores_via_mxu):
    """One batch tile.

    h_ref   : (TB, dec_hid)        f32 enc_hidden @ W_h + b (hoisted, bias folded in)
    eo_ref  : (TB, S, 2*enc_hid)   encoder outputs of this tile
    we_ref  : (2*enc_hid, dec_hid) attn-weight slice acting on encoder_outputs
    v_ref   : (1, dec_hid)         val weight (row vector, no bias)
    out_ref : (TB, S)              softmax over S
    """
    tb, s, feat = eo_ref.shape
    dec_hid = we_ref.shape[1]

    hid_proj = h_ref[...]  # already f32, bias included

    # encoder_outputs projection on the MXU.  The (TB, S) merge into the sublane
    # dim is layout-free because the wrapper guarantees S is sublane-aligned
    # (S % 8 == 0 for f32, S % 16 == 0 for bf16).
    eo2 = eo_ref[...].reshape(tb * s, feat)
    enc_proj = jnp.dot(eo2, we_ref[...],
                       preferred_element_type=jnp.float32).reshape(tb, s, dec_hid)

    # tanh in f32 (EUP) — keeps v5e (no bf16 VPU/EUP) correct for bf16 inputs.
    energy = jnp.tanh(enc_proj + hid_proj[:, None, :])        # (TB, S, dec_hid) f32

    v_row = v_ref[...].astype(jnp.float32)                    # (1, dec_hid)
    if scores_via_mxu:
        # Sweep knob for v6e/v7x: N=1 MXU matmul frees the XLUs for softmax.
        scores = jnp.dot(energy.reshape(tb * s, dec_hid),
                         v_row.reshape(dec_hid, 1),
                         preferred_element_type=jnp.float32).reshape(tb, s)
    else:
        # VPU multiply + cross-lane reduce (preferred on v5e: 3 XLUs, small MXU).
        scores = jnp.sum(energy * v_row, axis=-1)              # (TB, S)

    # Numerically stable softmax over S; exact divide so rows sum to 1.
    m = jnp.max(scores, axis=-1, keepdims=True)
    e = jnp.exp(scores - m)
    denom = jnp.sum(e, axis=-1, keepdims=True)
    out_ref[...] = (e / denom).astype(out_ref.dtype)


def _vmem_budget_and_capacity():
    """(working-set budget, physical VMEM capacity) for the current chip."""
    cap = 128 << 20
    try:
        info = pltpu.get_tpu_info()
        cap = int(getattr(info, "vmem_capacity_bytes", cap))
    except Exception:
        pass
    if cap <= (96 << 20):          # v7x-class: 64 MiB physical per TensorCore
        return 12 << 20, cap
    return 20 << 20, cap           # v5e / v6e: 128 MiB physical


def _auto_batch_tile(b, per_row_bytes, fixed_bytes, budget_bytes,
                     min_blocks=_MIN_GRID_BLOCKS):
    """Largest batch tile whose resident working set fits the budget, while
    keeping >= min_blocks grid steps (pipeline overlap / v7x TC sharding) and
    never shrinking below the 8-row sublane granule just to lengthen the grid."""
    cap_vmem = max(1, int((budget_bytes - fixed_bytes) // max(per_row_bytes, 1)))
    cap_grid = max(min(8, b), b // min_blocks)
    cap = max(1, min(b, cap_vmem, cap_grid))
    for t in range(cap, 0, -1):            # prefer 8-aligned divisors of b
        if b % t == 0 and (t % 8 == 0 or t == b):
            return t
    for t in range(cap, 0, -1):            # fallback: any divisor (t=1 always)
        if b % t == 0:
            return t
    return 1


@functools.partial(jax.jit, static_argnames=("batch_tile", "scores_via_mxu"))
def attention_forward(enc_hidden, encoder_outputs, w_attn, b_attn, w_val, *,
                      batch_tile=None, scores_via_mxu=False):
    """Additive attention.

    enc_hidden      : (B, dec_hid)
    encoder_outputs : (B, S, 2*enc_hid)
    w_attn          : (dec_hid + 2*enc_hid, dec_hid)  (x @ w_attn layout; rows
                       ordered [enc_hidden ; encoder_outputs] matching torch.cat)
    b_attn          : (1, dec_hid) or (dec_hid,)
    w_val           : (dec_hid, 1)  (no bias)
    returns (B, S) float32 softmax over S.
    """
    b, s, feat = encoder_outputs.shape
    dec_hid = enc_hidden.shape[1]
    if w_attn.shape[0] != dec_hid + feat:
        raise ValueError("w_attn rows must equal dec_hid + 2*enc_hid")

    act_itemsize = jnp.dtype(encoder_outputs.dtype).itemsize
    w_itemsize = jnp.dtype(w_attn.dtype).itemsize

    # Sublane-alignment guard: the in-kernel (TB,S)->(TB*S) merge is a free view
    # only if S is a multiple of the sublane granule (8 f32 / 16 bf16 / 32 int8).
    sublane = 8 * (4 // act_itemsize)
    if s % sublane != 0:
        raise ValueError(
            f"S={s} must be a multiple of {sublane} for dtype "
            f"{jnp.dtype(encoder_outputs.dtype).name}; pad S or cast to float32.")

    # Split the concatenated-input weight instead of materializing the concat:
    #   x @ W == enc_hidden @ W[:dec_hid] + encoder_outputs @ W[dec_hid:]
    w_h = w_attn[:dec_hid, :]
    w_e = w_attn[dec_hid:, :]
    v_row = w_val.reshape(1, dec_hid)

    # enc_hidden projection hoisted out of the kernel (review item): one small
    # XLA matmul over the whole batch, bias folded in, passed as f32.
    hid_proj = (jnp.dot(enc_hidden, w_h, preferred_element_type=jnp.float32)
                + b_attn.reshape(1, dec_hid).astype(jnp.float32))       # (B, dec_hid)

    # --- VMEM accounting: everything actually resident per grid step ---------
    per_row_bytes = (2 * s * feat * act_itemsize     # eo tile (double-buffered)
                     + 2 * dec_hid * 4               # hid_proj tile (f32, dbuf)
                     + 2 * s * 4                     # output tile (f32, dbuf)
                     + 2 * s * dec_hid * 4)          # f32 enc_proj + energy
    fixed_bytes = 2 * (feat * dec_hid + dec_hid) * w_itemsize   # w_e + v (2 bufs each)

    budget, vmem_cap = _vmem_budget_and_capacity()
    tb = int(batch_tile) if batch_tile is not None else _auto_batch_tile(
        b, per_row_bytes, fixed_bytes, budget)
    grid = (pl.cdiv(b, tb),)

    est_bytes = fixed_bytes + tb * per_row_bytes
    vmem_limit = int(min(max(est_bytes + (8 << 20), 32 << 20),
                         max(vmem_cap - (8 << 20), 32 << 20)))

    cost = pl.CostEstimate(
        flops=2 * b * s * feat * dec_hid            # encoder_outputs projection
        + 4 * b * s * dec_hid                       # add / tanh-input / mul / reduce
        + 4 * b * s,                                # softmax elementwise
        transcendentals=b * s * dec_hid + b * s,    # tanh + exp
        bytes_accessed=(encoder_outputs.size * act_itemsize
                        + hid_proj.size * 4
                        + (w_e.size + v_row.size) * w_itemsize
                        + b * s * 4),
    )

    kernel = functools.partial(_attention_kernel, scores_via_mxu=scores_via_mxu)
    return pl.pallas_call(
        kernel,
        out_shape=jax.ShapeDtypeStruct((b, s), jnp.float32),
        grid=grid,
        in_specs=[
            pl.BlockSpec((tb, dec_hid), lambda i: (i, 0)),     # hid_proj (f32)
            pl.BlockSpec((tb, s, feat), lambda i: (i, 0, 0)),  # encoder_outputs
            pl.BlockSpec((feat, dec_hid), lambda i: (0, 0)),   # w_e (constant idx)
            pl.BlockSpec((1, dec_hid), lambda i: (0, 0)),      # v   (constant idx)
        ],
        out_specs=pl.BlockSpec((tb, s), lambda i: (i, 0)),
        compiler_params=pltpu.CompilerParams(
            # batch tiles are independent -> shard across both TCs on v7x
            dimension_semantics=("parallel",),
            vmem_limit_bytes=vmem_limit,
        ),
        cost_estimate=cost,
    )(hid_proj, encoder_outputs, w_e, v_row)


def _attention_reference(enc_hidden, encoder_outputs, w_attn, b_attn, w_val):
    """Plain-JAX reference identical to the PyTorch module's math (with concat)."""
    b, s, _ = encoder_outputs.shape
    dec_hid = enc_hidden.shape[1]
    rep = jnp.broadcast_to(enc_hidden[:, None, :], (b, s, dec_hid))
    x = jnp.concatenate([rep, encoder_outputs], axis=2)
    energy = jnp.tanh(x @ w_attn + b_attn.reshape(-1))
    scores = (energy @ w_val)[..., 0]
    return jax.nn.softmax(scores, axis=1)


# --------------------------------------------------------------------------- #
# Seq2SeqEncoder output head:  dec_hidden = tanh(fc(cat(h[-2], h[-1], dim=1)))
# --------------------------------------------------------------------------- #
def _fc_tanh_kernel(x_ref, w_ref, b_ref, o_ref):
    acc = jnp.dot(x_ref[...], w_ref[...], preferred_element_type=jnp.float32)
    o_ref[...] = jnp.tanh(acc + b_ref[...].astype(jnp.float32)).astype(o_ref.dtype)


@jax.jit
def encoder_fc_forward(h_fwd, h_bwd, w_fc, b_fc):
    """h_fwd/h_bwd: (B, enc_hid) last-layer GRU directions; w_fc: (2*enc_hid, dec_hid)."""
    x = jnp.concatenate([h_fwd, h_bwd], axis=1)
    b = x.shape[0]
    d_out = w_fc.shape[1]
    return pl.pallas_call(
        _fc_tanh_kernel,
        out_shape=jax.ShapeDtypeStruct((b, d_out), jnp.float32),
    )(x, w_fc, b_fc.reshape(1, d_out))


# --------------------------------------------------------------------------- #
if __name__ == "__main__":
    # Lane-dense demo shapes; B=64 so the auto tile (8 rows) yields a grid of 8
    # blocks (>= 4 per TensorCore on v7x) while staying 8-sublane aligned.
    B, S = 64, 128
    enc_hid_dim, dec_hid_dim = 64, 128
    feat = 2 * enc_hid_dim                 # 128
    d_in = feat + dec_hid_dim              # 256

    key = jax.random.PRNGKey(0)
    k1, k2, k3, k4, k5, k6, k7, k8, k9 = jax.random.split(key, 9)

    bound_attn = 1.0 / np.sqrt(d_in)
    w_attn = jax.random.uniform(k1, (d_in, dec_hid_dim), jnp.float32, -bound_attn, bound_attn)
    b_attn = jax.random.uniform(k2, (1, dec_hid_dim), jnp.float32, -bound_attn, bound_attn)
    bound_val = 1.0 / np.sqrt(dec_hid_dim)
    w_val = jax.random.uniform(k3, (dec_hid_dim, 1), jnp.float32, -bound_val, bound_val)

    enc_hidden = jax.random.normal(k4, (B, dec_hid_dim), jnp.float32)
    encoder_outputs = jax.random.normal(k5, (B, S, feat), jnp.float32)

    ref = _attention_reference(enc_hidden, encoder_outputs, w_attn, b_attn, w_val)

    # f32 path: auto tile -> tb=8, grid=(8,), pipelined, "parallel" across TCs.
    out = attention_forward(enc_hidden, encoder_outputs, w_attn, b_attn, w_val)
    out = jax.block_until_ready(out)
    assert out.shape == (B, S)
    assert np.allclose(np.asarray(out), np.asarray(ref), atol=2e-3, rtol=1e-2)
    # exact divide in the softmax -> rows sum to 1 up to f32 rounding
    assert np.allclose(np.asarray(out).sum(axis=1), 1.0, atol=1e-4)

    # bf16 activations/weights (halves HBM bytes on v6e/v7x); accumulation and
    # transcendentals stay f32 inside the kernel (v5e-safe).
    out_bf16 = attention_forward(
        enc_hidden.astype(jnp.bfloat16),
        encoder_outputs.astype(jnp.bfloat16),
        w_attn.astype(jnp.bfloat16),
        b_attn.astype(jnp.bfloat16),
        w_val.astype(jnp.bfloat16),
    )
    out_bf16 = jax.block_until_ready(out_bf16)
    assert np.allclose(np.asarray(out_bf16), np.asarray(ref), atol=5e-3, rtol=5e-2)

    # Seq2SeqEncoder fc + tanh head.
    bound_fc = 1.0 / np.sqrt(feat)
    w_fc = jax.random.uniform(k6, (feat, dec_hid_dim), jnp.float32, -bound_fc, bound_fc)
    b_fc = jax.random.uniform(k7, (dec_hid_dim,), jnp.float32, -bound_fc, bound_fc)
    h_fwd = jax.random.normal(k8, (B, enc_hid_dim), jnp.float32)
    h_bwd = jax.random.normal(k9, (B, enc_hid_dim), jnp.float32)

    dec_hidden = jax.block_until_ready(encoder_fc_forward(h_fwd, h_bwd, w_fc, b_fc))
    fc_ref = np.tanh(np.concatenate([np.asarray(h_fwd), np.asarray(h_bwd)], axis=1)
                     @ np.asarray(w_fc) + np.asarray(b_fc))
    assert dec_hidden.shape == (B, dec_hid_dim)
    assert np.allclose(np.asarray(dec_hidden), fc_ref, atol=2e-3, rtol=1e-2)

    print("KERNEL_OK")
</pallas_src>

<mosaic_0001>
module attributes {stable_mosaic.version = 11 : i64} {
  func.func @_attention_kernel(%arg0: i32, %arg1: memref<8x128xf32, #tpu.memory_space<vmem>>, %arg2: memref<8x128x128xf32, #tpu.memory_space<vmem>>, %arg3: memref<128x128xf32, #tpu.memory_space<vmem>>, %arg4: memref<1x128xf32, #tpu.memory_space<vmem>>, %arg5: memref<8x128xf32, #tpu.memory_space<vmem>>) attributes {dimension_semantics = [#tpu.dimension_semantics<parallel>], iteration_bounds = array<i64: 8>, scalar_prefetch = 0 : i64, scratch_operands = 0 : i64, tpu.core_type = #tpu.core_type<tc>, window_params = [{transform_indices = @transform_0, window_bounds = array<i64: 8, 128>}, {transform_indices = @transform_1, window_bounds = array<i64: 8, 128, 128>}, {pipeline_mode = #tpu.pipeline_mode<synchronous>, transform_indices = @transform_2, window_bounds = array<i64: 128, 128>}, {pipeline_mode = #tpu.pipeline_mode<synchronous>, transform_indices = @transform_3, window_bounds = array<i64: 1, 128>}, {transform_indices = @transform_4, window_bounds = array<i64: 8, 128>}]} {
    %c0 = arith.constant 0 : index
    %c0_0 = arith.constant 0 : index
    %0 = vector.load %arg1[%c0, %c0_0] : memref<8x128xf32, #tpu.memory_space<vmem>>, vector<8x128xf32>
    %c0_1 = arith.constant 0 : index
    %c0_2 = arith.constant 0 : index
    %c0_3 = arith.constant 0 : index
    %1 = vector.load %arg2[%c0_1, %c0_2, %c0_3] : memref<8x128x128xf32, #tpu.memory_space<vmem>>, vector<8x128x128xf32>
    %2 = vector.shape_cast %1 : vector<8x128x128xf32> to vector<1024x128xf32>
    %c0_4 = arith.constant 0 : index
    %c0_5 = arith.constant 0 : index
    %3 = vector.load %arg3[%c0_4, %c0_5] : memref<128x128xf32, #tpu.memory_space<vmem>>, vector<128x128xf32>
    %cst = arith.constant dense<0.000000e+00> : vector<1024x128xf32>
    %4 = tpu.matmul %2, %3, %cst {dimension_numbers = #tpu.dot_dimension_numbers<[1], [0], [0], [1], [0, 0, 1, 1], [], []>} : vector<1024x128xf32>, vector<128x128xf32>, vector<1024x128xf32> -> vector<1024x128xf32>
    %5 = vector.shape_cast %4 : vector<1024x128xf32> to vector<8x128x128xf32>
    %6 = vector.shape_cast %0 : vector<8x128xf32> to vector<8x1x128xf32>
    %7 = vector.broadcast %6 : vector<8x1x128xf32> to vector<8x128x128xf32>
    %8 = arith.addf %5, %7 : vector<8x128x128xf32>
    %9 = math.tanh %8 : vector<8x128x128xf32>
    %c0_6 = arith.constant 0 : index
    %c0_7 = arith.constant 0 : index
    %10 = vector.load %arg4[%c0_6, %c0_7] : memref<1x128xf32, #tpu.memory_space<vmem>>, vector<1x128xf32>
    %11 = vector.shape_cast %10 : vector<1x128xf32> to vector<1x1x128xf32>
    %12 = vector.broadcast %11 : vector<1x1x128xf32> to vector<8x128x128xf32>
    %13 = arith.mulf %9, %12 : vector<8x128x128xf32>
    %cst_8 = arith.constant dense<0.000000e+00> : vector<8x128xf32>
    %14 = vector.multi_reduction <add>, %13, %cst_8 [2] : vector<8x128x128xf32> to vector<8x128xf32>
    %cst_9 = arith.constant dense<0xFF800000> : vector<8xf32>
    %15 = vector.multi_reduction <maximumf>, %14, %cst_9 [1] : vector<8x128xf32> to vector<8xf32>
    %16 = vector.shape_cast %15 : vector<8xf32> to vector<8x1xf32>
    %17 = vector.broadcast %16 : vector<8x1xf32> to vector<8x128xf32>
    %18 = arith.subf %14, %17 : vector<8x128xf32>
    %19 = math.exp %18 : vector<8x128xf32>
    %cst_10 = arith.constant dense<0.000000e+00> : vector<8xf32>
    %20 = vector.multi_reduction <add>, %19, %cst_10 [1] : vector<8x128xf32> to vector<8xf32>
    %21 = vector.shape_cast %20 : vector<8xf32> to vector<8x1xf32>
    %22 = vector.broadcast %21 : vector<8x1xf32> to vector<8x128xf32>
    %23 = arith.divf %19, %22 : vector<8x128xf32>
    %c0_11 = arith.constant 0 : index
    %c0_12 = arith.constant 0 : index
    %24 = vector.load %arg5[%c0_11, %c0_12] : memref<8x128xf32, #tpu.memory_space<vmem>>, vector<8x128xf32>
    tpu.vector_store %arg5[%c0_11, %c0_12], %23 {strides = array<i32>} : memref<8x128xf32, #tpu.memory_space<vmem>>, vector<8x128xf32>,
    return
  }
  func.func @transform_0(%arg0: i32) -> (i32, i32) {
    %c0_i32 = arith.constant 0 : i32
    %c0_i32_0 = arith.constant 0 : i32
    return %arg0, %c0_i32 : i32, i32
  }
  func.func @transform_1(%arg0: i32) -> (i32, i32, i32) {
    %c0_i32 = arith.constant 0 : i32
    %c0_i32_0 = arith.constant 0 : i32
    %c0_i32_1 = arith.constant 0 : i32
    return %arg0, %c0_i32, %c0_i32_0 : i32, i32, i32
  }
  func.func @transform_2(%arg0: i32) -> (i32, i32) {
    %c0_i32 = arith.constant 0 : i32
    %c0_i32_0 = arith.constant 0 : i32
    %c0_i32_1 = arith.constant 0 : i32
    return %c0_i32, %c0_i32_0 : i32, i32
  }
  func.func @transform_3(%arg0: i32) -> (i32, i32) {
    %c0_i32 = arith.constant 0 : i32
    %c0_i32_0 = arith.constant 0 : i32
    %c0_i32_1 = arith.constant 0 : i32
    return %c0_i32, %c0_i32_0 : i32, i32
  }
  func.func @transform_4(%arg0: i32) -> (i32, i32) {
    %c0_i32 = arith.constant 0 : i32
    %c0_i32_0 = arith.constant 0 : i32
    return %arg0, %c0_i32 : i32, i32
  }
}

</mosaic_0001>

<bundles_post_ra>
// kernel: attention_forward.1
= control target key start
LH: loop header
LB: loop body
LE: loop exit
PB: predicated region body
PF: predicated region fallthrough
CT: control target
= control target key end

     0   :  { %9 = vsyncpa [#allocation3], 0  ;;  %s10616_s0 = inlined_call_operand.vmem [shape: f32[64,128], index: 0, kind: input, shape index: {}]   ;;  %s10617_s1 = inlined_call_operand.hbm [shape: f32[64,128,128], index: 1, kind: input, shape index: {}]   ;;  %s10618_s2 = inlined_call_operand.vmem [shape: f32[128,128], index: 2, kind: input, shape index: {}]   ;;  %s10619_s3 = inlined_call_operand.hbm [shape: f32[1,128], index: 3, kind: input, shape index: {}]   ;;  %s10620_s4 = inlined_call_operand.hbm [shape: f32[64,128], index: 4, kind: output, shape index: {}]  }
   0x1   :  { %11 = vsyncpa [#allocation3 + $0x1], 0 }
   0x2   :  { %12 = vsyncpa [#allocation6], 0 }
   0x3   :  { %13 = vsyncpa [#allocation4], 0 }
   0x4   :  { %15 = vsyncpa [#allocation4 + $0x1], 0  ;;  %s6850_s15 = smov 0   ;;  %s6852_s16 = smov 0  }
   0x5   :  { %s6854_s17 = smov 0   ;;  %s6856_s18 = smov 0  }
   0x6 LB: > { %s6871_s19 = sadd.s32 4294967295, %s6816_s18   ;;  %s5659_s20 = sadd.s32 4294967294, %s6816_s18   ;;  %s6816_s18 = sphi %s6856_s18, %s11693_s18   ;;  %s6812_s17 = sphi %s6854_s17, %s11692_s17   ;;  %s6808_s16 = sphi %s6852_s16, %s11691_s16   ;;  %s6804_s15 = sphi %s6850_s15, %s11690_s15  }
   0x7   : > { %s6875_s21 = sadd.s32 1, %s6816_s18   ;;  %s54_s22 = sadd.s32 1, %s6812_s17 }
   0x8   : > { %s51_s23 = ssub.s32 %s6816_s18, %s6875_s21  ;;  %p61_p0 = scmp.ne.s32.totalorder %s6812_s17, %s6808_s16 }
   0x9   : > { %p52_p1 = scmp.eq.s32.totalorder %s51_s23, 0  ;;  %p62_p2 = scmp.eq.s32.totalorder %s6816_s18, 0 }
   0xa   : > { %p67_p3 = scmp.ne.s32.totalorder %s6808_s16, %s6804_s15  ;;  %p10621_p4 = scmp.eq.s32.totalorder %s6871_s19, 0 }
   0xb   : > { %s6887_s24 = scalar_select %p52_p1, %s6812_s17, %s54_s22  }
   0xc   : > { %p6889_p5 = por %p62_p2, %p61_p0  ;;  %p6895_p6 = por %p10621_p4, %p67_p3 }
   0xd   : > { %p133_p7 = scmp.eq.s32.totalorder %s6871_s19, 7  ;;  %p139_p8 = scmp.eq.s32.totalorder %s5659_s20, 7 }
   0xe   : > { %s10923_s26 = scalar_select %p6895_p6, 1, 0 }
   0xf   : > { %p5660_p9 = scmp.ge.s32.totalorder %s6816_s18, 1  ;;  %p146_p10 = scmp.lt.s32.totalorder %s6816_s18, 9 }
  0x10   : > { %p6902_p11 = por %p133_p7, %p61_p0  ;;  %p6906_p12 = por %p139_p8, %p67_p3 }
  0x11   : > { %p6910_p13 = pnand %p5660_p9, %p146_p10  ;;  %s6818_s30 = smov [#allocation5]  }
  0x12   : > { %s10924_s27 = scalar_select %p6902_p11, 1, 0 }
  0x13   : > { %s10925_s28 = scalar_select %p6906_p12, 1, 0 }
  0x14   : > { %s10926_s29 = scalar_select %p6910_p13, 1, 0 }
  0x15   : > { %p6103_p1 = pneg %p6910_p13  ;;  %s162_s5 = sshll.u32 %s6818_s30, 4  ;;  %s163_s5 = int_to_ptr.vmem [resolvable:$true] %s162_s5 }
  0x16   : > { %p6116_p2 = scmp.lt.s32.totalorder %s6816_s18, 8  ;;  %s180_s7 = sand.u32 1, %s6812_s17  }
  0x17   : > { %p6919_p0 = pnand %p6103_p1, %p10621_p4  ;;  %s5663_s9 = sshll.u32 %s180_s7, 10 }
  0x18   : > { %p6926_p3 = pnand %p6116_p2, %p6889_p5  ;;  %s6688_s12 = scalar_lea.hbm %s10619_s3, 16 }
  0x19   : > { %p6689_p7 = scmp.ne.s32.totalorder %s10619_s3, %s6688_s12  ;;  %p6690_p8 = pneg %p6919_p0 }
  0x1a   : > { %s10928_s8 = scalar_select %p6926_p3, 1, 0 }
  0x1b   : > { %p6691_p9 = pnand %p6690_p8, %p6689_p7  ;;  %p6695_p5 = scmp.lt.u32.totalorder %s6688_s12, %s10619_s3 }
  0x1d   : > { %p6692_p10 = pneg %p6691_p9 }
  0x1f   : > { %p6697_p1 = pnand %p6695_p5, %p6692_p10 }
  0x21   : > { %6700 = shalt.err (!%p6697_p1)
}
  0x22   : > { %s6701_s23 = scalar_lea.vmem %s163_s5, 16  ;;  %s6708_s25 = scalar_lea.vmem %s163_s5, 32 }
  0x23   : > { %p6702_p2 = scmp.ne.s32.totalorder %s163_s5, %s6701_s23  ;;  %p6709_p11 = scmp.lt.s32.totalorder %s163_s5, %s163_s5 }
  0x24   : > { %p6710_p6 = scmp.lt.s32.totalorder %s6708_s25, %s6701_s23 }
  0x25   : > { %p6704_p4 = pnand %p6702_p2, %p6690_p8 }
  0x26   : > { %p6711_p13 = por %p6710_p6, %p6709_p11 }
  0x27   : > { %p6705_p12 = pneg %p6704_p4 }
  0x29   : > { %p6712_p3 = pnand %p6711_p13, %p6705_p12 }
  0x2b   : > { %6715 = shalt.err (!%p6712_p3)
}
  0x2c   : > { %6106 = dma.hbm_to_vmem [thread:$0]  (!%p6919_p0), %s10619_s3, 16, %s163_s5, [#allocation6]  }
  0x2d   : > { %s5678_s11 = sshll.u32 %s6816_s18, 14  ;;  %s184_s12 = scalar_lea.vmem [#allocation2], %s5663_s9 }
  0x2e   : > { %s192_s13 = sshll.u32 %s184_s12, 4  ;;  %s6950_s22 = scalar_lea.hbm %s10617_s1, %s5678_s11  ;;  %s6952_s13 = int_to_ptr.vmem [resolvable:$true] %s192_s13 }
  0x2f   : > { %s6954_s6 = scalar_lea.sflag [#allocation3], %s180_s7  ;;  %s6716_s23 = scalar_lea.hbm %s6950_s22, 16384 }
  0x30   : > { %p6717_p4 = scmp.ne.s32.totalorder %s6950_s22, %s6716_s23  ;;  %p10929_p6 = scmp.ne.s32.totalorder %s10928_s8, 0 }
  0x31   : > { %s6721_s25 = scalar_lea.hbm %s10617_s1, 131072  ;;  %p6722_p0 = scmp.lt.u32.totalorder %s6950_s22, %s10617_s1 }
  0x32   : > { %p6718_p11 = pneg %p10929_p6  ;;  %p6723_p3 = scmp.lt.u32.totalorder %s6721_s25, %s6716_s23 }
  0x33   : > { %p6725_p8 = scmp.lt.u32.totalorder %s6716_s23, %s6950_s22 }
  0x34   : > { %p6719_p12 = pnand %p6718_p11, %p6717_p4  ;;  %p6724_p7 = por %p6723_p3, %p6722_p0 }
  0x36   : > { %p6720_p13 = pneg %p6719_p12  ;;  %p6726_p9 = por %p6725_p8, %p6724_p7 }
  0x38   : > { %p6727_p10 = pnand %p6726_p9, %p6720_p13 }
  0x3a   : > { %6730 = shalt.err (!%p6727_p10)
}
  0x3b   : > { %s6731_s7 = scalar_lea.vmem %s6952_s13, 16384  ;;  %s6819_s11 = smov [#allocation2]  }
  0x3c   : > { %p6732_p5 = scmp.ne.s32.totalorder %s6952_s13, %s6731_s7  ;;  %s6736_s12 = sshll.u32 %s6819_s11, 4  ;;  %s6737_s12 = int_to_ptr.vmem [resolvable:$false] %s6736_s12 }
  0x3d   : > { %s6738_s14 = scalar_lea.vmem %s6737_s12, 32768  ;;  %p6739_p4 = scmp.lt.s32.totalorder %s6952_s13, %s6737_s12 }
  0x3e   : > { %p6734_p1 = pnand %p6732_p5, %p6718_p11  ;;  %p6740_p12 = scmp.lt.s32.totalorder %s6738_s14, %s6731_s7 }
  0x40   : > { %p6735_p2 = pneg %p6734_p1  ;;  %p6741_p0 = por %p6740_p12, %p6739_p4 }
  0x42   : > { %p6742_p3 = pnand %p6741_p0, %p6735_p2 }
  0x44   : > { %6745 = shalt.err (!%p6742_p3)
}
  0x45   : > { %s6820_s20 = smov 128   ;;  %s6821_s23 = smov 8  }
  0x46   : > { %6110 = dma.hbm_to_vmem [thread:$0]  (!%p10929_p6), %s6950_s22, 16384, %s6952_s13, %s6954_s6, %s6820_s20, %s6820_s20, %s6821_s23  }
  0x47   : > { %p10930_p11 = scmp.ne.s32.totalorder %s10926_s29, 0 }
  0x49   : > { %204 = sbr.rel (%p10930_p11) target bundleno = 1887 (0x75f), region = 36 }
  0x50   : > { %s6985_s5 = sand.u32 1, %s6808_s16   ;;  %p10931_p13 = scmp.ne.s32.totalorder %s10923_s26, 0 }
  0x51   : > { %s5668_s9 = sshll.u32 %s6985_s5, 10  ;;  %s207_s25 = scalar_lea.sflag [#allocation3], %s6985_s5 }
  0x52   : > { %s6989_s30 = scalar_lea.vmem [#allocation2], %s5668_s9 }
  0x53   : > { %6791 = dma.done.wait (%p10931_p13), %s207_s25, 16384  }
  0x54   : > { %6793 = vsyncadd (%p10931_p13), %s207_s25, 4294950912  ;;  %p10932_p6 = scmp.eq.s32.totalorder %s6871_s19, 0 }
  0x56   : > { %6795 = dma.done.wait (%p10932_p6), [#allocation6], 16   ;;  %p10933_p7 = pmov %p10932_p6 }
  0x57   : > { %v377_v0 = vld [vmem:[%s10618_s2] sm:$0xff]  ;;  %v378_v1 = vld [vmem:[%s10618_s2 + $0x8] sm:$0xff]  ;;  %v379_v2 = vld [vmem:[%s10618_s2 + $0x10] sm:$0xff]  ;;  %p243_p8 = scmp.lt.s32.totalorder %s6871_s19, 7  ;;  %vm1974_vm0 = vcmask 130112   ;;  %vm1981_vm1 = vcmask 195712  }
  0x58   : > { %6797 = vsyncadd (%p10933_p7), [#allocation6], 4294967280  ;;  %v6047_v3 = vpack.c.bf16 %v378_v1, %v377_v0  ;;  %v380_v4 = vld [vmem:[%s10618_s2 + $0x18] sm:$0xff]  ;;  %v381_v6 = vld [vmem:[%s10618_s2 + $0x20] sm:$0xff]  ;;  %vm1988_vm2 = vcmask 261312   ;;  %vm1995_vm3 = vcmask 326912  }
  0x59   : > { %v6051_v5 = vpack.c.bf16 %v380_v4, %v379_v2  ;;  %v382_v7 = vld [vmem:[%s10618_s2 + $0x28] sm:$0xff]  ;;  %v249_v9 = vld [vmem:[%s6989_s30] sm:$0xff]  ;;  %v383_v11 = vld [vmem:[%s10618_s2 + $0x30] sm:$0xff]  ;;  %s244_s13 = scalar_select %p243_p8, %s6871_s19, 7  ;;  %vm2002_vm4 = vcmask 392512   ;;  %vm10753_vm5 = vcmask 458112  }
  0x5a   : > { %6048 = vmatprep.subr.bf16.mxu0 %v6047_v3  ;;  %6079 = vmatprep.subr.bf16.mxu1 %v6047_v3  ;;  %v6055_v8 = vpack.c.bf16 %v382_v7, %v381_v6  ;;  %v313_v10 = vld [vmem:[%s6989_s30 + $0x200] sm:$0xff]  ;;  %v384_v12 = vld [vmem:[%s10618_s2 + $0x38] sm:$0xff]  ;;  %v386_v15 = vld [vmem:[%s10618_s2 + $0x48] sm:$0xff]  ;;  %vm2016_vm6 = vcmask 523712   ;;  %vm2023_vm7 = vcmask 589312   ;;  %vm2030_vm8 = vcmask 654912  }
  0x5b   : > { %6050 = vmatpush3.bf16.msra.mxu0 %v6047_v3  ;;  %6087 = vmatpush3.bf16.msra.mxu1 %v6047_v3  ;;  %v6059_v13 = vpack.c.bf16 %v384_v12, %v383_v11  ;;  %v385_v14 = vld [vmem:[%s10618_s2 + $0x40] sm:$0xff]  ;;  %v387_v17 = vld [vmem:[%s10618_s2 + $0x50] sm:$0xff]  ;;  %v388_v18 = vld [vmem:[%s10618_s2 + $0x58] sm:$0xff]  ;;  %s5671_s22 = sshll.u32 %s244_s13, 3  ;;  %vm10766_vm9 = vcmask 720512   ;;  %vm10771_vm10 = vcmask 786112  }
  0x5c   : > { %6052 = vmatprep.subr.bf16.mxu0 %v6051_v5  ;;  %6080 = vmatprep.subr.bf16.mxu1 %v6051_v5  ;;  %v6063_v16 = vpack.c.bf16 %v386_v15, %v385_v14  ;;  %v6067_v19 = vpack.c.bf16 %v388_v18, %v387_v17  ;;  %v389_v20 = vld [vmem:[%s10618_s2 + $0x60] sm:$0xff]  ;;  %v390_v21 = vld [vmem:[%s10618_s2 + $0x68] sm:$0xff]  ;;  %v391_v23 = vld [vmem:[%s10618_s2 + $0x70] sm:$0xff]  ;;  %s246_s26 = scalar_lea.vmem %s10616_s0, %s5671_s22  ;;  %vm10773_vm11 = vcmask 851712   ;;  %vm2058_vm12 = vcmask 917312   ;;  %s5674_s7 = sshll.u32 %s6871_s19, 7 }
  0x5d   : > { %5855 = vmatprep.mubr.f32.mxu0 %v249_v9  ;;  %5951 = vmatprep.mubr.f32.mxu1 %v313_v10  ;;  %v6071_v22 = vpack.c.bf16 %v390_v21, %v389_v20  ;;  %v392_v24 = vld [vmem:[%s10618_s2 + $0x78] sm:$0xff]  ;;  %v250_v26 = vld [vmem:[%s6989_s30 + $0x8] sm:$0xff]  ;;  %v251_v28 = vld [vmem:[%s6989_s30 + $0x10] sm:$0xff]  ;;  %vm2065_vm13 = vcmask 982912   ;;  %vm2072_vm14 = vcmask 1048512   ;;  %vm10765_vm15 = vcmask 1041409   ;;  %s10572_s23 = scalar_lea.hbm %s10620_s4, %s5674_s7 }
  0x5e   : > { %v6075_v25 = vpack.c.bf16 %v392_v24, %v391_v23  ;;  %v314_v27 = vld [vmem:[%s6989_s30 + $0x208] sm:$0xff]  ;;  %v315_v29 = vld [vmem:[%s6989_s30 + $0x210] sm:$0xff]  ;;  %v252_v30 = vld [vmem:[%s6989_s30 + $0x18] sm:$0xff]  ;;  %s5554_s19 = scalar_lea.sflag [#allocation4], %s6985_s5  ;;  %p11688_p10 = scmp.ne.s32.totalorder %s10924_s27, 0 }
  0x5f   : > { %6054 = vmatpush3.bf16.msra.mxu0 %v6051_v5  ;;  %6088 = vmatpush3.bf16.msra.mxu1 %v6051_v5  ;;  %v316_v31 = vld [vmem:[%s6989_s30 + $0x218] sm:$0xff]  ;;  %v253_v32 = vld [vmem:[%s6989_s30 + $0x20] sm:$0xff]  ;;  %v254_v34 = vld [vmem:[%s6989_s30 + $0x28] sm:$0xff]  ;;  %s6824_s25 = smov [#allocation7]  }
  0x60   : > { %6056 = vmatprep.subr.bf16.mxu0 %v6055_v8  ;;  %6081 = vmatprep.subr.bf16.mxu1 %v6055_v8  ;;  %v317_v33 = vld [vmem:[%s6989_s30 + $0x220] sm:$0xff]  ;;  %v318_v35 = vld [vmem:[%s6989_s30 + $0x228] sm:$0xff]  ;;  %v255_v36 = vld [vmem:[%s6989_s30 + $0x30] sm:$0xff]  ;;  %s6750_s29 = sshll.u32 %s6824_s25, 4  ;;  %s6751_s29 = int_to_ptr.vmem [resolvable:$false] %s6750_s29 }
  0x61   : > { %v319_v37 = vld [vmem:[%s6989_s30 + $0x230] sm:$0xff]  ;;  %v256_v38 = vld [vmem:[%s6989_s30 + $0x38] sm:$0xff]  ;;  %v257_v40 = vld [vmem:[%s6989_s30 + $0x40] sm:$0xff]  ;;  %s6752_s8 = scalar_lea.vmem %s6751_s29, 256 }
  0x62   : > { %v320_v39 = vld [vmem:[%s6989_s30 + $0x238] sm:$0xff]  ;;  %v321_v41 = vld [vmem:[%s6989_s30 + $0x240] sm:$0xff]  ;;  %v258_v42 = vld [vmem:[%s6989_s30 + $0x48] sm:$0xff] }
  0x63   : > { %6058 = vmatpush3.bf16.msra.mxu0 %v6055_v8  ;;  %6089 = vmatpush3.bf16.msra.mxu1 %v6055_v8  ;;  %v322_v43 = vld [vmem:[%s6989_s30 + $0x248] sm:$0xff]  ;;  %v259_v44 = vld [vmem:[%s6989_s30 + $0x50] sm:$0xff]  ;;  %v260_v46 = vld [vmem:[%s6989_s30 + $0x58] sm:$0xff] }
  0x64   : > { %6060 = vmatprep.subr.bf16.mxu0 %v6059_v13  ;;  %6082 = vmatprep.subr.bf16.mxu1 %v6059_v13  ;;  %v323_v45 = vld [vmem:[%s6989_s30 + $0x250] sm:$0xff]  ;;  %v324_v47 = vld [vmem:[%s6989_s30 + $0x258] sm:$0xff]  ;;  %v261_v48 = vld [vmem:[%s6989_s30 + $0x60] sm:$0xff] }
  0x65   : > { %v325_v49 = vld [vmem:[%s6989_s30 + $0x260] sm:$0xff]  ;;  %v262_v50 = vld [vmem:[%s6989_s30 + $0x68] sm:$0xff]  ;;  %v263_v52 = vld [vmem:[%s6989_s30 + $0x70] sm:$0xff] }
  0x66   : > { %v326_v51 = vld [vmem:[%s6989_s30 + $0x268] sm:$0xff]  ;;  %v327_v53 = vld [vmem:[%s6989_s30 + $0x270] sm:$0xff]  ;;  %v264_v54 = vld [vmem:[%s6989_s30 + $0x78] sm:$0xff] }
  0x67   : > { %6062 = vmatpush3.bf16.msra.mxu0 %v6059_v13  ;;  %6090 = vmatpush3.bf16.msra.mxu1 %v6059_v13  ;;  %v328_v55 = vld [vmem:[%s6989_s30 + $0x278] sm:$0xff]  ;;  %v265_v56 = vld [vmem:[%s6989_s30 + $0x80] sm:$0xff]  ;;  %v266_v58 = vld [vmem:[%s6989_s30 + $0x88] sm:$0xff] }
  0x68   : > { %6064 = vmatprep.subr.bf16.mxu0 %v6063_v16  ;;  %6083 = vmatprep.subr.bf16.mxu1 %v6063_v16  ;;  %v329_v57 = vld [vmem:[%s6989_s30 + $0x280] sm:$0xff]  ;;  %v330_v59 = vld [vmem:[%s6989_s30 + $0x288] sm:$0xff]  ;;  %v267_v60 = vld [vmem:[%s6989_s30 + $0x90] sm:$0xff] }
  0x69   : > { %v331_v61 = vld [vmem:[%s6989_s30 + $0x290] sm:$0xff]  ;;  %v268_v62 = vld [vmem:[%s6989_s30 + $0x98] sm:$0xff]  ;;  %v269_v0 = vld [vmem:[%s6989_s30 + $0xa0] sm:$0xff] }
  0x6a   : > { %v332_v63 = vld [vmem:[%s6989_s30 + $0x298] sm:$0xff]  ;;  %v333_v1 = vld [vmem:[%s6989_s30 + $0x2a0] sm:$0xff]  ;;  %v270_v2 = vld [vmem:[%s6989_s30 + $0xa8] sm:$0xff] }
  0x6b   : > { %6066 = vmatpush3.bf16.msra.mxu0 %v6063_v16  ;;  %6091 = vmatpush3.bf16.msra.mxu1 %v6063_v16  ;;  %v334_v3 = vld [vmem:[%s6989_s30 + $0x2a8] sm:$0xff]  ;;  %v271_v4 = vld [vmem:[%s6989_s30 + $0xb0] sm:$0xff]  ;;  %v272_v6 = vld [vmem:[%s6989_s30 + $0xb8] sm:$0xff] }
  0x6c   : > { %6068 = vmatprep.subr.bf16.mxu0 %v6067_v19  ;;  %6084 = vmatprep.subr.bf16.mxu1 %v6067_v19  ;;  %v335_v5 = vld [vmem:[%s6989_s30 + $0x2b0] sm:$0xff]  ;;  %v336_v7 = vld [vmem:[%s6989_s30 + $0x2b8] sm:$0xff]  ;;  %v273_v8 = vld [vmem:[%s6989_s30 + $0xc0] sm:$0xff] }
  0x6d   : > { %v337_v9 = vld [vmem:[%s6989_s30 + $0x2c0] sm:$0xff]  ;;  %v274_v10 = vld [vmem:[%s6989_s30 + $0xc8] sm:$0xff]  ;;  %v275_v12 = vld [vmem:[%s6989_s30 + $0xd0] sm:$0xff] }
  0x6e   : > { %v338_v11 = vld [vmem:[%s6989_s30 + $0x2c8] sm:$0xff]  ;;  %v339_v13 = vld [vmem:[%s6989_s30 + $0x2d0] sm:$0xff]  ;;  %v276_v14 = vld [vmem:[%s6989_s30 + $0xd8] sm:$0xff] }
  0x6f   : > { %6070 = vmatpush3.bf16.msra.mxu0 %v6067_v19  ;;  %6092 = vmatpush3.bf16.msra.mxu1 %v6067_v19  ;;  %v340_v15 = vld [vmem:[%s6989_s30 + $0x2d8] sm:$0xff]  ;;  %v277_v16 = vld [vmem:[%s6989_s30 + $0xe0] sm:$0xff]  ;;  %v278_v18 = vld [vmem:[%s6989_s30 + $0xe8] sm:$0xff] }
  0x70   : > { %6072 = vmatprep.subr.bf16.mxu0 %v6071_v22  ;;  %6085 = vmatprep.subr.bf16.mxu1 %v6071_v22  ;;  %v341_v17 = vld [vmem:[%s6989_s30 + $0x2e0] sm:$0xff]  ;;  %v342_v19 = vld [vmem:[%s6989_s30 + $0x2e8] sm:$0xff]  ;;  %v279_v20 = vld [vmem:[%s6989_s30 + $0xf0] sm:$0xff] }
  0x71   : > { %v343_v21 = vld [vmem:[%s6989_s30 + $0x2f0] sm:$0xff]  ;;  %v344_v23 = vld [vmem:[%s6989_s30 + $0x2f8] sm:$0xff]  ;;  %v281_v24 = vld [vmem:[%s6989_s30 + $0x100] sm:$0xff] }
  0x73   : > { %6074 = vmatpush3.bf16.msra.mxu0 %v6071_v22  ;;  %6093 = vmatpush3.bf16.msra.mxu1 %v6071_v22  ;;  %v280_v22 = vld [vmem:[%s6989_s30 + $0xf8] sm:$0xff] }
  0x74   : > { %6076 = vmatprep.subr.bf16.mxu0 %v6075_v25  ;;  %6086 = vmatprep.subr.bf16.mxu1 %v6075_v25 }
  0x77   : > { %6078 = vmatpush3.bf16.msra.mxu0 %v6075_v25  ;;  %6094 = vmatpush3.bf16.msra.mxu1 %v6075_v25  ;;  %v345_v25 = vld [vmem:[%s6989_s30 + $0x300] sm:$0xff] }
  0x7a   : > { %5856 = vmatmul.mubr.f32.vlgmr.msra.gmra.mrb[0].mxu0 %v250_v26  ;;  %5952 = vmatmul.mubr.f32.vlgmr.msra.gmra.mrb[0].mxu1 %v314_v27  ;;  %v282_v26 = vld [vmem:[%s6989_s30 + $0x108] sm:$0xff] }
  0x7b   : > { %5858 = vmatprep.mubr.f32.mxu0 %v251_v28  ;;  %5954 = vmatprep.mubr.f32.mxu1 %v315_v29  ;;  %v346_v27 = vld [vmem:[%s6989_s30 + $0x308] sm:$0xff]  ;;  %v283_v28 = vld [vmem:[%s6989_s30 + $0x110] sm:$0xff] }
  0x7c   : > { %v347_v29 = vld [vmem:[%s6989_s30 + $0x310] sm:$0xff] }
  0x7e   : > { %5859 = vmatmul.mubr.f32.gmra.mrb[2].mxu0 %v252_v30  ;;  %5955 = vmatmul.mubr.f32.gmra.mrb[2].mxu1 %v316_v31  ;;  %v284_v30 = vld [vmem:[%s6989_s30 + $0x118] sm:$0xff] }
  0x7f   : > { %5861 = vmatprep.mubr.f32.mxu0 %v253_v32  ;;  %5957 = vmatprep.mubr.f32.mxu1 %v317_v33  ;;  %v348_v31 = vld [vmem:[%s6989_s30 + $0x318] sm:$0xff]  ;;  %v285_v32 = vld [vmem:[%s6989_s30 + $0x120] sm:$0xff] }
  0x80   : > { %v349_v33 = vld [vmem:[%s6989_s30 + $0x320] sm:$0xff] }
  0x82   : > { %5862 = vmatmul.mubr.f32.gmra.mrb[4].mxu0 %v254_v34  ;;  %5958 = vmatmul.mubr.f32.gmra.mrb[4].mxu1 %v318_v35  ;;  %v286_v34 = vld [vmem:[%s6989_s30 + $0x128] sm:$0xff] }
  0x83   : > { %5864 = vmatprep.mubr.f32.mxu0 %v255_v36  ;;  %5960 = vmatprep.mubr.f32.mxu1 %v319_v37  ;;  %v350_v35 = vld [vmem:[%s6989_s30 + $0x328] sm:$0xff]  ;;  %v287_v36 = vld [vmem:[%s6989_s30 + $0x130] sm:$0xff] }
  0x84   : > { %v351_v37 = vld [vmem:[%s6989_s30 + $0x330] sm:$0xff] }
  0x86   : > { %5865 = vmatmul.mubr.f32.gmra.mrb[6].mxu0 %v256_v38  ;;  %5961 = vmatmul.mubr.f32.gmra.mrb[6].mxu1 %v320_v39  ;;  %v288_v38 = vld [vmem:[%s6989_s30 + $0x138] sm:$0xff] }
  0x87   : > { %5867 = vmatprep.mubr.f32.mxu0 %v257_v40  ;;  %5963 = vmatprep.mubr.f32.mxu1 %v321_v41  ;;  %v352_v39 = vld [vmem:[%s6989_s30 + $0x338] sm:$0xff]  ;;  %v289_v40 = vld [vmem:[%s6989_s30 + $0x140] sm:$0xff] }
  0x88   : > { %v353_v41 = vld [vmem:[%s6989_s30 + $0x340] sm:$0xff] }
  0x8a   : > { %5868 = vmatmul.mubr.f32.gmra.mrb[8].mxu0 %v258_v42  ;;  %5964 = vmatmul.mubr.f32.gmra.mrb[8].mxu1 %v322_v43  ;;  %v290_v42 = vld [vmem:[%s6989_s30 + $0x148] sm:$0xff] }
  0x8b   : > { %5870 = vmatprep.mubr.f32.mxu0 %v259_v44  ;;  %5966 = vmatprep.mubr.f32.mxu1 %v323_v45  ;;  %v354_v43 = vld [vmem:[%s6989_s30 + $0x348] sm:$0xff]  ;;  %v291_v44 = vld [vmem:[%s6989_s30 + $0x150] sm:$0xff] }
  0x8c   : > { %v355_v45 = vld [vmem:[%s6989_s30 + $0x350] sm:$0xff] }
  0x8e   : > { %5871 = vmatmul.mubr.f32.gmra.mrb[10].mxu0 %v260_v46  ;;  %5967 = vmatmul.mubr.f32.gmra.mrb[10].mxu1 %v324_v47  ;;  %v292_v46 = vld [vmem:[%s6989_s30 + $0x158] sm:$0xff] }
  0x8f   : > { %5873 = vmatprep.mubr.f32.mxu0 %v261_v48  ;;  %5969 = vmatprep.mubr.f32.mxu1 %v325_v49  ;;  %v356_v47 = vld [vmem:[%s6989_s30 + $0x358] sm:$0xff]  ;;  %v293_v48 = vld [vmem:[%s6989_s30 + $0x160] sm:$0xff] }
  0x90   : > { %v357_v49 = vld [vmem:[%s6989_s30 + $0x360] sm:$0xff] }
  0x92   : > { %5874 = vmatmul.mubr.f32.gmra.mrb[12].mxu0 %v262_v50  ;;  %5970 = vmatmul.mubr.f32.gmra.mrb[12].mxu1 %v326_v51  ;;  %v294_v50 = vld [vmem:[%s6989_s30 + $0x168] sm:$0xff] }
  0x93   : > { %5876 = vmatprep.mubr.f32.mxu0 %v263_v52  ;;  %5972 = vmatprep.mubr.f32.mxu1 %v327_v53  ;;  %v358_v51 = vld [vmem:[%s6989_s30 + $0x368] sm:$0xff]  ;;  %v295_v52 = vld [vmem:[%s6989_s30 + $0x170] sm:$0xff] }
  0x94   : > { %v359_v53 = vld [vmem:[%s6989_s30 + $0x370] sm:$0xff] }
  0x96   : > { %5877 = vmatmul.mubr.f32.gmra.mrb[14].mxu0 %v264_v54  ;;  %5973 = vmatmul.mubr.f32.gmra.mrb[14].mxu1 %v328_v55  ;;  %v296_v54 = vld [vmem:[%s6989_s30 + $0x178] sm:$0xff] }
  0x97   : > { %5879 = vmatprep.mubr.f32.mxu0 %v265_v56  ;;  %5975 = vmatprep.mubr.f32.mxu1 %v329_v57  ;;  %v360_v55 = vld [vmem:[%s6989_s30 + $0x378] sm:$0xff]  ;;  %v297_v56 = vld [vmem:[%s6989_s30 + $0x180] sm:$0xff] }
  0x98   : > { %v361_v57 = vld [vmem:[%s6989_s30 + $0x380] sm:$0xff] }
  0x9a   : > { %5880 = vmatmul.mubr.f32.gmra.mrb[16].mxu0 %v266_v58  ;;  %5976 = vmatmul.mubr.f32.gmra.mrb[16].mxu1 %v330_v59  ;;  %v298_v58 = vld [vmem:[%s6989_s30 + $0x188] sm:$0xff] }
  0x9b   : > { %5882 = vmatprep.mubr.f32.mxu0 %v267_v60  ;;  %5978 = vmatprep.mubr.f32.mxu1 %v331_v61  ;;  %v362_v59 = vld [vmem:[%s6989_s30 + $0x388] sm:$0xff]  ;;  %v299_v60 = vld [vmem:[%s6989_s30 + $0x190] sm:$0xff] }
  0x9c   : > { %v363_v61 = vld [vmem:[%s6989_s30 + $0x390] sm:$0xff] }
  0x9e   : > { %5883 = vmatmul.mubr.f32.gmra.mrb[18].mxu0 %v268_v62  ;;  %5979 = vmatmul.mubr.f32.gmra.mrb[18].mxu1 %v332_v63  ;;  %v300_v62 = vld [vmem:[%s6989_s30 + $0x198] sm:$0xff] }
  0x9f   : > { %5885 = vmatprep.mubr.f32.mxu0 %v269_v0  ;;  %5981 = vmatprep.mubr.f32.mxu1 %v333_v1  ;;  %v364_v63 = vld [vmem:[%s6989_s30 + $0x398] sm:$0xff]  ;;  %v301_v0 = vld [vmem:[%s6989_s30 + $0x1a0] sm:$0xff] }
  0xa0   : > { %v365_v1 = vld [vmem:[%s6989_s30 + $0x3a0] sm:$0xff] }
  0xa2   : > { %5886 = vmatmul.mubr.f32.gmra.mrb[20].mxu0 %v270_v2  ;;  %5982 = vmatmul.mubr.f32.gmra.mrb[20].mxu1 %v334_v3  ;;  %v302_v2 = vld [vmem:[%s6989_s30 + $0x1a8] sm:$0xff] }
  0xa3   : > { %5888 = vmatprep.mubr.f32.mxu0 %v271_v4  ;;  %5984 = vmatprep.mubr.f32.mxu1 %v335_v5  ;;  %v366_v3 = vld [vmem:[%s6989_s30 + $0x3a8] sm:$0xff]  ;;  %v303_v4 = vld [vmem:[%s6989_s30 + $0x1b0] sm:$0xff] }
  0xa4   : > { %v367_v5 = vld [vmem:[%s6989_s30 + $0x3b0] sm:$0xff] }
  0xa6   : > { %5889 = vmatmul.mubr.f32.gmra.mrb[22].mxu0 %v272_v6  ;;  %5985 = vmatmul.mubr.f32.gmra.mrb[22].mxu1 %v336_v7  ;;  %v304_v6 = vld [vmem:[%s6989_s30 + $0x1b8] sm:$0xff] }
  0xa7   : > { %5891 = vmatprep.mubr.f32.mxu0 %v273_v8  ;;  %5987 = vmatprep.mubr.f32.mxu1 %v337_v9  ;;  %v368_v7 = vld [vmem:[%s6989_s30 + $0x3b8] sm:$0xff]  ;;  %v305_v8 = vld [vmem:[%s6989_s30 + $0x1c0] sm:$0xff] }
  0xa8   : > { %v369_v9 = vld [vmem:[%s6989_s30 + $0x3c0] sm:$0xff] }
  0xaa   : > { %5892 = vmatmul.mubr.f32.gmra.mrb[24].mxu0 %v274_v10  ;;  %5988 = vmatmul.mubr.f32.gmra.mrb[24].mxu1 %v338_v11  ;;  %v306_v10 = vld [vmem:[%s6989_s30 + $0x1c8] sm:$0xff] }
  0xab   : > { %5894 = vmatprep.mubr.f32.mxu0 %v275_v12  ;;  %5990 = vmatprep.mubr.f32.mxu1 %v339_v13  ;;  %v370_v11 = vld [vmem:[%s6989_s30 + $0x3c8] sm:$0xff]  ;;  %v307_v12 = vld [vmem:[%s6989_s30 + $0x1d0] sm:$0xff] }
  0xac   : > { %v371_v13 = vld [vmem:[%s6989_s30 + $0x3d0] sm:$0xff] }
  0xae   : > { %5895 = vmatmul.mubr.f32.gmra.mrb[26].mxu0 %v276_v14  ;;  %5991 = vmatmul.mubr.f32.gmra.mrb[26].mxu1 %v340_v15  ;;  %v308_v14 = vld [vmem:[%s6989_s30 + $0x1d8] sm:$0xff] }
  0xaf   : > { %5897 = vmatprep.mubr.f32.mxu0 %v277_v16  ;;  %5993 = vmatprep.mubr.f32.mxu1 %v341_v17  ;;  %v372_v15 = vld [vmem:[%s6989_s30 + $0x3d8] sm:$0xff]  ;;  %v309_v16 = vld [vmem:[%s6989_s30 + $0x1e0] sm:$0xff] }
  0xb0   : > { %v373_v17 = vld [vmem:[%s6989_s30 + $0x3e0] sm:$0xff] }
  0xb2   : > { %5898 = vmatmul.mubr.f32.gmra.mrb[28].mxu0 %v278_v18  ;;  %5994 = vmatmul.mubr.f32.gmra.mrb[28].mxu1 %v342_v19  ;;  %v310_v18 = vld [vmem:[%s6989_s30 + $0x1e8] sm:$0xff] }
  0xb3   : > { %5900 = vmatprep.mubr.f32.mxu0 %v279_v20  ;;  %5996 = vmatprep.mubr.f32.mxu1 %v343_v21  ;;  %v374_v19 = vld [vmem:[%s6989_s30 + $0x3e8] sm:$0xff]  ;;  %v311_v20 = vld [vmem:[%s6989_s30 + $0x1f0] sm:$0xff] }
  0xb4   : > { %v375_v21 = vld [vmem:[%s6989_s30 + $0x3f0] sm:$0xff] }
  0xb6   : > { %5901 = vmatmul.mubr.f32.gmra.mrb[30].mxu0 %v280_v22  ;;  %5997 = vmatmul.mubr.f32.gmra.mrb[30].mxu1 %v344_v23  ;;  %v312_v22 = vld [vmem:[%s6989_s30 + $0x1f8] sm:$0xff] }
  0xb7   : > { %5903 = vmatprep.mubr.f32.mxu0 %v281_v24  ;;  %5999 = vmatprep.mubr.f32.mxu1 %v345_v25  ;;  %v376_v23 = vld [vmem:[%s6989_s30 + $0x3f8] sm:$0xff]  ;;  %v6822_v24 = vmov 1966171168   ;;  %s5670_s30 = sshll.u32 %s6985_s5, 3 }
  0xb8   : > { %v1101_v25 = vunpack.c.l.s4 %v6822_v24  ;;  %s242_s11 = scalar_lea.vmem [#allocation7], %s5670_s30 }
  0xb9   : > { %s5567_s12 = sshll.u32 %s242_s11, 4  ;;  %s10574_s12 = int_to_ptr.vmem [resolvable:$true] %s5567_s12 }
  0xba   : > { %5904 = vmatmul.mubr.f32.gmra.mrb[32].mxu0 %v282_v26  ;;  %6000 = vmatmul.mubr.f32.gmra.mrb[32].mxu1 %v346_v27  ;;  %v10626_v26 = vlaneseq  ;;  %v1102_v27 = vunpack.c.0.s8 %v1101_v25  ;;  %s6746_s9 = scalar_lea.vmem %s10574_s12, 128  ;;  %p6753_p2 = scmp.lt.s32.totalorder %s10574_s12, %s6751_s29 }
  0xbb   : > { %5906 = vmatprep.mubr.f32.mxu0 %v283_v28  ;;  %6002 = vmatprep.mubr.f32.mxu1 %v347_v29  ;;  %v248_v29 = vld [vmem:[%s246_s26] sm:$0xff]  ;;  %p6747_p9 = scmp.ne.s32.totalorder %s10574_s12, %s6746_s9  ;;  %p6754_p4 = scmp.lt.s32.totalorder %s6752_s8, %s6746_s9 }
  0xbc   : > { %v7181_v28 = vshrl.u32 %v10626_v26, 7 }
  0xbd   : > { %p6748_p5 = pnand %p6747_p9, %p11688_p10  ;;  %p6755_p12 = por %p6754_p4, %p6753_p2 }
  0xbe   : > { %5907 = vmatmul.mubr.f32.gmra.mrb[34].mxu0 %v284_v30  ;;  %6003 = vmatmul.mubr.f32.gmra.mrb[34].mxu1 %v348_v31  ;;  %10934 = vst [vmem:[#allocation11_spill] sm:$0xff] %v7181_v28  ;;  %v7184_v30 = vsub.s32 %v1102_v27, %v7181_v28  ;;  %v1099_v31 = vcombine.high %v248_v29, %v248_v29 }
  0xbf   : > { %5909 = vmatprep.mubr.f32.mxu0 %v285_v32  ;;  %6005 = vmatprep.mubr.f32.mxu1 %v349_v33  ;;  %p6749_p1 = pneg %p6748_p5 }
  0xc0   : > { %v7187_v32 = vrot.slane %v248_v29, %v7184_v30  ;;  %v7190_v33 = vrot.slane %v1099_v31, %v7184_v30 }
  0xc1   : > { %p6756_p0 = pnand %p6755_p12, %p6749_p1 }
  0xc2   : > { %5910 = vmatmul.mubr.f32.gmra.mrb[36].mxu0 %v286_v34  ;;  %6006 = vmatmul.mubr.f32.gmra.mrb[36].mxu1 %v350_v35  ;;  %v7194_v34 = vrot.slane %v7187_v32, %v7184_v30  ;;  %v7197_v35 = vsub.s32 0, %v7181_v28 }
  0xc3   : > { %5912 = vmatprep.mubr.f32.mxu0 %v287_v36  ;;  %6008 = vmatprep.mubr.f32.mxu1 %v351_v37  ;;  %v7201_v36 = vrot.slane %v7190_v33, %v7184_v30 }
  0xc4   : > { %10935 = vst [vmem:[#allocation12_spill] sm:$0xff] %v7197_v35  ;;  %v7205_v37 = vrot.slane %v7194_v34, %v7197_v35 }
  0xc6   : > { %5913 = vmatmul.mubr.f32.gmra.mrb[38].mxu0 %v288_v38  ;;  %6009 = vmatmul.mubr.f32.gmra.mrb[38].mxu1 %v352_v39  ;;  %v7209_v38 = vrot.slane %v7201_v36, %v7197_v35 }
  0xc7   : > { %5915 = vmatprep.mubr.f32.mxu0 %v289_v40  ;;  %6011 = vmatprep.mubr.f32.mxu1 %v353_v41 }
  0xca   : > { %5916 = vmatmul.mubr.f32.gmra.mrb[40].mxu0 %v290_v42  ;;  %6012 = vmatmul.mubr.f32.gmra.mrb[40].mxu1 %v354_v43 }
  0xcb   : > { %5918 = vmatprep.mubr.f32.mxu0 %v291_v44  ;;  %6014 = vmatprep.mubr.f32.mxu1 %v355_v45 }
  0xce   : > { %5919 = vmatmul.mubr.f32.gmra.mrb[42].mxu0 %v292_v46  ;;  %6015 = vmatmul.mubr.f32.gmra.mrb[42].mxu1 %v356_v47 }
  0xcf   : > { %5921 = vmatprep.mubr.f32.mxu0 %v293_v48  ;;  %6017 = vmatprep.mubr.f32.mxu1 %v357_v49 }
  0xd2   : > { %5922 = vmatmul.mubr.f32.gmra.mrb[44].mxu0 %v294_v50  ;;  %6018 = vmatmul.mubr.f32.gmra.mrb[44].mxu1 %v358_v51 }
  0xd3   : > { %5924 = vmatprep.mubr.f32.mxu0 %v295_v52  ;;  %6020 = vmatprep.mubr.f32.mxu1 %v359_v53 }
  0xd6   : > { %5925 = vmatmul.mubr.f32.gmra.mrb[46].mxu0 %v296_v54  ;;  %6021 = vmatmul.mubr.f32.gmra.mrb[46].mxu1 %v360_v55 }
  0xd7   : > { %5927 = vmatprep.mubr.f32.mxu0 %v297_v56  ;;  %6023 = vmatprep.mubr.f32.mxu1 %v361_v57 }
  0xda   : > { %5928 = vmatmul.mubr.f32.gmra.mrb[48].mxu0 %v298_v58  ;;  %6024 = vmatmul.mubr.f32.gmra.mrb[48].mxu1 %v362_v59 }
  0xdb   : > { %5930 = vmatprep.mubr.f32.mxu0 %v299_v60  ;;  %6026 = vmatprep.mubr.f32.mxu1 %v363_v61  ;;  %v7220_v60 = vld [vmem:[#allocation5] ss:$0 sm:$0xff] }
  0xde   : > { %5931 = vmatmul.mubr.f32.gmra.mrb[50].mxu0 %v300_v62  ;;  %6027 = vmatmul.mubr.f32.gmra.mrb[50].mxu1 %v364_v63 }
  0xdf   : > { %5933 = vmatprep.mubr.f32.mxu0 %v301_v0  ;;  %6029 = vmatprep.mubr.f32.mxu1 %v365_v1 }
  0xe2   : > { %5934 = vmatmul.mubr.f32.gmra.mrb[52].mxu0 %v302_v2  ;;  %6030 = vmatmul.mubr.f32.gmra.mrb[52].mxu1 %v366_v3 }
  0xe3   : > { %5936 = vmatprep.mubr.f32.mxu0 %v303_v4  ;;  %6032 = vmatprep.mubr.f32.mxu1 %v367_v5 }
  0xe6   : > { %5937 = vmatmul.mubr.f32.gmra.mrb[54].mxu0 %v304_v6  ;;  %6033 = vmatmul.mubr.f32.gmra.mrb[54].mxu1 %v368_v7 }
  0xe7   : > { %5939 = vmatprep.mubr.f32.mxu0 %v305_v8  ;;  %6035 = vmatprep.mubr.f32.mxu1 %v369_v9 }
  0xea   : > { %5940 = vmatmul.mubr.f32.gmra.mrb[56].mxu0 %v306_v10  ;;  %6036 = vmatmul.mubr.f32.gmra.mrb[56].mxu1 %v370_v11 }
  0xeb   : > { %5942 = vmatprep.mubr.f32.mxu0 %v307_v12  ;;  %6038 = vmatprep.mubr.f32.mxu1 %v371_v13 }
  0xee   : > { %5943 = vmatmul.mubr.f32.gmra.mrb[58].mxu0 %v308_v14  ;;  %6039 = vmatmul.mubr.f32.gmra.mrb[58].mxu1 %v372_v15 }
  0xef   : > { %5945 = vmatprep.mubr.f32.mxu0 %v309_v16  ;;  %6041 = vmatprep.mubr.f32.mxu1 %v373_v17 }
  0xf2   : > { %5946 = vmatmul.mubr.f32.gmra.mrb[60].mxu0 %v310_v18  ;;  %6042 = vmatmul.mubr.f32.gmra.mrb[60].mxu1 %v374_v19 }
  0xf3   : > { %5948 = vmatprep.mubr.f32.mxu0 %v311_v20  ;;  %6044 = vmatprep.mubr.f32.mxu1 %v375_v21 }
  0xf6   : > { %5949 = vmatmul.mubr.f32.gmra.mrb[62].mxu0 %v312_v22  ;;  %6045 = vmatmul.mubr.f32.gmra.mrb[62].mxu1 %v376_v23 }
 0x14d   : > { %v5857_v39 = vpop.f32.mrb[0].mxu0  ;;  %v5953_v40 = vpop.f32.mrb[0].mxu1 }
 0x14e   : > { %v1189_v41 = vadd.f32 %v5857_v39, %v7205_v37  ;;  %v1253_v42 = vadd.f32 %v5953_v40, %v7209_v38  ;;  %v459_v43 = vpop.f32.mrb[1].mxu0  ;;  %v779_v44 = vpop.f32.mrb[1].mxu1 }
 0x14f   : > { %v1188_v45 = vadd.f32 %v7205_v37, %v459_v43  ;;  %v1252_v46 = vadd.f32 %v7209_v38, %v779_v44 }
 0x150   : > { %6159 = vtanh.f32 %v1189_v41 }
 0x151   : > { %6161 = vtanh.f32 %v1253_v42  ;;  %v5860_v47 = vpop.f32.mrb[2].mxu0  ;;  %v5956_v48 = vpop.f32.mrb[2].mxu1 }
 0x152   : > { %6163 = vtanh.f32 %v1188_v45  ;;  %v1191_v49 = vadd.f32 %v5860_v47, %v7205_v37  ;;  %v469_v50 = vpop.f32.mrb[3].mxu0  ;;  %v1255_v51 = vadd.f32 %v5956_v48, %v7209_v38  ;;  %v789_v52 = vpop.f32.mrb[3].mxu1 }
 0x153   : > { %v1254_v55 = vadd.f32 %v7209_v38, %v789_v52  ;;  %v1190_v58 = vadd.f32 %v7205_v37, %v469_v50 }
 0x154   : > { %6165 = vtanh.f32 %v1191_v49 }
 0x155   : > { %6167 = vtanh.f32 %v1252_v46  ;;  %v5863_v53 = vpop.f32.mrb[4].mxu0  ;;  %v5959_v54 = vpop.f32.mrb[4].mxu1 }
 0x156   : > { %6169 = vtanh.f32 %v1255_v51  ;;  %v479_v56 = vpop.f32.mrb[5].mxu0  ;;  %v799_v57 = vpop.f32.mrb[5].mxu1  ;;  %v1193_v61 = vadd.f32 %v5863_v53, %v7205_v37  ;;  %v1257_v8 = vadd.f32 %v5959_v54, %v7209_v38 }
 0x157   : > { %v1192_v59 = vadd.f32 %v7205_v37, %v479_v56  ;;  %6171 = vtanh.f32 %v1254_v55  ;;  %v1256_v7 = vadd.f32 %v7209_v38, %v799_v57 }
 0x158   : > { %6173 = vtanh.f32 %v1190_v58 }
 0x159   : > { %v5866_v62 = vpop.f32.mrb[6].mxu0  ;;  %v5962_v63 = vpop.f32.mrb[6].mxu1  ;;  %6175 = vtanh.f32 %v1192_v59 }
 0x15a   : > { %v6160_v0 = vpop.eup %6159  ;;  %v489_v1 = vpop.f32.mrb[7].mxu0  ;;  %6177 = vtanh.f32 %v1193_v61  ;;  %v1195_v19 = vadd.f32 %v5866_v62, %v7205_v37  ;;  %v1259_v39 = vadd.f32 %v5962_v63, %v7209_v38 }
 0x15b   : > { %v809_v2 = vpop.f32.mrb[7].mxu1  ;;  %v6162_v3 = vpop.eup %6161  ;;  %v1452_v4 = vmul.f32 %v6160_v0, %v7220_v60  ;;  %6179 = vtanh.f32 %v1256_v7  ;;  %v1194_v18 = vadd.f32 %v7205_v37, %v489_v1 }
 0x15c   : > { %v6164_v5 = vpop.eup %6163  ;;  %v1516_v6 = vmul.f32 %v6162_v3, %v7220_v60  ;;  %6181 = vtanh.f32 %v1257_v8  ;;  %v1258_v29 = vadd.f32 %v7209_v38, %v809_v2 }
 0x15d   : > { %1581 = vadd.xlane.f32.xlu0 %v1452_v4  ;;  %v5869_v9 = vpop.f32.mrb[8].mxu0  ;;  %v5965_v10 = vpop.f32.mrb[8].mxu1  ;;  %v1451_v15 = vmul.f32 %v6164_v5, %v7220_v60  ;;  %6183 = vtanh.f32 %v1194_v18 }
 0x15e   : > { %v6166_v11 = vpop.eup %6165  ;;  %1709 = vadd.xlane.f32.xlu1 %v1516_v6  ;;  %v499_v12 = vpop.f32.mrb[9].mxu0  ;;  %6185 = vtanh.f32 %v1195_v19  ;;  %v1197_v49 = vadd.f32 %v5869_v9, %v7205_v37  ;;  %v1261_v59 = vadd.f32 %v5965_v10, %v7209_v38 }
 0x15f   : > { %v819_v13 = vpop.f32.mrb[9].mxu1  ;;  %v6168_v14 = vpop.eup %6167  ;;  %v1454_v16 = vmul.f32 %v6166_v11, %v7220_v60  ;;  %6187 = vtanh.f32 %v1258_v29  ;;  %v1196_v48 = vadd.f32 %v7205_v37, %v499_v12 }
 0x160   : > { %v6170_v17 = vpop.eup %6169  ;;  %v1515_v25 = vmul.f32 %v6168_v14, %v7220_v60  ;;  %6189 = vtanh.f32 %v1259_v39  ;;  %v1260_v58 = vadd.f32 %v7209_v38, %v819_v13 }
 0x161   : > { %1579 = vadd.xlane.f32.xlu0 %v1451_v15  ;;  %v5872_v20 = vpop.f32.mrb[10].mxu0  ;;  %v7231_v21 = vpop.f32.mrb[10].mxu1  ;;  %v1518_v22 = vmul.f32 %v6170_v17, %v7220_v60  ;;  %6191 = vtanh.f32 %v1196_v48 }
 0x162   : > { %1585 = vadd.xlane.f32.xlu1 %v1454_v16  ;;  %v509_v23 = vpop.f32.mrb[11].mxu0  ;;  %v829_v24 = vpop.f32.mrb[11].mxu1  ;;  %6193 = vtanh.f32 %v1197_v49  ;;  %v1199_v6 = vadd.f32 %v5872_v20, %v7205_v37  ;;  %v1263_v16 = vadd.f32 %v7231_v21, %v7209_v38 }
 0x163   : > { %v6172_v27 = vpop.eup %6171  ;;  %6195 = vtanh.f32 %v1260_v58  ;;  %v1198_v5 = vadd.f32 %v7205_v37, %v509_v23  ;;  %v1262_v15 = vadd.f32 %v7209_v38, %v829_v24 }
 0x164   : > { %v6174_v31 = vpop.eup %6173  ;;  %v1517_v46 = vmul.f32 %v6172_v27, %v7220_v60  ;;  %6197 = vtanh.f32 %v1261_v59 }
 0x165   : > { %1707 = vadd.xlane.f32.xlu0 %v1515_v25  ;;  %v7237_v40 = vpop.f32.mrb[12].mxu0  ;;  %v7239_v41 = vpop.f32.mrb[12].mxu1  ;;  %v1453_v47 = vmul.f32 %v6174_v31, %v7220_v60  ;;  %6199 = vtanh.f32 %v1198_v5 }
 0x166   : > { %v6176_v42 = vpop.eup %6175  ;;  %1713 = vadd.xlane.f32.xlu1 %v1518_v22  ;;  %v519_v43 = vpop.f32.mrb[13].mxu0  ;;  %6201 = vtanh.f32 %v1199_v6  ;;  %v1201_v21 = vadd.f32 %v7237_v40, %v7205_v37  ;;  %v1114_v40 = vcombine.high %v7187_v32, %v7187_v32  ;;  %v1265_v49 = vadd.f32 %v7239_v41, %v7209_v38 }
 0x167   : > { %v7241_v44 = vpop.f32.mrb[13].mxu1  ;;  %v6178_v45 = vpop.eup %6177  ;;  %v1455_v50 = vmul.f32 %v6176_v42, %v7220_v60  ;;  %6203 = vtanh.f32 %v1262_v15  ;;  %v1200_v27 = vadd.f32 %v7205_v37, %v519_v43 }
 0x168   : > { %v6180_v53 = vpop.eup %6179  ;;  %v1456_v54 = vmul.f32 %v6178_v45, %v7220_v60  ;;  %6205 = vtanh.f32 %v1263_v16  ;;  %v1264_v48 = vadd.f32 %v7209_v38, %v7241_v44  ;;  %v7326_v41 = vrot.slane %v1114_v40, %v7184_v30 }
 0x169   : > { %1711 = vadd.xlane.f32.xlu0 %v1517_v46  ;;  %v7248_v51 = vpop.f32.mrb[14].mxu0  ;;  %v7250_v52 = vpop.f32.mrb[14].mxu1  ;;  %v1519_v61 = vmul.f32 %v6180_v53, %v7220_v60  ;;  %6207 = vtanh.f32 %v1200_v27 }
 0x16a   : > { %1583 = vadd.xlane.f32.xlu1 %v1453_v47  ;;  %v7253_v55 = vpop.f32.mrb[15].mxu0  ;;  %v7255_v56 = vpop.f32.mrb[15].mxu1  ;;  %6209 = vtanh.f32 %v1201_v21  ;;  %10936 = vst [vmem:[#allocation13_spill] sm:$0xff] %v7326_v41  ;;  %v1267_v15 = vadd.f32 %v7250_v52, %v7209_v38 }
 0x16b   : > { %v6182_v57 = vpop.eup %6181  ;;  %6211 = vtanh.f32 %v1264_v48 }
 0x16c   : > { %v6184_v0 = vpop.eup %6183  ;;  %v1520_v1 = vmul.f32 %v6182_v57, %v7220_v60  ;;  %6213 = vtanh.f32 %v1265_v49 }
 0x16d   : > { %1587 = vadd.xlane.f32.xlu0 %v1455_v50  ;;  %v7260_v62 = vpop.f32.mrb[16].mxu0  ;;  %v7262_v63 = vpop.f32.mrb[16].mxu1  ;;  %v1457_v7 = vmul.f32 %v6184_v0, %v7220_v60  ;;  %v1115_v0 = vcombine.high %v7190_v33, %v7190_v33 }
 0x16e   : > { %1589 = vadd.xlane.f32.xlu1 %v1456_v54  ;;  %v7265_v2 = vpop.f32.mrb[17].mxu0  ;;  %v7267_v3 = vpop.f32.mrb[17].mxu1 }
 0x16f   : > { %v6186_v4 = vpop.eup %6185 }
 0x170   : > { %v6188_v10 = vpop.eup %6187  ;;  %v1458_v11 = vmul.f32 %v6186_v4, %v7220_v60 }
 0x171   : > { %1715 = vadd.xlane.f32.xlu0 %v1519_v61  ;;  %v7272_v8 = vpop.f32.mrb[18].mxu0  ;;  %v7274_v9 = vpop.f32.mrb[18].mxu1  ;;  %v1521_v17 = vmul.f32 %v6188_v10, %v7220_v60  ;;  %v1202_v61 = vadd.f32 %v7205_v37, %v7253_v55 }
 0x172   : > { %1717 = vadd.xlane.f32.xlu1 %v1520_v1  ;;  %v7277_v12 = vpop.f32.mrb[19].mxu0  ;;  %v7279_v13 = vpop.f32.mrb[19].mxu1  ;;  %v1203_v1 = vadd.f32 %v7248_v51, %v7205_v37  ;;  %v7346_v37 = vrot.slane %v7326_v41, %v7197_v35  ;;  %v7349_v51 = vrot.slane %v1115_v0, %v7184_v30 }
 0x173   : > { %v6190_v14 = vpop.eup %6189  ;;  %6215 = vtanh.f32 %v1202_v61 }
 0x174   : > { %v6192_v20 = vpop.eup %6191  ;;  %v1522_v22 = vmul.f32 %v6190_v14, %v7220_v60  ;;  %v1266_v14 = vadd.f32 %v7209_v38, %v7255_v56  ;;  %10937 = vst [vmem:[#allocation14_spill] sm:$0xff] %v7349_v51  ;;  %6217 = vtanh.f32 %v1203_v1  ;;  %v1204_v21 = vadd.f32 %v7346_v37, %v7265_v2 }
 0x175   : > { %1591 = vadd.xlane.f32.xlu0 %v1457_v7  ;;  %v7285_v18 = vpop.f32.mrb[20].mxu0  ;;  %v7287_v19 = vpop.f32.mrb[20].mxu1  ;;  %v1459_v29 = vmul.f32 %v6192_v20, %v7220_v60  ;;  %v7367_v38 = vrot.slane %v7349_v51, %v7197_v35  ;;  %v1205_v52 = vadd.f32 %v7260_v62, %v7346_v37 }
 0x176   : > { %1593 = vadd.xlane.f32.xlu1 %v1458_v11  ;;  %v7290_v23 = vpop.f32.mrb[21].mxu0  ;;  %v7292_v25 = vpop.f32.mrb[21].mxu1  ;;  %6219 = vtanh.f32 %v1266_v14 }
 0x177   : > { %v6194_v24 = vpop.eup %6193  ;;  %6221 = vtanh.f32 %v1267_v15  ;;  %v1269_v62 = vadd.f32 %v7262_v63, %v7367_v38  ;;  %v1207_v63 = vadd.f32 %v7272_v8, %v7346_v37  ;;  %v1271_v8 = vadd.f32 %v7274_v9, %v7367_v38 }
 0x178   : > { %v6196_v42 = vpop.eup %6195  ;;  %v1460_v45 = vmul.f32 %v6194_v24, %v7220_v60  ;;  %6223 = vtanh.f32 %v1204_v21  ;;  %v1209_v9 = vadd.f32 %v7285_v18, %v7346_v37  ;;  %v1273_v18 = vadd.f32 %v7287_v19, %v7367_v38 }
 0x179   : > { %1719 = vadd.xlane.f32.xlu0 %v1521_v17  ;;  %v7298_v31 = vpop.f32.mrb[22].mxu0  ;;  %v7300_v39 = vpop.f32.mrb[22].mxu1  ;;  %v1523_v50 = vmul.f32 %v6196_v42, %v7220_v60  ;;  %6225 = vtanh.f32 %v1205_v52 }
 0x17a   : > { %1721 = vadd.xlane.f32.xlu1 %v1522_v22  ;;  %v7303_v46 = vpop.f32.mrb[23].mxu0  ;;  %v7305_v47 = vpop.f32.mrb[23].mxu1  ;;  %v1211_v19 = vadd.f32 %v7298_v31, %v7346_v37  ;;  %v1275_v31 = vadd.f32 %v7300_v39, %v7367_v38 }
 0x17b   : > { %v6198_v43 = vpop.eup %6197 }
 0x17c   : > { %v6200_v57 = vpop.eup %6199  ;;  %v1524_v58 = vmul.f32 %v6198_v43, %v7220_v60 }
 0x17d   : > { %1595 = vadd.xlane.f32.xlu0 %v1459_v29  ;;  %v7314_v53 = vpop.f32.mrb[24].mxu0  ;;  %v7316_v54 = vpop.f32.mrb[24].mxu1  ;;  %v1461_v4 = vmul.f32 %v6200_v57, %v7220_v60 }
 0x17e   : > { %1597 = vadd.xlane.f32.xlu1 %v1460_v45  ;;  %v7319_v59 = vpop.f32.mrb[25].mxu0  ;;  %v7321_v44 = vpop.f32.mrb[25].mxu1  ;;  %v1213_v39 = vadd.f32 %v7314_v53, %v7346_v37  ;;  %v1277_v53 = vadd.f32 %v7316_v54, %v7367_v38 }
 0x17f   : > { %v6202_v32 = vpop.eup %6201 }
 0x180   : > { %v6204_v7 = vpop.eup %6203  ;;  %v1462_v55 = vmul.f32 %v6202_v32, %v7220_v60 }
 0x181   : > { %1723 = vadd.xlane.f32.xlu0 %v1523_v50  ;;  %v7333_v5 = vpop.f32.mrb[26].mxu0  ;;  %v7335_v6 = vpop.f32.mrb[26].mxu1  ;;  %v1525_v16 = vmul.f32 %v6204_v7, %v7220_v60  ;;  %v1268_v50 = vadd.f32 %v7367_v38, %v7267_v3  ;;  %v1206_v7 = vadd.f32 %v7346_v37, %v7277_v12 }
 0x182   : > { %1725 = vadd.xlane.f32.xlu1 %v1524_v58  ;;  %v7338_v10 = vpop.f32.mrb[27].mxu0  ;;  %v7340_v11 = vpop.f32.mrb[27].mxu1  ;;  %v1215_v54 = vadd.f32 %v7333_v5, %v7346_v37  ;;  %v1279_v5 = vadd.f32 %v7335_v6, %v7367_v38 }
 0x183   : > { %v6206_v33 = vpop.eup %6205  ;;  %6227 = vtanh.f32 %v1268_v50 }
 0x184   : > { %v6208_v22 = vpop.eup %6207  ;;  %v1526_v56 = vmul.f32 %v6206_v33, %v7220_v60  ;;  %6229 = vtanh.f32 %v1269_v62  ;;  %v1208_v62 = vadd.f32 %v7346_v37, %v7290_v23 }
 0x185   : > { %1599 = vadd.xlane.f32.xlu0 %v1461_v4  ;;  %v7354_v17 = vpop.f32.mrb[28].mxu0  ;;  %v7356_v20 = vpop.f32.mrb[28].mxu1  ;;  %v1463_v29 = vmul.f32 %v6208_v22, %v7220_v60  ;;  %6231 = vtanh.f32 %v1206_v7 }
 0x186   : > { %1601 = vadd.xlane.f32.xlu1 %v1462_v55  ;;  %v7359_v24 = vpop.f32.mrb[29].mxu0  ;;  %v7361_v27 = vpop.f32.mrb[29].mxu1  ;;  %6233 = vtanh.f32 %v1207_v63  ;;  %v1217_v6 = vadd.f32 %v7354_v17, %v7346_v37  ;;  %v1281_v17 = vadd.f32 %v7356_v20, %v7367_v38  ;;  %v1144_v20 = vcombine.high %v7194_v34, %v7194_v34 }
 0x187   : > { %v6210_v30 = vpop.eup %6209 }
 0x188   : > { %v6212_v43 = vpop.eup %6211  ;;  %v1464_v48 = vmul.f32 %v6210_v30, %v7220_v60  ;;  %v1270_v30 = vadd.f32 %v7367_v38, %v7279_v13 }
 0x189   : > { %1727 = vadd.xlane.f32.xlu0 %v1525_v16  ;;  %v7372_v42 = vpop.f32.mrb[30].mxu0  ;;  %v7374_v45 = vpop.f32.mrb[30].mxu1  ;;  %v1527_v57 = vmul.f32 %v6212_v43, %v7220_v60 }
 0x18a   : > { %1729 = vadd.xlane.f32.xlu1 %v1526_v56  ;;  %v7377_v2 = vpop.f32.mrb[31].mxu0  ;;  %v7379_v40 = vpop.f32.mrb[31].mxu1  ;;  %6235 = vtanh.f32 %v1270_v30 }
 0x18b   : > { %v6214_v49 = vpop.eup %6213  ;;  %6237 = vtanh.f32 %v1271_v8 }
 0x18c   : > { %v6216_v61 = vpop.eup %6215  ;;  %v1528_v0 = vmul.f32 %v6214_v49, %v7220_v60  ;;  %6239 = vtanh.f32 %v1208_v62 }
 0x18d   : > { %1603 = vadd.xlane.f32.xlu0 %v1463_v29  ;;  %v7386_v58 = vpop.f32.mrb[32].mxu0  ;;  %v7388_v32 = vpop.f32.mrb[32].mxu1  ;;  %v1465_v55 = vmul.f32 %v6216_v61, %v7220_v60  ;;  %6241 = vtanh.f32 %v1209_v9 }
 0x18e   : > { %1605 = vadd.xlane.f32.xlu1 %v1464_v48  ;;  %v7391_v1 = vpop.f32.mrb[33].mxu0  ;;  %v7393_v4 = vpop.f32.mrb[33].mxu1 }
 0x18f   : > { %v6218_v3 = vpop.eup %6217 }
 0x190   : > { %v6220_v15 = vpop.eup %6219  ;;  %v1466_v16 = vmul.f32 %v6218_v3, %v7220_v60 }
 0x191   : > { %1731 = vadd.xlane.f32.xlu0 %v1527_v57  ;;  %v7400_v33 = vpop.f32.mrb[34].mxu0  ;;  %v7402_v14 = vpop.f32.mrb[34].mxu1  ;;  %v1529_v21 = vmul.f32 %v6220_v15, %v7220_v60  ;;  %v1272_v15 = vadd.f32 %v7367_v38, %v7292_v25 }
 0x192   : > { %1733 = vadd.xlane.f32.xlu1 %v1528_v0  ;;  %v7405_v22 = vpop.f32.mrb[35].mxu0  ;;  %v7407_v56 = vpop.f32.mrb[35].mxu1 }
 0x193   : > { %v6222_v12 = vpop.eup %6221  ;;  %6243 = vtanh.f32 %v1272_v15 }
 0x194   : > { %v6224_v43 = vpop.eup %6223  ;;  %v1530_v48 = vmul.f32 %v6222_v12, %v7220_v60  ;;  %6245 = vtanh.f32 %v1273_v18  ;;  %v1274_v18 = vadd.f32 %v7367_v38, %v7305_v47 }
 0x195   : > { %1607 = vadd.xlane.f32.xlu0 %v1465_v55  ;;  %v7414_v52 = vpop.f32.mrb[36].mxu0  ;;  %v7416_v29 = vpop.f32.mrb[36].mxu1  ;;  %v1467_v57 = vmul.f32 %v6224_v43, %v7220_v60 }
 0x196   : > { %1609 = vadd.xlane.f32.xlu1 %v1466_v16  ;;  %v7419_v49 = vpop.f32.mrb[37].mxu0  ;;  %v7421_v50 = vpop.f32.mrb[37].mxu1 }
 0x197   : > { %v6226_v13 = vpop.eup %6225 }
 0x198   : > { %v6228_v3 = vpop.eup %6227  ;;  %v1468_v7 = vmul.f32 %v6226_v13, %v7220_v60  ;;  %v1210_v13 = vadd.f32 %v7346_v37, %v7303_v46 }
 0x199   : > { %1735 = vadd.xlane.f32.xlu0 %v1529_v21  ;;  %v7428_v61 = vpop.f32.mrb[38].mxu0  ;;  %v7430_v0 = vpop.f32.mrb[38].mxu1  ;;  %v1531_v16 = vmul.f32 %v6228_v3, %v7220_v60 }
 0x19a   : > { %1737 = vadd.xlane.f32.xlu1 %v1530_v48  ;;  %v7433_v63 = vpop.f32.mrb[39].mxu0  ;;  %v7435_v55 = vpop.f32.mrb[39].mxu1  ;;  %6247 = vtanh.f32 %v1210_v13 }
 0x19b   : > { %v6230_v23 = vpop.eup %6229  ;;  %6249 = vtanh.f32 %v1211_v19  ;;  %v1212_v19 = vadd.f32 %v7346_v37, %v7319_v59 }
 0x19c   : > { %v6232_v8 = vpop.eup %6231  ;;  %v1532_v21 = vmul.f32 %v6230_v23, %v7220_v60  ;;  %6251 = vtanh.f32 %v1274_v18 }
 0x19d   : > { %1611 = vadd.xlane.f32.xlu0 %v1467_v57  ;;  %v7442_v12 = vpop.f32.mrb[40].mxu0  ;;  %v7444_v30 = vpop.f32.mrb[40].mxu1  ;;  %v1469_v62 = vmul.f32 %v6232_v8, %v7220_v60  ;;  %6253 = vtanh.f32 %v1275_v31  ;;  %v1276_v31 = vadd.f32 %v7367_v38, %v7321_v44 }
 0x19e   : > { %1613 = vadd.xlane.f32.xlu1 %v1468_v7  ;;  %v7447_v43 = vpop.f32.mrb[41].mxu0  ;;  %v7449_v48 = vpop.f32.mrb[41].mxu1  ;;  %6255 = vtanh.f32 %v1212_v19 }
 0x19f   : > { %v6234_v25 = vpop.eup %6233  ;;  %6257 = vtanh.f32 %v1213_v39  ;;  %v1214_v39 = vadd.f32 %v7346_v37, %v7338_v10 }
 0x1a0   : > { %v6236_v3 = vpop.eup %6235  ;;  %v1470_v7 = vmul.f32 %v6234_v25, %v7220_v60  ;;  %6259 = vtanh.f32 %v1276_v31 }
 0x1a1   : > { %1739 = vadd.xlane.f32.xlu0 %v1531_v16  ;;  %v7456_v9 = vpop.f32.mrb[42].mxu0  ;;  %v7458_v57 = vpop.f32.mrb[42].mxu1  ;;  %v1533_v16 = vmul.f32 %v6236_v3, %v7220_v60  ;;  %6261 = vtanh.f32 %v1277_v53  ;;  %v1278_v53 = vadd.f32 %v7367_v38, %v7340_v11 }
 0x1a2   : > { %1741 = vadd.xlane.f32.xlu1 %v1532_v21  ;;  %v7461_v23 = vpop.f32.mrb[43].mxu0  ;;  %v7463_v15 = vpop.f32.mrb[43].mxu1  ;;  %6263 = vtanh.f32 %v1214_v39 }
 0x1a3   : > { %v6238_v46 = vpop.eup %6237  ;;  %6265 = vtanh.f32 %v1215_v54  ;;  %v1216_v54 = vadd.f32 %v7346_v37, %v7359_v24 }
 0x1a4   : > { %v6240_v25 = vpop.eup %6239  ;;  %v1534_v26 = vmul.f32 %v6238_v46, %v7220_v60  ;;  %6267 = vtanh.f32 %v1278_v53 }
 0x1a5   : > { %1615 = vadd.xlane.f32.xlu0 %v1469_v62  ;;  %v7470_v8 = vpop.f32.mrb[44].mxu0  ;;  %v7472_v21 = vpop.f32.mrb[44].mxu1  ;;  %v1471_v62 = vmul.f32 %v6240_v25, %v7220_v60  ;;  %6269 = vtanh.f32 %v1279_v5  ;;  %v1280_v5 = vadd.f32 %v7367_v38, %v7361_v27 }
 0x1a6   : > { %1617 = vadd.xlane.f32.xlu1 %v1470_v7  ;;  %v7475_v28 = vpop.f32.mrb[45].mxu0  ;;  %v7477_v13 = vpop.f32.mrb[45].mxu1  ;;  %6271 = vtanh.f32 %v1216_v54 }
 0x1a7   : > { %v6242_v47 = vpop.eup %6241  ;;  %6273 = vtanh.f32 %v1217_v6  ;;  %v1218_v6 = vadd.f32 %v7346_v37, %v7377_v2 }
 0x1a8   : > { %v6244_v46 = vpop.eup %6243  ;;  %v1472_v51 = vmul.f32 %v6242_v47, %v7220_v60  ;;  %6275 = vtanh.f32 %v1280_v5 }
 0x1a9   : > { %1743 = vadd.xlane.f32.xlu0 %v1533_v16  ;;  %v7484_v3 = vpop.f32.mrb[46].mxu0  ;;  %v7486_v7 = vpop.f32.mrb[46].mxu1  ;;  %v1535_v16 = vmul.f32 %v6244_v46, %v7220_v60 }
 0x1aa   : > { %10938 = vst [vmem:[#allocation15_spill] sm:$0xff] %v7486_v7  ;;  %1745 = vadd.xlane.f32.xlu1 %v1534_v26  ;;  %v7489_v41 = vpop.f32.mrb[47].mxu0  ;;  %v7491_v18 = vpop.f32.mrb[47].mxu1 }
 0x1ab   : > { %10939 = vst [vmem:[#allocation16_spill] sm:$0xff] %v7491_v18  ;;  %v6246_v59 = vpop.eup %6245  ;;  %6277 = vtanh.f32 %v1281_v17  ;;  %v1282_v17 = vadd.f32 %v7367_v38, %v7379_v40 }
 0x1ac   : > { %v6248_v47 = vpop.eup %6247  ;;  %v1536_v7 = vmul.f32 %v6246_v59, %v7220_v60  ;;  %6279 = vtanh.f32 %v1218_v6 }
 0x1ad   : > { %1619 = vadd.xlane.f32.xlu0 %v1471_v62  ;;  %v7498_v25 = vpop.f32.mrb[48].mxu0  ;;  %v7500_v26 = vpop.f32.mrb[48].mxu1  ;;  %v1473_v62 = vmul.f32 %v6248_v47, %v7220_v60 }
 0x1ae   : > { %10940 = vst [vmem:[#allocation17_spill] sm:$0xff] %v7500_v26  ;;  %1621 = vadd.xlane.f32.xlu1 %v1472_v51  ;;  %v7503_v18 = vpop.f32.mrb[49].mxu0  ;;  %v7505_v19 = vpop.f32.mrb[49].mxu1 }
 0x1af   : > { %10941 = vst [vmem:[#allocation18_spill] sm:$0xff] %v7505_v19  ;;  %v6250_v44 = vpop.eup %6249 }
 0x1b0   : > { %v6252_v59 = vpop.eup %6251  ;;  %v1474_v26 = vmul.f32 %v6250_v44, %v7220_v60 }
 0x1b1   : > { %1747 = vadd.xlane.f32.xlu0 %v1535_v16  ;;  %v7512_v46 = vpop.f32.mrb[50].mxu0  ;;  %v7514_v51 = vpop.f32.mrb[50].mxu1  ;;  %v1537_v16 = vmul.f32 %v6252_v59, %v7220_v60 }
 0x1b2   : > { %10942 = vst [vmem:[#allocation19_spill] sm:$0xff] %v7514_v51  ;;  %1749 = vadd.xlane.f32.xlu1 %v1536_v7  ;;  %v7517_v19 = vpop.f32.mrb[51].mxu0  ;;  %v7519_v31 = vpop.f32.mrb[51].mxu1 }
 0x1b3   : > { %10943 = vst [vmem:[#allocation20_spill] sm:$0xff] %v7519_v31  ;;  %v6254_v10 = vpop.eup %6253 }
 0x1b4   : > { %v6256_v44 = vpop.eup %6255  ;;  %v1538_v51 = vmul.f32 %v6254_v10, %v7220_v60 }
 0x1b5   : > { %1623 = vadd.xlane.f32.xlu0 %v1473_v62  ;;  %v7526_v47 = vpop.f32.mrb[52].mxu0  ;;  %v7528_v7 = vpop.f32.mrb[52].mxu1  ;;  %v1475_v62 = vmul.f32 %v6256_v44, %v7220_v60 }
 0x1b6   : > { %10944 = vst [vmem:[#allocation21_spill] sm:$0xff] %v7528_v7  ;;  %1625 = vadd.xlane.f32.xlu1 %v1474_v26  ;;  %v7531_v31 = vpop.f32.mrb[53].mxu0  ;;  %v7533_v39 = vpop.f32.mrb[53].mxu1 }
 0x1b7   : > { %10945 = vst [vmem:[#allocation22_spill] sm:$0xff] %v7533_v39  ;;  %v6258_v11 = vpop.eup %6257 }
 0x1b8   : > { %v6260_v10 = vpop.eup %6259  ;;  %v1476_v7 = vmul.f32 %v6258_v11, %v7220_v60 }
 0x1b9   : > { %1751 = vadd.xlane.f32.xlu0 %v1537_v16  ;;  %v7540_v59 = vpop.f32.mrb[54].mxu0  ;;  %v7542_v26 = vpop.f32.mrb[54].mxu1  ;;  %v1539_v16 = vmul.f32 %v6260_v10, %v7220_v60 }
 0x1ba   : > { %10946 = vst [vmem:[#allocation23_spill] sm:$0xff] %v7542_v26  ;;  %1753 = vadd.xlane.f32.xlu1 %v1538_v51  ;;  %v7545_v39 = vpop.f32.mrb[55].mxu0  ;;  %v7547_v53 = vpop.f32.mrb[55].mxu1 }
 0x1bb   : > { %10947 = vst [vmem:[#allocation24_spill] sm:$0xff] %v7547_v53  ;;  %v6262_v24 = vpop.eup %6261 }
 0x1bc   : > { %v6264_v11 = vpop.eup %6263  ;;  %v1540_v26 = vmul.f32 %v6262_v24, %v7220_v60 }
 0x1bd   : > { %1627 = vadd.xlane.f32.xlu0 %v1475_v62  ;;  %v7554_v44 = vpop.f32.mrb[56].mxu0  ;;  %v7556_v51 = vpop.f32.mrb[56].mxu1  ;;  %v1219_v62 = vadd.f32 %v7372_v42, %v7346_v37  ;;  %v7582_v37 = vrot.slane %v1144_v20, %v7197_v35  ;;  %v1145_v42 = vcombine.high %v7201_v36, %v7201_v36 }
 0x1be   : > { %10948 = vst [vmem:[#allocation25_spill] sm:$0xff] %v7556_v51  ;;  %1629 = vadd.xlane.f32.xlu1 %v1476_v7  ;;  %v7559_v53 = vpop.f32.mrb[57].mxu0  ;;  %v7561_v54 = vpop.f32.mrb[57].mxu1  ;;  %v1477_v7 = vmul.f32 %v6264_v11, %v7220_v60 }
 0x1bf   : > { %10949 = vst [vmem:[#allocation26_spill] sm:$0xff] %v7561_v54  ;;  %v6266_v27 = vpop.eup %6265  ;;  %6281 = vtanh.f32 %v1219_v62  ;;  %v1220_v62 = vadd.f32 %v7582_v37, %v7391_v1 }
 0x1c0   : > { %v6268_v51 = vpop.eup %6267  ;;  %v1478_v5 = vmul.f32 %v6266_v27, %v7220_v60  ;;  %6283 = vtanh.f32 %v1282_v17 }
 0x1c1   : > { %1755 = vadd.xlane.f32.xlu0 %v1539_v16  ;;  %v7570_v10 = vpop.f32.mrb[58].mxu0  ;;  %v7572_v24 = vpop.f32.mrb[58].mxu1  ;;  %v1541_v16 = vmul.f32 %v6268_v51, %v7220_v60 }
 0x1c2   : > { %10950 = vst [vmem:[#allocation27_spill] sm:$0xff] %v7572_v24  ;;  %1757 = vadd.xlane.f32.xlu1 %v1540_v26  ;;  %v7575_v54 = vpop.f32.mrb[59].mxu0  ;;  %v7577_v2 = vpop.f32.mrb[59].mxu1  ;;  %v1283_v26 = vadd.f32 %v7374_v45, %v7367_v38  ;;  %v7601_v38 = vrot.slane %v1145_v42, %v7197_v35  ;;  %v1221_v45 = vadd.f32 %v7386_v58, %v7582_v37 }
 0x1c3   : > { %v6270_v34 = vpop.eup %6269 }
 0x1c4   : > { %v6272_v6 = vpop.eup %6271  ;;  %v1542_v40 = vmul.f32 %v6270_v34, %v7220_v60  ;;  %6285 = vtanh.f32 %v1283_v26  ;;  %v1284_v26 = vadd.f32 %v7601_v38, %v7393_v4  ;;  %v1285_v58 = vadd.f32 %v7388_v32, %v7601_v38 }
 0x1c5   : > { %1631 = vadd.xlane.f32.xlu0 %v1477_v7  ;;  %v7589_v11 = vpop.f32.mrb[60].mxu0  ;;  %v7591_v27 = vpop.f32.mrb[60].mxu1  ;;  %v1479_v51 = vmul.f32 %v6272_v6, %v7220_v60  ;;  %6287 = vtanh.f32 %v1220_v62  ;;  %v1223_v4 = vadd.f32 %v7400_v33, %v7582_v37 }
 0x1c6   : > { %10951 = vst [vmem:[#allocation28_spill] sm:$0xff] %v7591_v27  ;;  %1633 = vadd.xlane.f32.xlu1 %v1478_v5  ;;  %v7594_v20 = vpop.f32.mrb[61].mxu0  ;;  %v7596_v24 = vpop.f32.mrb[61].mxu1  ;;  %6289 = vtanh.f32 %v1221_v45 }
 0x1c7   : > { %v6274_v36 = vpop.eup %6273  ;;  %6291 = vtanh.f32 %v1284_v26 }
 0x1c8   : > { %v6276_v34 = vpop.eup %6275  ;;  %v1480_v17 = vmul.f32 %v6274_v36, %v7220_v60  ;;  %6293 = vtanh.f32 %v1285_v58  ;;  %v1224_v58 = vadd.f32 %v7582_v37, %v7419_v49  ;;  %v1289_v49 = vadd.f32 %v7416_v29, %v7601_v38 }
 0x1c9   : > { %1759 = vadd.xlane.f32.xlu0 %v1541_v16  ;;  %v7606_v7 = vpop.f32.mrb[62].mxu0  ;;  %v7608_v5 = vpop.f32.mrb[62].mxu1  ;;  %v1543_v16 = vmul.f32 %v6276_v34, %v7220_v60  ;;  %v1286_v34 = vadd.f32 %v7601_v38, %v7407_v56  ;;  %v1225_v56 = vadd.f32 %v7414_v52, %v7582_v37 }
 0x1ca   : > { %10952 = vst [vmem:[#allocation29_spill] sm:$0xff] %v7608_v5  ;;  %1761 = vadd.xlane.f32.xlu1 %v1542_v40  ;;  %v7611_v27 = vpop.f32.mrb[63].mxu0  ;;  %v7613_v1 = vpop.f32.mrb[63].mxu1  ;;  %v1222_v5 = vadd.f32 %v7582_v37, %v7405_v22  ;;  %v1287_v22 = vadd.f32 %v7402_v14, %v7601_v38 }
 0x1cb   : > { %v6278_v42 = vpop.eup %6277 }
 0x1cc   : > { %v6280_v6 = vpop.eup %6279  ;;  %v1544_v40 = vmul.f32 %v6278_v42, %v7220_v60  ;;  %6295 = vtanh.f32 %v1222_v5 }
 0x1cd   : > { %1635 = vadd.xlane.f32.xlu0 %v1479_v51  ;;  %v6282_v36 = vpop.eup %6281  ;;  %v1481_v62 = vmul.f32 %v6280_v6, %v7220_v60  ;;  %6297 = vtanh.f32 %v1223_v4 }
 0x1ce   : > { %1637 = vadd.xlane.f32.xlu1 %v1480_v17  ;;  %v6284_v45 = vpop.eup %6283  ;;  %v1482_v32 = vmul.f32 %v6282_v36, %v7220_v60  ;;  %6299 = vtanh.f32 %v1286_v34 }
 0x1cf   : > { %v6286_v51 = vpop.eup %6285  ;;  %v1545_v17 = vmul.f32 %v6284_v45, %v7220_v60  ;;  %6301 = vtanh.f32 %v1287_v22  ;;  %v1226_v45 = vadd.f32 %v7582_v37, %v7433_v63  ;;  %v1290_v22 = vadd.f32 %v7601_v38, %v7435_v55 }
 0x1d0   : > { %v6288_v42 = vpop.eup %6287  ;;  %v1546_v33 = vmul.f32 %v6286_v51, %v7220_v60  ;;  %6303 = vtanh.f32 %v1224_v58  ;;  %v1291_v63 = vadd.f32 %v7430_v0, %v7601_v38  ;;  %v1229_v55 = vadd.f32 %v7442_v12, %v7582_v37 }
 0x1d1   : > { %1763 = vadd.xlane.f32.xlu0 %v1543_v16  ;;  %v6290_v26 = vpop.eup %6289  ;;  %v1483_v5 = vmul.f32 %v6288_v42, %v7220_v60  ;;  %6305 = vtanh.f32 %v1225_v56  ;;  %v1293_v12 = vadd.f32 %v7444_v30, %v7601_v38  ;;  %v1231_v30 = vadd.f32 %v7456_v9, %v7582_v37 }
 0x1d2   : > { %1765 = vadd.xlane.f32.xlu1 %v1544_v40  ;;  %v6292_v16 = vpop.eup %6291  ;;  %v1484_v14 = vmul.f32 %v6290_v26, %v7220_v60  ;;  %v1288_v40 = vadd.f32 %v7601_v38, %v7421_v50  ;;  %v1227_v50 = vadd.f32 %v7428_v61, %v7582_v37  ;;  %v1228_v26 = vadd.f32 %v7582_v37, %v7447_v43 }
 0x1d3   : > { %v6294_v6 = vpop.eup %6293  ;;  %v1547_v36 = vmul.f32 %v6292_v16, %v7220_v60  ;;  %v1292_v43 = vadd.f32 %v7601_v38, %v7449_v48  ;;  %v1230_v48 = vadd.f32 %v7582_v37, %v7461_v23  ;;  %v1294_v23 = vadd.f32 %v7601_v38, %v7463_v15 }
 0x1d4   : > { %v1548_v52 = vmul.f32 %v6294_v6, %v7220_v60  ;;  %6307 = vtanh.f32 %v1288_v40  ;;  %v1295_v9 = vadd.f32 %v7458_v57, %v7601_v38  ;;  %v1232_v15 = vadd.f32 %v7582_v37, %v7475_v28 }
 0x1d5   : > { %1639 = vadd.xlane.f32.xlu0 %v1481_v62  ;;  %6309 = vtanh.f32 %v1289_v49  ;;  %v1233_v57 = vadd.f32 %v7470_v8, %v7582_v37  ;;  %v1296_v28 = vadd.f32 %v7601_v38, %v7477_v13  ;;  %v1297_v8 = vadd.f32 %v7472_v21, %v7601_v38 }
 0x1d6   : > { %1641 = vadd.xlane.f32.xlu1 %v1482_v32  ;;  %v6296_v4 = vpop.eup %6295  ;;  %6311 = vtanh.f32 %v1226_v45  ;;  %v1234_v13 = vadd.f32 %v7582_v37, %v7489_v41  ;;  %v1235_v21 = vadd.f32 %v7484_v3, %v7582_v37  ;;  %v10968_v41 = vld [vmem:[#allocation16_spill] sm:$0xff]  ;;  %v10970_v37 = vld [vmem:[#allocation15_spill] sm:$0xff] }
 0x1d7   : > { %v6298_v62 = vpop.eup %6297  ;;  %v1485_v32 = vmul.f32 %v6296_v4, %v7220_v60  ;;  %6313 = vtanh.f32 %v1227_v50 }
 0x1d8   : > { %v6300_v51 = vpop.eup %6299  ;;  %v1486_v29 = vmul.f32 %v6298_v62, %v7220_v60  ;;  %6315 = vtanh.f32 %v1290_v22  ;;  %v7681_v62 = vld [vmem:[#allocation5] ss:$0 sm:$0xff] }
 0x1d9   : > { %1767 = vadd.xlane.f32.xlu0 %v1545_v17  ;;  %v6302_v34 = vpop.eup %6301  ;;  %v1549_v17 = vmul.f32 %v6300_v51, %v7220_v60  ;;  %6317 = vtanh.f32 %v1291_v63 }
 0x1da   : > { %1769 = vadd.xlane.f32.xlu1 %v1546_v33  ;;  %v6304_v42 = vpop.eup %6303  ;;  %v1550_v61 = vmul.f32 %v6302_v34, %v7220_v60  ;;  %6319 = vtanh.f32 %v1228_v26 }
 0x1db   : > { %v6306_v33 = vpop.eup %6305  ;;  %v1487_v58 = vmul.f32 %v6304_v42, %v7220_v60  ;;  %6321 = vtanh.f32 %v1229_v55 }
 0x1dc   : > { %6323 = vtanh.f32 %v1292_v43 }
 0x1dd   : > { %1643 = vadd.xlane.f32.xlu0 %v1483_v5  ;;  %v1488_v5 = vmul.f32 %v6306_v33, %v7220_v60  ;;  %6325 = vtanh.f32 %v1293_v12 }
 0x1de   : > { %1645 = vadd.xlane.f32.xlu1 %v1484_v14  ;;  %v6308_v56 = vpop.eup %6307  ;;  %6327 = vtanh.f32 %v1230_v48 }
 0x1df   : > { %v6310_v16 = vpop.eup %6309  ;;  %v1551_v6 = vmul.f32 %v6308_v56, %v7220_v60  ;;  %6329 = vtanh.f32 %v1231_v30 }
 0x1e0   : > { %v6312_v40 = vpop.eup %6311  ;;  %6331 = vtanh.f32 %v1294_v23 }
 0x1e1   : > { %1771 = vadd.xlane.f32.xlu0 %v1547_v36  ;;  %v1552_v36 = vmul.f32 %v6310_v16, %v7220_v60  ;;  %v6314_v4 = vpop.eup %6313  ;;  %v1489_v45 = vmul.f32 %v7681_v62, %v6312_v40  ;;  %6333 = vtanh.f32 %v1295_v9  ;;  %v1298_v9 = vadd.f32 %v7601_v38, %v10968_v41 }
 0x1e2   : > { %1773 = vadd.xlane.f32.xlu1 %v1548_v52  ;;  %v6316_v50 = vpop.eup %6315  ;;  %v1490_v60 = vmul.f32 %v7681_v62, %v6314_v4  ;;  %6335 = vtanh.f32 %v1232_v15  ;;  %v10965_v4 = vld [vmem:[#allocation13_spill] sm:$0xff] }
 0x1e3   : > { %v6318_v51 = vpop.eup %6317  ;;  %v1553_v34 = vmul.f32 %v7681_v62, %v6316_v50  ;;  %6337 = vtanh.f32 %v1233_v57  ;;  %v1146_v48 = vcombine.high %v10965_v4, %v10965_v4 }
 0x1e4   : > { %v6320_v22 = vpop.eup %6319  ;;  %6339 = vtanh.f32 %v1296_v28 }
 0x1e5   : > { %1647 = vadd.xlane.f32.xlu0 %v1485_v32  ;;  %v6322_v42 = vpop.eup %6321  ;;  %v1491_v33 = vmul.f32 %v7681_v62, %v6320_v22  ;;  %6341 = vtanh.f32 %v1297_v8  ;;  %v10969_v22 = vld [vmem:[#allocation14_spill] sm:$0xff] }
 0x1e6   : > { %1649 = vadd.xlane.f32.xlu1 %v1486_v29  ;;  %v6324_v26 = vpop.eup %6323  ;;  %6343 = vtanh.f32 %v1234_v13  ;;  %v1147_v3 = vcombine.high %v10969_v22, %v10969_v22 }
 0x1e7   : > { %v6326_v56 = vpop.eup %6325  ;;  %v1555_v16 = vmul.f32 %v7681_v62, %v6324_v26  ;;  %6345 = vtanh.f32 %v1235_v21 }
 0x1e8   : > { %v6328_v43 = vpop.eup %6327  ;;  %6347 = vtanh.f32 %v1298_v9  ;;  %v7749_v28 = vrot.slane %v1147_v3, %v7197_v35 }
 0x1e9   : > { %1775 = vadd.xlane.f32.xlu0 %v1549_v17  ;;  %v1554_v17 = vmul.f32 %v7681_v62, %v6318_v51  ;;  %v6330_v40 = vpop.eup %6329  ;;  %v1493_v30 = vmul.f32 %v7681_v62, %v6328_v43 }
 0x1ea   : > { %1777 = vadd.xlane.f32.xlu1 %v1550_v61  ;;  %v7662_v0 = vpop.xlane.xlu0 %1581 }
 0x1eb   : > { %10953 = vst [vmem:[#allocation30_spill] sm:$0xff] %v7662_v0  ;;  %v7665_v14 = vpop.xlane.xlu1 %1709 }
 0x1ec   : > { %10954 = vst [vmem:[#allocation31_spill] sm:$0xff] %v7665_v14 }
 0x1ed   : > { %1651 = vadd.xlane.f32.xlu0 %v1487_v58  ;;  %v1492_v58 = vmul.f32 %v7681_v62, %v6322_v42 }
 0x1ee   : > { %1653 = vadd.xlane.f32.xlu1 %v1488_v5  ;;  %v7672_v49 = vpop.xlane.xlu0 %1579 }
 0x1ef   : > { %10955 = vst [vmem:[#allocation32_spill] sm:$0xff] %v7672_v49  ;;  %v7675_v52 = vpop.xlane.xlu1 %1585 }
 0x1f0   : > { %10956 = vst [vmem:[#allocation33_spill] sm:$0xff] %v7675_v52 }
 0x1f1   : > { %1779 = vadd.xlane.f32.xlu0 %v1551_v6  ;;  %v1556_v6 = vmul.f32 %v7681_v62, %v6326_v56 }
 0x1f2   : > { %1781 = vadd.xlane.f32.xlu1 %v1552_v36  ;;  %v7684_v32 = vpop.xlane.xlu0 %1707 }
 0x1f3   : > { %10957 = vst [vmem:[#allocation34_spill] sm:$0xff] %v7684_v32  ;;  %v7687_v29 = vpop.xlane.xlu1 %1713 }
 0x1f4   : > { %10958 = vst [vmem:[#allocation35_spill] sm:$0xff] %v7687_v29 }
 0x1f5   : > { %1655 = vadd.xlane.f32.xlu0 %v1489_v45  ;;  %v6332_v45 = vpop.eup %6331 }
 0x1f6   : > { %1657 = vadd.xlane.f32.xlu1 %v1490_v60  ;;  %v7694_v63 = vpop.xlane.xlu0 %1711  ;;  %v1494_v60 = vmul.f32 %v7681_v62, %v6330_v40  ;;  %v6334_v51 = vpop.eup %6333  ;;  %v1557_v42 = vmul.f32 %v7681_v62, %v6332_v45 }
 0x1f7   : > { %10959 = vst [vmem:[#allocation36_spill] sm:$0xff] %v7694_v63  ;;  %v7697_v61 = vpop.xlane.xlu1 %1583  ;;  %v6336_v15 = vpop.eup %6335 }
 0x1f8   : > { %10960 = vst [vmem:[#allocation37_spill] sm:$0xff] %v7697_v61  ;;  %v6338_v26 = vpop.eup %6337  ;;  %v1495_v8 = vmul.f32 %v7681_v62, %v6336_v15 }
 0x1f9   : > { %1783 = vadd.xlane.f32.xlu0 %v1553_v34  ;;  %v7734_v34 = vrot.slane %v1146_v48, %v7197_v35  ;;  %v10976_v48 = vld [vmem:[#allocation17_spill] sm:$0xff] }
 0x1fa   : > { %1785 = vadd.xlane.f32.xlu1 %v1554_v17  ;;  %v7704_v55 = vpop.xlane.xlu0 %1587  ;;  %v1299_v17 = vadd.f32 %v10970_v37, %v7601_v38 }
 0x1fb   : > { %10961 = vst [vmem:[#allocation38_spill] sm:$0xff] %v7704_v55  ;;  %v7707_v5 = vpop.xlane.xlu1 %1589  ;;  %v1236_v56 = vadd.f32 %v7734_v34, %v7503_v18  ;;  %v1237_v38 = vadd.f32 %v7498_v25, %v7734_v34  ;;  %v10975_v18 = vld [vmem:[#allocation18_spill] sm:$0xff]  ;;  %v1301_v25 = vadd.f32 %v10976_v48, %v7749_v28  ;;  %v1238_v9 = vadd.f32 %v7734_v34, %v7517_v19 }
 0x1fc   : > { %10962 = vst [vmem:[#allocation39_spill] sm:$0xff] %v7707_v5  ;;  %6349 = vtanh.f32 %v1299_v17  ;;  %v1300_v4 = vadd.f32 %v7749_v28, %v10975_v18  ;;  %v1239_v22 = vadd.f32 %v7512_v46, %v7734_v34  ;;  %v1241_v48 = vadd.f32 %v7526_v47, %v7734_v34 }
 0x1fd   : > { %1659 = vadd.xlane.f32.xlu0 %v1491_v33  ;;  %v1558_v33 = vmul.f32 %v7681_v62, %v6334_v51  ;;  %6351 = vtanh.f32 %v1236_v56  ;;  %v10981_v56 = vld [vmem:[#allocation19_spill] sm:$0xff] }
 0x1fe   : > { %1661 = vadd.xlane.f32.xlu1 %v1492_v58  ;;  %v7714_v12 = vpop.xlane.xlu0 %1715  ;;  %6353 = vtanh.f32 %v1237_v38  ;;  %v1303_v46 = vadd.f32 %v10981_v56, %v7749_v28 }
 0x1ff   : > { %10963 = vst [vmem:[#allocation40_spill] sm:$0xff] %v7714_v12  ;;  %v7717_v36 = vpop.xlane.xlu1 %1717  ;;  %6355 = vtanh.f32 %v1300_v4  ;;  %v1240_v4 = vadd.f32 %v7734_v34, %v7531_v31 }
 0x200   : > { %10964 = vst [vmem:[#allocation41_spill] sm:$0xff] %v7717_v36  ;;  %6357 = vtanh.f32 %v1301_v25 }
 0x201   : > { %1787 = vadd.xlane.f32.xlu0 %v1555_v16  ;;  %v6340_v16 = vpop.eup %6339  ;;  %6359 = vtanh.f32 %v1238_v9 }
 0x202   : > { %1789 = vadd.xlane.f32.xlu1 %v1556_v6  ;;  %v7726_v50 = vpop.xlane.xlu0 %1591  ;;  %v1496_v6 = vmul.f32 %v7681_v62, %v6338_v26  ;;  %v6342_v40 = vpop.eup %6341  ;;  %v1559_v21 = vmul.f32 %v7681_v62, %v6340_v16  ;;  %v10980_v26 = vld [vmem:[#allocation20_spill] sm:$0xff]  ;;  %6361 = vtanh.f32 %v1239_v22  ;;  %v10985_v22 = vld [vmem:[#allocation22_spill] sm:$0xff] }
 0x203   : > { %10966 = vst [vmem:[#allocation13_spill] sm:$0xff] %v7726_v50  ;;  %v7729_v23 = vpop.xlane.xlu1 %1593  ;;  %v1302_v19 = vadd.f32 %v7749_v28, %v10980_v26  ;;  %v1304_v31 = vadd.f32 %v7749_v28, %v10985_v22 }
 0x204   : > { %10967 = vst [vmem:[#allocation42_spill] sm:$0xff] %v7729_v23 }
 0x205   : > { %1663 = vadd.xlane.f32.xlu0 %v1493_v30  ;;  %v6344_v30 = vpop.eup %6343  ;;  %6363 = vtanh.f32 %v1302_v19 }
 0x206   : > { %1665 = vadd.xlane.f32.xlu1 %v1494_v60  ;;  %v7741_v57 = vpop.xlane.xlu0 %1719  ;;  %v1560_v60 = vmul.f32 %v7681_v62, %v6342_v40  ;;  %v6346_v51 = vpop.eup %6345  ;;  %v1497_v3 = vmul.f32 %v7681_v62, %v6344_v30  ;;  %6365 = vtanh.f32 %v1303_v46  ;;  %v1242_v46 = vadd.f32 %v7734_v34, %v7545_v39 }
 0x207   : > { %10971 = vst [vmem:[#allocation16_spill] sm:$0xff] %v7741_v57  ;;  %v7744_v58 = vpop.xlane.xlu1 %1721  ;;  %v6348_v37 = vpop.eup %6347  ;;  %6367 = vtanh.f32 %v1240_v4 }
 0x208   : > { %10972 = vst [vmem:[#allocation14_spill] sm:$0xff] %v7744_v58  ;;  %v6350_v15 = vpop.eup %6349  ;;  %v1561_v38 = vmul.f32 %v7681_v62, %v6348_v37  ;;  %6369 = vtanh.f32 %v1241_v48 }
 0x209   : > { %1791 = vadd.xlane.f32.xlu0 %v1557_v42  ;;  %v1498_v42 = vmul.f32 %v7681_v62, %v6346_v51  ;;  %6371 = vtanh.f32 %v1304_v31 }
 0x20a   : > { %1793 = vadd.xlane.f32.xlu1 %v1558_v33  ;;  %v7754_v43 = vpop.xlane.xlu0 %1595 }
 0x20b   : > { %10973 = vst [vmem:[#allocation15_spill] sm:$0xff] %v7754_v43  ;;  %v7757_v13 = vpop.xlane.xlu1 %1597 }
 0x20c   : > { %10974 = vst [vmem:[#allocation43_spill] sm:$0xff] %v7757_v13 }
 0x20d   : > { %1667 = vadd.xlane.f32.xlu0 %v1495_v8  ;;  %v6352_v8 = vpop.eup %6351 }
 0x20e   : > { %1669 = vadd.xlane.f32.xlu1 %v1496_v6  ;;  %v7764_v45 = vpop.xlane.xlu0 %1723  ;;  %v1562_v6 = vmul.f32 %v7681_v62, %v6350_v15  ;;  %v6354_v40 = vpop.eup %6353  ;;  %v1499_v25 = vmul.f32 %v7681_v62, %v6352_v8 }
 0x20f   : > { %10977 = vst [vmem:[#allocation18_spill] sm:$0xff] %v7764_v45  ;;  %v7767_v41 = vpop.xlane.xlu1 %1725 }
 0x210   : > { %10978 = vst [vmem:[#allocation17_spill] sm:$0xff] %v7767_v41 }
 0x211   : > { %1795 = vadd.xlane.f32.xlu0 %v1559_v21  ;;  %v6356_v21 = vpop.eup %6355 }
 0x212   : > { %1797 = vadd.xlane.f32.xlu1 %v1560_v60  ;;  %v7774_v17 = vpop.xlane.xlu0 %1599  ;;  %v1500_v60 = vmul.f32 %v7681_v62, %v6354_v40  ;;  %v6358_v51 = vpop.eup %6357  ;;  %v1563_v37 = vmul.f32 %v7681_v62, %v6356_v21  ;;  %v10991_v21 = vld [vmem:[#allocation24_spill] sm:$0xff] }
 0x213   : > { %v7777_v33 = vpop.xlane.xlu1 %1601  ;;  %v1564_v26 = vmul.f32 %v7681_v62, %v6358_v51  ;;  %v1306_v39 = vadd.f32 %v7749_v28, %v10991_v21  ;;  %v10997_v21 = vld [vmem:[#allocation25_spill] sm:$0xff] }
 0x214   : > { %10979 = vst [vmem:[#allocation44_spill] sm:$0xff] %v7777_v33 }
 0x215   : > { %1671 = vadd.xlane.f32.xlu0 %v1497_v3  ;;  %v10986_v3 = vld [vmem:[#allocation21_spill] sm:$0xff] }
 0x216   : > { %1673 = vadd.xlane.f32.xlu1 %v1498_v42  ;;  %v7784_v16 = vpop.xlane.xlu0 %1727  ;;  %v1305_v47 = vadd.f32 %v10986_v3, %v7749_v28  ;;  %v6360_v42 = vpop.eup %6359 }
 0x217   : > { %10982 = vst [vmem:[#allocation20_spill] sm:$0xff] %v7784_v16  ;;  %v7787_v18 = vpop.xlane.xlu1 %1729  ;;  %v6362_v19 = vpop.eup %6361  ;;  %v1501_v8 = vmul.f32 %v7681_v62, %v6360_v42  ;;  %v1244_v42 = vadd.f32 %v7734_v34, %v7559_v53 }
 0x218   : > { %10983 = vst [vmem:[#allocation19_spill] sm:$0xff] %v7787_v18  ;;  %6373 = vtanh.f32 %v1305_v47  ;;  %v1502_v4 = vmul.f32 %v7681_v62, %v6362_v19 }
 0x219   : > { %1799 = vadd.xlane.f32.xlu0 %v1561_v38  ;;  %v1243_v38 = vadd.f32 %v7540_v59, %v7734_v34  ;;  %6375 = vtanh.f32 %v1242_v46 }
 0x21a   : > { %1801 = vadd.xlane.f32.xlu1 %v1562_v6  ;;  %v7794_v30 = vpop.xlane.xlu0 %1603  ;;  %v6364_v6 = vpop.eup %6363 }
 0x21b   : > { %v7797_v9 = vpop.xlane.xlu1 %1605  ;;  %v6366_v48 = vpop.eup %6365  ;;  %6377 = vtanh.f32 %v1243_v38  ;;  %v1565_v51 = vmul.f32 %v7681_v62, %v6364_v6 }
 0x21c   : > { %10984 = vst [vmem:[#allocation45_spill] sm:$0xff] %v7797_v9  ;;  %v6368_v22 = vpop.eup %6367  ;;  %v1566_v3 = vmul.f32 %v7681_v62, %v6366_v48  ;;  %6379 = vtanh.f32 %v1306_v39  ;;  %v10996_v48 = vld [vmem:[#allocation26_spill] sm:$0xff] }
 0x21d   : > { %1675 = vadd.xlane.f32.xlu0 %v1499_v25  ;;  %v6370_v47 = vpop.eup %6369  ;;  %v1503_v19 = vmul.f32 %v7681_v62, %v6368_v22  ;;  %v1308_v53 = vadd.f32 %v7749_v28, %v10996_v48 }
 0x21e   : > { %1677 = vadd.xlane.f32.xlu1 %v1500_v60  ;;  %v7804_v15 = vpop.xlane.xlu0 %1731  ;;  %v10992_v60 = vld [vmem:[#allocation23_spill] sm:$0xff]  ;;  %v6372_v46 = vpop.eup %6371 }
 0x21f   : > { %10987 = vst [vmem:[#allocation22_spill] sm:$0xff] %v7804_v15  ;;  %v7807_v56 = vpop.xlane.xlu1 %1733  ;;  %v1307_v59 = vadd.f32 %v10992_v60, %v7749_v28  ;;  %v1567_v39 = vmul.f32 %v7681_v62, %v6372_v46 }
 0x220   : > { %10988 = vst [vmem:[#allocation21_spill] sm:$0xff] %v7807_v56 }
 0x221   : > { %1803 = vadd.xlane.f32.xlu0 %v1563_v37  ;;  %6381 = vtanh.f32 %v1307_v59 }
 0x222   : > { %1805 = vadd.xlane.f32.xlu1 %v1564_v26  ;;  %v7814_v40 = vpop.xlane.xlu0 %1607  ;;  %v1245_v26 = vadd.f32 %v7554_v44, %v7734_v34  ;;  %v6374_v6 = vpop.eup %6373  ;;  %6383 = vtanh.f32 %v1244_v42  ;;  %v1309_v44 = vadd.f32 %v10997_v21, %v7749_v28  ;;  %v1247_v42 = vadd.f32 %v7570_v10, %v7734_v34 }
 0x223   : > { %10989 = vst [vmem:[#allocation46_spill] sm:$0xff] %v7814_v40  ;;  %v7817_v25 = vpop.xlane.xlu1 %1609  ;;  %v6376_v60 = vpop.eup %6375 }
 0x224   : > { %10990 = vst [vmem:[#allocation47_spill] sm:$0xff] %v7817_v25  ;;  %6385 = vtanh.f32 %v1245_v26  ;;  %v1505_v26 = vmul.f32 %v7681_v62, %v6376_v60 }
 0x225   : > { %1679 = vadd.xlane.f32.xlu0 %v1501_v8  ;;  %v1504_v8 = vmul.f32 %v7681_v62, %v6370_v47  ;;  %v6378_v22 = vpop.eup %6377  ;;  %6387 = vtanh.f32 %v1308_v53  ;;  %v1246_v47 = vadd.f32 %v7734_v34, %v7575_v54  ;;  %v1310_v54 = vadd.f32 %v7749_v28, %v7577_v2  ;;  %v11001_v53 = vld [vmem:[#allocation27_spill] sm:$0xff] }
 0x226   : > { %1681 = vadd.xlane.f32.xlu1 %v1502_v4  ;;  %v7824_v31 = vpop.xlane.xlu0 %1735  ;;  %6389 = vtanh.f32 %v1309_v44  ;;  %v1311_v10 = vadd.f32 %v11001_v53, %v7749_v28  ;;  %v1248_v2 = vadd.f32 %v7734_v34, %v7594_v20  ;;  %v1312_v20 = vadd.f32 %v7749_v28, %v7596_v24 }
 0x227   : > { %10993 = vst [vmem:[#allocation24_spill] sm:$0xff] %v7824_v31  ;;  %v7827_v37 = vpop.xlane.xlu1 %1737  ;;  %6391 = vtanh.f32 %v1246_v47  ;;  %v1249_v47 = vadd.f32 %v7589_v11, %v7734_v34  ;;  %v1250_v24 = vadd.f32 %v7734_v34, %v7611_v27  ;;  %v1314_v27 = vadd.f32 %v7749_v28, %v7613_v1 }
 0x228   : > { %10994 = vst [vmem:[#allocation23_spill] sm:$0xff] %v7827_v37  ;;  %6393 = vtanh.f32 %v1247_v42 }
 0x229   : > { %1807 = vadd.xlane.f32.xlu0 %v1565_v51  ;;  %v1568_v51 = vmul.f32 %v7681_v62, %v6374_v6  ;;  %6395 = vtanh.f32 %v1310_v54  ;;  %v11006_v54 = vld [vmem:[#allocation28_spill] sm:$0xff] }
 0x22a   : > { %1809 = vadd.xlane.f32.xlu1 %v1566_v3  ;;  %v7834_v38 = vpop.xlane.xlu0 %1611  ;;  %6397 = vtanh.f32 %v1311_v10  ;;  %v1313_v11 = vadd.f32 %v11006_v54, %v7749_v28 }
 0x22b   : > { %v7837_v4 = vpop.xlane.xlu1 %1613  ;;  %6399 = vtanh.f32 %v1248_v2  ;;  %v1251_v2 = vadd.f32 %v7606_v7, %v7734_v34 }
 0x22c   : > { %10995 = vst [vmem:[#allocation48_spill] sm:$0xff] %v7837_v4  ;;  %6401 = vtanh.f32 %v1249_v47 }
 0x22d   : > { %1683 = vadd.xlane.f32.xlu0 %v1503_v19  ;;  %v6380_v19 = vpop.eup %6379  ;;  %6403 = vtanh.f32 %v1312_v20  ;;  %v11011_v20 = vld [vmem:[#allocation29_spill] sm:$0xff] }
 0x22e   : > { %1685 = vadd.xlane.f32.xlu1 %v1504_v8  ;;  %v7844_v59 = vpop.xlane.xlu0 %1739  ;;  %v1506_v8 = vmul.f32 %v7681_v62, %v6378_v22  ;;  %v6382_v6 = vpop.eup %6381  ;;  %v1569_v21 = vmul.f32 %v7681_v62, %v6380_v19  ;;  %6405 = vtanh.f32 %v1313_v11  ;;  %v1315_v7 = vadd.f32 %v11011_v20, %v7749_v28 }
 0x22f   : > { %10998 = vst [vmem:[#allocation26_spill] sm:$0xff] %v7844_v59  ;;  %v7847_v3 = vpop.xlane.xlu1 %1741  ;;  %v6384_v44 = vpop.eup %6383  ;;  %v1570_v60 = vmul.f32 %v7681_v62, %v6382_v6  ;;  %6407 = vtanh.f32 %v1250_v24 }
 0x230   : > { %10999 = vst [vmem:[#allocation25_spill] sm:$0xff] %v7847_v3  ;;  %v1507_v42 = vmul.f32 %v7681_v62, %v6384_v44  ;;  %6409 = vtanh.f32 %v1251_v2 }
 0x231   : > { %1811 = vadd.xlane.f32.xlu0 %v1567_v39  ;;  %6411 = vtanh.f32 %v1314_v27 }
 0x232   : > { %1813 = vadd.xlane.f32.xlu1 %v1568_v51  ;;  %v7854_v46 = vpop.xlane.xlu0 %1615  ;;  %v6386_v51 = vpop.eup %6385  ;;  %6413 = vtanh.f32 %v1315_v7 }
 0x233   : > { %v7857_v48 = vpop.xlane.xlu1 %1617 }
 0x234   : > { %11000 = vst [vmem:[#allocation49_spill] sm:$0xff] %v7857_v48 }
 0x235   : > { %1687 = vadd.xlane.f32.xlu0 %v1505_v26  ;;  %v6388_v26 = vpop.eup %6387 }
 0x236   : > { %1689 = vadd.xlane.f32.xlu1 %v1506_v8  ;;  %v7864_v39 = vpop.xlane.xlu0 %1743  ;;  %v1508_v8 = vmul.f32 %v7681_v62, %v6386_v51  ;;  %v6390_v6 = vpop.eup %6389  ;;  %v1571_v10 = vmul.f32 %v7681_v62, %v6388_v26 }
 0x237   : > { %11002 = vst [vmem:[#allocation27_spill] sm:$0xff] %v7864_v39  ;;  %v7867_v22 = vpop.xlane.xlu1 %1745 }
 0x238   : > { %11003 = vst [vmem:[#allocation50_spill] sm:$0xff] %v7867_v22 }
 0x239   : > { %1815 = vadd.xlane.f32.xlu0 %v1569_v21  ;;  %v6392_v21 = vpop.eup %6391 }
 0x23a   : > { %1817 = vadd.xlane.f32.xlu1 %v1570_v60  ;;  %v7874_v19 = vpop.xlane.xlu0 %1619  ;;  %v1572_v60 = vmul.f32 %v7681_v62, %v6390_v6  ;;  %v6394_v51 = vpop.eup %6393  ;;  %v1509_v47 = vmul.f32 %v7681_v62, %v6392_v21 }
 0x23b   : > { %11004 = vst [vmem:[#allocation51_spill] sm:$0xff] %v7874_v19  ;;  %v7877_v53 = vpop.xlane.xlu1 %1621 }
 0x23c   : > { %11005 = vst [vmem:[#allocation52_spill] sm:$0xff] %v7877_v53 }
 0x23d   : > { %1691 = vadd.xlane.f32.xlu0 %v1507_v42  ;;  %v6396_v42 = vpop.eup %6395 }
 0x23e   : > { %1693 = vadd.xlane.f32.xlu1 %v1508_v8  ;;  %v7884_v44 = vpop.xlane.xlu0 %1747  ;;  %v1510_v8 = vmul.f32 %v7681_v62, %v6394_v51  ;;  %v6398_v6 = vpop.eup %6397  ;;  %v1573_v34 = vmul.f32 %v7681_v62, %v6396_v42 }
 0x23f   : > { %11007 = vst [vmem:[#allocation28_spill] sm:$0xff] %v7884_v44  ;;  %v7887_v35 = vpop.xlane.xlu1 %1749  ;;  %v6400_v11 = vpop.eup %6399  ;;  %v1574_v21 = vmul.f32 %v7681_v62, %v6398_v6 }
 0x240   : > { %11008 = vst [vmem:[#allocation53_spill] sm:$0xff] %v7887_v35  ;;  %v1511_v1 = vmul.f32 %v7681_v62, %v6400_v11 }
 0x241   : > { %1819 = vadd.xlane.f32.xlu0 %v1571_v10 }
 0x242   : > { %1821 = vadd.xlane.f32.xlu1 %v1572_v60  ;;  %v7894_v26 = vpop.xlane.xlu0 %1623  ;;  %v6402_v60 = vpop.eup %6401 }
 0x243   : > { %11009 = vst [vmem:[#allocation54_spill] sm:$0xff] %v7894_v26  ;;  %v7897_v54 = vpop.xlane.xlu1 %1625  ;;  %v6404_v24 = vpop.eup %6403  ;;  %v1512_v28 = vmul.f32 %v7681_v62, %v6402_v60 }
 0x244   : > { %11010 = vst [vmem:[#allocation55_spill] sm:$0xff] %v7897_v54 }
 0x245   : > { %1695 = vadd.xlane.f32.xlu0 %v1509_v47  ;;  %v6406_v47 = vpop.eup %6405 }
 0x246   : > { %1697 = vadd.xlane.f32.xlu1 %v1510_v8  ;;  %v7904_v10 = vpop.xlane.xlu0 %1751  ;;  %v1575_v8 = vmul.f32 %v7681_v62, %v6404_v24  ;;  %v6408_v6 = vpop.eup %6407  ;;  %v1576_v27 = vmul.f32 %v7681_v62, %v6406_v47 }
 0x247   : > { %11012 = vst [vmem:[#allocation29_spill] sm:$0xff] %v7904_v10  ;;  %v7907_v51 = vpop.xlane.xlu1 %1753  ;;  %v6410_v7 = vpop.eup %6409  ;;  %v1513_v11 = vmul.f32 %v7681_v62, %v6408_v6 }
 0x248   : > { %11013 = vst [vmem:[#allocation56_spill] sm:$0xff] %v7907_v51 }
 0x249   : > { %1823 = vadd.xlane.f32.xlu0 %v1573_v34 }
 0x24a   : > { %1825 = vadd.xlane.f32.xlu1 %v1574_v21  ;;  %v7910_v2 = vpop.xlane.xlu0 %1627  ;;  %v6412_v21 = vpop.eup %6411 }
 0x24b   : > { %11014 = vst [vmem:[#allocation57_spill] sm:$0xff] %v7910_v2  ;;  %v7913_v42 = vpop.xlane.xlu1 %1629  ;;  %v6414_v37 = vpop.eup %6413 }
 0x24c   : > { %11015 = vst [vmem:[#allocation58_spill] sm:$0xff] %v7913_v42  ;;  %v1578_v25 = vmul.f32 %v7681_v62, %v6414_v37 }
 0x24d   : > { %1699 = vadd.xlane.f32.xlu0 %v1511_v1  ;;  %v1514_v1 = vmul.f32 %v7681_v62, %v6410_v7 }
 0x24e   : > { %1701 = vadd.xlane.f32.xlu1 %v1512_v28  ;;  %v7916_v20 = vpop.xlane.xlu0 %1755  ;;  %v1577_v28 = vmul.f32 %v7681_v62, %v6412_v21 }
 0x24f   : > { %11016 = vst [vmem:[#allocation59_spill] sm:$0xff] %v7916_v20  ;;  %v7919_v34 = vpop.xlane.xlu1 %1757 }
 0x250   : > { %11017 = vst [vmem:[#allocation60_spill] sm:$0xff] %v7919_v34 }
 0x251   : > { %1827 = vadd.xlane.f32.xlu0 %v1575_v8 }
 0x252   : > { %1829 = vadd.xlane.f32.xlu1 %v1576_v27  ;;  %v7922_v60 = vpop.xlane.xlu0 %1631 }
 0x253   : > { %11018 = vst [vmem:[#allocation61_spill] sm:$0xff] %v7922_v60  ;;  %v7925_v24 = vpop.xlane.xlu1 %1633 }
 0x254   : > { %11019 = vst [vmem:[#allocation62_spill] sm:$0xff] %v7925_v24 }
 0x255   : > { %1703 = vadd.xlane.f32.xlu0 %v1513_v11 }
 0x256   : > { %1705 = vadd.xlane.f32.xlu1 %v1514_v1  ;;  %v7928_v47 = vpop.xlane.xlu0 %1759 }
 0x257   : > { %11020 = vst [vmem:[#allocation63_spill] sm:$0xff] %v7928_v47  ;;  %v7931_v8 = vpop.xlane.xlu1 %1761 }
 0x258   : > { %11021 = vst [vmem:[#allocation64_spill] sm:$0xff] %v7931_v8 }
 0x259   : > { %1831 = vadd.xlane.f32.xlu0 %v1577_v28 }
 0x25a   : > { %1833 = vadd.xlane.f32.xlu1 %v1578_v25  ;;  %v7933_v6 = vpop.xlane.xlu0 %1635 }
 0x25b   : > { %11022 = vst [vmem:[#allocation65_spill] sm:$0xff] %v7933_v6  ;;  %v7935_v27 = vpop.xlane.xlu1 %1637 }
 0x25c   : > { %11023 = vst [vmem:[#allocation66_spill] sm:$0xff] %v7935_v27 }
 0x25e   : > { %v7937_v7 = vpop.xlane.xlu0 %1763 }
 0x25f   : > { %11024 = vst [vmem:[#allocation67_spill] sm:$0xff] %v7937_v7  ;;  %v7939_v34 = vpop.xlane.xlu1 %1765 }
 0x260   : > { %11025 = vst [vmem:[#allocation68_spill] sm:$0xff] %v7939_v34 }
 0x262   : > { %v7941_v11 = vpop.xlane.xlu0 %1639 }
 0x263   : > { %11026 = vst [vmem:[#allocation69_spill] sm:$0xff] %v7941_v11  ;;  %v7943_v21 = vpop.xlane.xlu1 %1641 }
 0x264   : > { %11027 = vst [vmem:[#allocation70_spill] sm:$0xff] %v7943_v21 }
 0x266   : > { %v7945_v1 = vpop.xlane.xlu0 %1767 }
 0x267   : > { %11028 = vst [vmem:[#allocation71_spill] sm:$0xff] %v7945_v1  ;;  %v7947_v47 = vpop.xlane.xlu1 %1769 }
 0x268   : > { %11029 = vst [vmem:[#allocation72_spill] sm:$0xff] %v7947_v47 }
 0x26a   : > { %v7949_v62 = vpop.xlane.xlu0 %1643 }
 0x26b   : > { %11030 = vst [vmem:[#allocation73_spill] sm:$0xff] %v7949_v62  ;;  %v7951_v37 = vpop.xlane.xlu1 %1645 }
 0x26c   : > { %11031 = vst [vmem:[#allocation74_spill] sm:$0xff] %v7951_v37 }
 0x26e   : > { %v7953_v25 = vpop.xlane.xlu0 %1771 }
 0x26f   : > { %11032 = vst [vmem:[#allocation75_spill] sm:$0xff] %v7953_v25  ;;  %v7955_v28 = vpop.xlane.xlu1 %1773 }
 0x270   : > { %11033 = vst [vmem:[#allocation76_spill] sm:$0xff] %v7955_v28 }
 0x272   : > { %v7957_v27 = vpop.xlane.xlu0 %1647 }
 0x273   : > { %11034 = vst [vmem:[#allocation77_spill] sm:$0xff] %v7957_v27  ;;  %v7959_v7 = vpop.xlane.xlu1 %1649 }
 0x274   : > { %11035 = vst [vmem:[#allocation78_spill] sm:$0xff] %v7959_v7 }
 0x276   : > { %v7961_v34 = vpop.xlane.xlu0 %1775 }
 0x277   : > { %11036 = vst [vmem:[#allocation79_spill] sm:$0xff] %v7961_v34  ;;  %v7963_v11 = vpop.xlane.xlu1 %1777 }
 0x278   : > { %11037 = vst [vmem:[#allocation80_spill] sm:$0xff] %v7963_v11 }
 0x27a   : > { %v7965_v21 = vpop.xlane.xlu0 %1651 }
 0x27b   : > { %11038 = vst [vmem:[#allocation81_spill] sm:$0xff] %v7965_v21  ;;  %v7967_v1 = vpop.xlane.xlu1 %1653 }
 0x27c   : > { %11039 = vst [vmem:[#allocation82_spill] sm:$0xff] %v7967_v1 }
 0x27e   : > { %v7969_v47 = vpop.xlane.xlu0 %1779 }
 0x27f   : > { %11040 = vst [vmem:[#allocation83_spill] sm:$0xff] %v7969_v47  ;;  %v7971_v8 = vpop.xlane.xlu1 %1781 }
 0x280   : > { %11041 = vst [vmem:[#allocation84_spill] sm:$0xff] %v7971_v8 }
 0x282   : > { %v7973_v62 = vpop.xlane.xlu0 %1655 }
 0x283   : > { %11042 = vst [vmem:[#allocation85_spill] sm:$0xff] %v7973_v62  ;;  %v7975_v25 = vpop.xlane.xlu1 %1657  ;;  %v11053_v62 = vlaneseq }
 0x284   : > { %11043 = vst [vmem:[#allocation86_spill] sm:$0xff] %v7975_v25 }
 0x285   : > { %v7996_v25 = vand.u32 127, %v11053_v62 }
 0x286   : > { %v7977_v28 = vpop.xlane.xlu0 %1783 }
 0x287   : > { %11044 = vst [vmem:[#allocation87_spill] sm:$0xff] %v7977_v28  ;;  %v7979_v27 = vpop.xlane.xlu1 %1785  ;;  %v1990_v62 = vadd.s32 4294967264, %v7996_v25  ;;  %v2004_v31 = vadd.s32 4294967248, %v7996_v25 }
 0x288   : > { %11045 = vst [vmem:[#allocation88_spill] sm:$0xff] %v7979_v27  ;;  %v1976_v27 = vadd.s32 4294967280, %v7996_v25 }
 0x28a   : > { %v7981_v7 = vpop.xlane.xlu0 %1659 }
 0x28b   : > { %11046 = vst [vmem:[#allocation89_spill] sm:$0xff] %v7981_v7  ;;  %v7983_v34 = vpop.xlane.xlu1 %1661 }
 0x28c   : > { %11047 = vst [vmem:[#allocation90_spill] sm:$0xff] %v7983_v34  ;;  %v1969_v34 = vadd.s32 4294967288, %v7996_v25 }
 0x28e   : > { %v7985_v11 = vpop.xlane.xlu0 %1787 }
 0x28f   : > { %11048 = vst [vmem:[#allocation91_spill] sm:$0xff] %v7985_v11  ;;  %v7987_v21 = vpop.xlane.xlu1 %1789 }
 0x290   : > { %11049 = vst [vmem:[#allocation92_spill] sm:$0xff] %v7987_v21  ;;  %v1983_v21 = vadd.s32 4294967272, %v7996_v25 }
 0x292   : > { %v7989_v1 = vpop.xlane.xlu0 %1663 }
 0x293   : > { %11050 = vst [vmem:[#allocation93_spill] sm:$0xff] %v7989_v1  ;;  %v7991_v47 = vpop.xlane.xlu1 %1665  ;;  %v11057_v1 = vld [vmem:[#allocation11_spill] sm:$0xff] }
 0x294   : > { %11051 = vst [vmem:[#allocation94_spill] sm:$0xff] %v7991_v47  ;;  %v8009_v47 = vsub.s32 %v7996_v25, %v11057_v1  ;;  %v8018_v37 = vsub.s32 %v1969_v34, %v11057_v1 }
 0x296   : > { %v7993_v8 = vpop.xlane.xlu0 %1791  ;;  %11058 = vst [vmem:[#allocation99_spill] sm:$0xff] %v8009_v47  ;;  %11061 = vst [vmem:[#allocation102_spill] sm:$0xff] %v8018_v37  ;;  %v1968_v24 = vrot.slane %v7672_v49, %v8009_v47  ;;  %v2314_v34 = vrot.slane %v7684_v32, %v8009_v47  ;;  %v1973_v49 = vrot.slane %v7662_v0, %v8018_v37 }
 0x297   : > { %11052 = vst [vmem:[#allocation95_spill] sm:$0xff] %v7993_v8  ;;  %v7998_v28 = vpop.xlane.xlu1 %1793  ;;  %v8012_v8 = vsub.s32 %v1976_v27, %v11057_v1  ;;  %v2011_v27 = vadd.s32 4294967240, %v7996_v25 }
 0x298   : > { %11054 = vst [vmem:[#allocation96_spill] sm:$0xff] %v7998_v28 }
 0x299   : > { %11059 = vst [vmem:[#allocation100_spill] sm:$0xff] %v8012_v8  ;;  %v2323_v60 = vrot.slane %v7694_v63, %v8012_v8  ;;  %v8054_v0 = vsub.s32 %v2011_v27, %v11057_v1  ;;  %v8057_v63 = vsub.s32 %v2004_v31, %v11057_v1  ;;  %v2039_v27 = vadd.s32 4294967208, %v7996_v25 }
 0x29a   : > { %v8001_v7 = vpop.xlane.xlu0 %1667 }
 0x29b   : > { %11055 = vst [vmem:[#allocation97_spill] sm:$0xff] %v8001_v7  ;;  %v8004_v11 = vpop.xlane.xlu1 %1669  ;;  %v1997_v7 = vadd.s32 4294967256, %v7996_v25  ;;  %11068 = vst [vmem:[#allocation109_spill] sm:$0xff] %v8054_v0 }
 0x29c   : > { %11056 = vst [vmem:[#allocation98_spill] sm:$0xff] %v8004_v11  ;;  %v8024_v11 = vsub.s32 %v1983_v21, %v11057_v1  ;;  %v2025_v21 = vadd.s32 4294967224, %v7996_v25  ;;  %11069 = vst [vmem:[#allocation110_spill] sm:$0xff] %v8057_v63 }
 0x29d   : > { %v8045_v20 = vsub.s32 %v1997_v7, %v11057_v1 }
 0x29e   : > { %v8015_v28 = vpop.xlane.xlu0 %1795  ;;  %11063 = vst [vmem:[#allocation104_spill] sm:$0xff] %v8024_v11  ;;  %v8064_v42 = vsub.s32 %v2025_v21, %v11057_v1  ;;  %v2032_v21 = vadd.s32 4294967216, %v7996_v25 }
 0x29f   : > { %11060 = vst [vmem:[#allocation101_spill] sm:$0xff] %v8015_v28  ;;  %v8021_v6 = vpop.xlane.xlu1 %1797  ;;  %v1980_v28 = vrot.slane %v7697_v61, %v8012_v8  ;;  %11066 = vst [vmem:[#allocation107_spill] sm:$0xff] %v8045_v20  ;;  %v2018_v61 = vadd.s32 4294967232, %v7996_v25 }
 0x2a0   : > { %11062 = vst [vmem:[#allocation103_spill] sm:$0xff] %v8021_v6  ;;  %v8035_v6 = vsub.s32 %v1990_v62, %v11057_v1  ;;  %v2318_v62 = vrot.slane %v7665_v14, %v8018_v37  ;;  %11070 = vst [vmem:[#allocation111_spill] sm:$0xff] %v8064_v42 }
 0x2a2   : > { %11064 = vst [vmem:[#allocation105_spill] sm:$0xff] %v8035_v6  ;;  %v8038_v40 = vpop.xlane.xlu0 %1671  ;;  %v2319_v7 = vsel %vm1974_vm0, %v2318_v62, %v2314_v34  ;;  %v1994_v14 = vrot.slane %v7704_v55, %v8035_v6  ;;  %v8079_v34 = vsub.s32 %v2018_v61, %v11057_v1  ;;  %v2053_v62 = vadd.s32 4294967192, %v7996_v25 }
 0x2a3   : > { %11065 = vst [vmem:[#allocation106_spill] sm:$0xff] %v8038_v40  ;;  %v8047_v32 = vpop.xlane.xlu1 %1673  ;;  %v1975_v40 = vsel %vm1974_vm0, %v1973_v49, %v1968_v24  ;;  %v1987_v49 = vrot.slane %v7675_v52, %v8024_v11  ;;  %v2324_v31 = vsel %vm1981_vm1, %v2323_v60, %v2319_v7  ;;  %v2333_v24 = vrot.slane %v7714_v12, %v8035_v6 }
 0x2a4   : > { %11067 = vst [vmem:[#allocation108_spill] sm:$0xff] %v8047_v32  ;;  %v1982_v32 = vsel %vm1981_vm1, %v1980_v28, %v1975_v40  ;;  %v2328_v28 = vrot.slane %v7687_v29, %v8024_v11  ;;  %11072 = vst [vmem:[#allocation113_spill] sm:$0xff] %v8079_v34  ;;  %v2001_v60 = vrot.slane %v7707_v5, %v8045_v20  ;;  %v2046_v12 = vadd.s32 4294967200, %v7996_v25 }
 0x2a5   : > { %v1989_v7 = vsel %vm1988_vm2, %v1987_v49, %v1982_v32  ;;  %v2338_v29 = vrot.slane %v7717_v36, %v8045_v20  ;;  %v2008_v52 = vrot.slane %v7726_v50, %v8057_v63  ;;  %v2343_v32 = vrot.slane %v7741_v57, %v8057_v63 }
 0x2a6   : > { %v8066_v51 = vpop.xlane.xlu0 %1799  ;;  %v1996_v55 = vsel %vm1995_vm3, %v1994_v14, %v1989_v7  ;;  %v2329_v61 = vsel %vm1988_vm2, %v2328_v28, %v2324_v31  ;;  %v8099_v49 = vsub.s32 %v2039_v27, %v11057_v1  ;;  %v8104_v7 = vsub.s32 %v2032_v21, %v11057_v1 }
 0x2a7   : > { %v8074_v40 = vpop.xlane.xlu1 %1801  ;;  %v2334_v5 = vsel %vm1995_vm3, %v2333_v24, %v2329_v61  ;;  %v8107_v31 = vsub.s32 %v2053_v62, %v11057_v1  ;;  %v2081_v28 = vrot.slane %v7837_v4, %v8018_v37  ;;  %v2077_v24 = vrot.slane %v7834_v38, %v8009_v47 }
 0x2a8   : > { %11071 = vst [vmem:[#allocation112_spill] sm:$0xff] %v8074_v40  ;;  %11074 = vst [vmem:[#allocation115_spill] sm:$0xff] %v8099_v49  ;;  %v2015_v61 = vrot.slane %v7729_v23, %v8054_v0  ;;  %v2003_v27 = vsel %vm2002_vm4, %v2001_v60, %v1996_v55  ;;  %v8117_v36 = vsub.s32 %v2046_v12, %v11057_v1 }
 0x2a9   : > { %11076 = vst [vmem:[#allocation117_spill] sm:$0xff] %v8104_v7  ;;  %11077 = vst [vmem:[#allocation118_spill] sm:$0xff] %v8107_v31  ;;  %v2086_v21 = vrot.slane %v7854_v46, %v8012_v8  ;;  %v2010_v62 = vsel %vm10753_vm5, %v2008_v52, %v2003_v27  ;;  %v2348_v57 = vrot.slane %v7744_v58, %v8054_v0 }
 0x2aa   : > { %v8093_v40 = vpop.xlane.xlu0 %1675  ;;  %11078 = vst [vmem:[#allocation119_spill] sm:$0xff] %v8117_v36  ;;  %v2339_v4 = vsel %vm2002_vm4, %v2338_v29, %v2334_v5  ;;  %v2022_v50 = vrot.slane %v7754_v43, %v8079_v34  ;;  %v2353_v12 = vrot.slane %v7764_v45, %v8079_v34  ;;  %v2397_v52 = vrot.slane %v7847_v3, %v8018_v37 }
 0x2ab   : > { %11073 = vst [vmem:[#allocation114_spill] sm:$0xff] %v8093_v40  ;;  %v8101_v14 = vpop.xlane.xlu1 %1677  ;;  %v2344_v55 = vsel %vm10753_vm5, %v2343_v32, %v2339_v4  ;;  %v2393_v60 = vrot.slane %v7844_v59, %v8009_v47  ;;  %v2060_v29 = vadd.s32 4294967184, %v7996_v25  ;;  %v2082_v5 = vsel %vm1974_vm0, %v2081_v28, %v2077_v24 }
 0x2ac   : > { %11075 = vst [vmem:[#allocation116_spill] sm:$0xff] %v8101_v14  ;;  %v2091_v58 = vrot.slane %v7857_v48, %v8024_v11  ;;  %v2402_v4 = vrot.slane %v7864_v39, %v8012_v8  ;;  %v2029_v32 = vrot.slane %v7757_v13, %v8064_v42  ;;  %v2017_v3 = vsel %vm2016_vm6, %v2015_v61, %v2010_v62 }
 0x2ad   : > { %v2087_v45 = vsel %vm1981_vm1, %v2086_v21, %v2082_v5  ;;  %v2096_v59 = vrot.slane %v7874_v19, %v8035_v6  ;;  %v2024_v43 = vsel %vm2023_vm7, %v2022_v50, %v2017_v3  ;;  %v2358_v28 = vrot.slane %v7767_v41, %v8064_v42 }
 0x2ae   : > { %v8127_v23 = vpop.xlane.xlu0 %1803  ;;  %v2349_v24 = vsel %vm2016_vm6, %v2348_v57, %v2344_v55  ;;  %v2036_v39 = vrot.slane %v7774_v17, %v8104_v7  ;;  %v2363_v61 = vrot.slane %v7784_v16, %v8104_v7  ;;  %v2398_v21 = vsel %vm1974_vm0, %v2397_v52, %v2393_v60  ;;  %v11094_v16 = vld [vmem:[#allocation62_spill] sm:$0xff] }
 0x2af   : > { %11079 = vst [vmem:[#allocation120_spill] sm:$0xff] %v8127_v23  ;;  %v8136_v27 = vpop.xlane.xlu1 %1805  ;;  %v2354_v13 = vsel %vm2023_vm7, %v2353_v12, %v2349_v24  ;;  %v2407_v50 = vrot.slane %v7867_v22, %v8024_v11  ;;  %v2403_v57 = vsel %vm1981_vm1, %v2402_v4, %v2398_v21  ;;  %v2101_v62 = vrot.slane %v7877_v53, %v8045_v20 }
 0x2b0   : > { %11080 = vst [vmem:[#allocation121_spill] sm:$0xff] %v8136_v27  ;;  %v2092_v55 = vsel %vm1988_vm2, %v2091_v58, %v2087_v45  ;;  %v2412_v12 = vrot.slane %v7884_v44, %v8035_v6  ;;  %v2043_v5 = vrot.slane %v7777_v33, %v8099_v49  ;;  %v2031_v52 = vsel %vm2030_vm8, %v2029_v32, %v2024_v43 }
 0x2b1   : > { %v2097_v60 = vsel %vm1995_vm3, %v2096_v59, %v2092_v55  ;;  %v2106_v24 = vrot.slane %v7894_v26, %v8057_v63  ;;  %v2038_v4 = vsel %vm10766_vm9, %v2036_v39, %v2031_v52  ;;  %v2368_v21 = vrot.slane %v7787_v18, %v8099_v49 }
 0x2b2   : > { %v8156_v48 = vpop.xlane.xlu0 %1679  ;;  %v2359_v58 = vsel %vm2030_vm8, %v2358_v28, %v2354_v13  ;;  %v2050_v45 = vrot.slane %v7794_v30, %v8117_v36  ;;  %v2373_v43 = vrot.slane %v7804_v15, %v8117_v36  ;;  %v2417_v59 = vrot.slane %v7887_v35, %v8045_v20 }
 0x2b3   : > { %11081 = vst [vmem:[#allocation122_spill] sm:$0xff] %v8156_v48  ;;  %v8164_v3 = vpop.xlane.xlu1 %1681  ;;  %v2364_v41 = vsel %vm10766_vm9, %v2363_v61, %v2359_v58  ;;  %v2408_v39 = vsel %vm1988_vm2, %v2407_v50, %v2403_v57  ;;  %v2111_v13 = vrot.slane %v7897_v54, %v8054_v0  ;;  %v2102_v28 = vsel %vm2002_vm4, %v2101_v62, %v2097_v60  ;;  %v11095_v54 = vld [vmem:[#allocation63_spill] sm:$0xff] }
 0x2b4   : > { %v2413_v55 = vsel %vm1995_vm3, %v2412_v12, %v2408_v39  ;;  %v2422_v61 = vrot.slane %v7904_v10, %v8057_v63  ;;  %v2045_v52 = vsel %vm10771_vm10, %v2043_v5, %v2038_v4  ;;  %v2067_v58 = vadd.s32 4294967176, %v7996_v25 }
 0x2b5   : > { %v2107_v35 = vsel %vm10753_vm5, %v2106_v24, %v2102_v28  ;;  %v2116_v50 = vrot.slane %v7910_v2, %v8079_v34  ;;  %v2057_v57 = vrot.slane %v7797_v9, %v8107_v31  ;;  %v2052_v12 = vsel %vm10773_vm11, %v2050_v45, %v2045_v52  ;;  %v11084_v24 = vld [vmem:[#allocation56_spill] sm:$0xff]  ;;  %v11086_v52 = vld [vmem:[#allocation59_spill] sm:$0xff]  ;;  %v11116_v2 = vld [vmem:[#allocation82_spill] sm:$0xff] }
 0x2b6   : > { %v8184_v22 = vpop.xlane.xlu0 %1807  ;;  %v2369_v39 = vsel %vm10771_vm10, %v2368_v21, %v2364_v41  ;;  %v8210_v62 = vsub.s32 %v2060_v29, %v11057_v1  ;;  %v2378_v25 = vrot.slane %v7807_v56, %v8107_v31  ;;  %v2427_v4 = vrot.slane %v11084_v24, %v8054_v0  ;;  %v11085_v41 = vld [vmem:[#allocation58_spill] sm:$0xff] }
 0x2b7   : > { %11082 = vst [vmem:[#allocation123_spill] sm:$0xff] %v8184_v22  ;;  %v8192_v32 = vpop.xlane.xlu1 %1809  ;;  %v2374_v5 = vsel %vm10773_vm11, %v2373_v43, %v2369_v39  ;;  %v2418_v28 = vsel %vm2002_vm4, %v2417_v59, %v2413_v55  ;;  %v2121_v29 = vrot.slane %v11085_v41, %v8064_v42  ;;  %v2112_v21 = vsel %vm2016_vm6, %v2111_v13, %v2107_v35  ;;  %v11088_v39 = vld [vmem:[#allocation61_spill] sm:$0xff]  ;;  %v11089_v55 = vld [vmem:[#allocation46_spill] sm:$0xff] }
 0x2b8   : > { %11083 = vst [vmem:[#allocation124_spill] sm:$0xff] %v8192_v32  ;;  %v2423_v45 = vsel %vm10753_vm5, %v2422_v61, %v2418_v28  ;;  %v2432_v10 = vrot.slane %v11086_v52, %v8079_v34  ;;  %v8229_v56 = vsub.s32 %v2067_v58, %v11057_v1  ;;  %v2117_v43 = vsel %vm2023_vm7, %v2116_v50, %v2112_v21  ;;  %v11090_v28 = vld [vmem:[#allocation24_spill] sm:$0xff] }
 0x2b9   : > { %v2126_v59 = vrot.slane %v11088_v39, %v8104_v7  ;;  %v2064_v61 = vrot.slane %v11089_v55, %v8210_v62  ;;  %v2383_v24 = vrot.slane %v11090_v28, %v8210_v62  ;;  %v2059_v13 = vsel %vm2058_vm12, %v2057_v57, %v2052_v12  ;;  %v11092_v52 = vld [vmem:[#allocation60_spill] sm:$0xff]  ;;  %v11096_v57 = vld [vmem:[#allocation47_spill] sm:$0xff] }
 0x2ba   : > { %v8212_v60 = vpop.xlane.xlu0 %1683  ;;  %11087 = vst [vmem:[#allocation125_spill] sm:$0xff] %v8229_v56  ;;  %v2379_v58 = vsel %vm2058_vm12, %v2378_v25, %v2374_v5  ;;  %v2437_v50 = vrot.slane %v11092_v52, %v8064_v42  ;;  %v2428_v21 = vsel %vm2016_vm6, %v2427_v4, %v2423_v45  ;;  %v2131_v41 = vrot.slane %v11094_v16, %v8099_v49  ;;  %v11097_v25 = vld [vmem:[#allocation23_spill] sm:$0xff]  ;;  %v11098_v45 = vld [vmem:[#allocation65_spill] sm:$0xff] }
 0x2bb   : > { %v8220_v18 = vpop.xlane.xlu1 %1685  ;;  %v2433_v15 = vsel %vm2023_vm7, %v2432_v10, %v2428_v21  ;;  %v2122_v28 = vsel %vm2030_vm8, %v2121_v29, %v2117_v43  ;;  %v2442_v53 = vrot.slane %v11095_v54, %v8104_v7  ;;  %v2071_v12 = vrot.slane %v11096_v57, %v8229_v56  ;;  %v11099_v29 = vld [vmem:[#allocation74_spill] sm:$0xff]  ;;  %v11100_v54 = vld [vmem:[#allocation73_spill] sm:$0xff]  ;;  %v11101_v57 = vld [vmem:[#allocation64_spill] sm:$0xff] }
 0x2bc   : > { %v2388_v5 = vrot.slane %v11097_v25, %v8229_v56  ;;  %v2127_v4 = vsel %vm10766_vm9, %v2126_v59, %v2122_v28  ;;  %v2136_v52 = vrot.slane %v11098_v45, %v8117_v36  ;;  %v2066_v10 = vsel %vm2065_vm13, %v2064_v61, %v2059_v13  ;;  %v11102_v28 = vld [vmem:[#allocation77_spill] sm:$0xff]  ;;  %v11103_v61 = vld [vmem:[#allocation66_spill] sm:$0xff] }
 0x2bd   : > { %v2384_v21 = vsel %vm2065_vm13, %v2383_v24, %v2379_v58  ;;  %v2160_v43 = vrot.slane %v11099_v29, %v8018_v37  ;;  %v2156_v16 = vrot.slane %v11100_v54, %v8009_v47  ;;  %v2447_v25 = vrot.slane %v11101_v57, %v8099_v49 }
 0x2be   : > { %v8238_v35 = vpop.xlane.xlu0 %1811  ;;  %v2438_v59 = vsel %vm2030_vm8, %v2437_v50, %v2433_v15  ;;  %v2165_v45 = vrot.slane %v11102_v28, %v8012_v8  ;;  %v2141_v13 = vrot.slane %v11103_v61, %v8107_v31  ;;  %v2132_v58 = vsel %vm10771_vm10, %v2131_v41, %v2127_v4  ;;  %v11104_v50 = vld [vmem:[#allocation67_spill] sm:$0xff]  ;;  %v11107_v41 = vld [vmem:[#allocation78_spill] sm:$0xff] }
 0x2bf   : > { %11091 = vst [vmem:[#allocation46_spill] sm:$0xff] %v8238_v35  ;;  %v8245_v44 = vpop.xlane.xlu1 %1813  ;;  %v2443_v24 = vsel %vm10766_vm9, %v2442_v53, %v2438_v59  ;;  %v8280_v29 = vsel %vm2072_vm14, %v2071_v12, %v2066_v10  ;;  %v8283_v54 = vsel %vm2072_vm14, %v2388_v5, %v2384_v21  ;;  %v2137_v15 = vsel %vm10773_vm11, %v2136_v52, %v2132_v58  ;;  %v11105_v53 = vld [vmem:[#allocation76_spill] sm:$0xff]  ;;  %v11106_v61 = vld [vmem:[#allocation75_spill] sm:$0xff] }
 0x2c0   : > { %11093 = vst [vmem:[#allocation126_spill] sm:$0xff] %v8245_v44  ;;  %v2452_v57 = vrot.slane %v11104_v50, %v8117_v36  ;;  %v2161_v28 = vsel %vm1974_vm0, %v2160_v43, %v2156_v16  ;;  %v2476_v59 = vrot.slane %v11105_v53, %v8018_v37  ;;  %v2472_v39 = vrot.slane %v11106_v61, %v8009_v47  ;;  %v11109_v10 = vld [vmem:[#allocation79_spill] sm:$0xff]  ;;  %v11110_v16 = vld [vmem:[#allocation81_spill] sm:$0xff]  ;;  %v11112_v53 = vld [vmem:[#allocation68_spill] sm:$0xff] }
 0x2c1   : > { %v2170_v12 = vrot.slane %v11107_v41, %v8024_v11  ;;  %v2448_v5 = vsel %vm10771_vm10, %v2447_v25, %v2443_v24  ;;  %v2166_v52 = vsel %vm1981_vm1, %v2165_v45, %v2161_v28  ;;  %v2481_v21 = vrot.slane %v11109_v10, %v8012_v8  ;;  %v11113_v28 = vld [vmem:[#allocation70_spill] sm:$0xff]  ;;  %v11114_v10 = vld [vmem:[#allocation69_spill] sm:$0xff] }
 0x2c2   : > { %v8266_v9 = vpop.xlane.xlu0 %1687  ;;  %v2175_v43 = vrot.slane %v11110_v16, %v8035_v6  ;;  %v2142_v50 = vsel %vm2058_vm12, %v2141_v13, %v2137_v15  ;;  %v2239_v41 = vrot.slane %v8101_v14, %v8018_v37  ;;  %v2235_v25 = vrot.slane %v8093_v40, %v8009_v47  ;;  %v11115_v15 = vld [vmem:[#allocation80_spill] sm:$0xff] }
 0x2c3   : > { %v8273_v33 = vpop.xlane.xlu1 %1689  ;;  %v8313_v45 = vsel %vm10773_vm11, %v2452_v57, %v2448_v5  ;;  %v2146_v16 = vrot.slane %v11114_v10, %v8210_v62  ;;  %v2244_v61 = vrot.slane %v8156_v48, %v8012_v8  ;;  %v2477_v13 = vsel %vm1974_vm0, %v2476_v59, %v2472_v39  ;;  %v11117_v10 = vld [vmem:[#allocation83_spill] sm:$0xff]  ;;  %v11118_v48 = vld [vmem:[#allocation85_spill] sm:$0xff] }
 0x2c4   : > { %v2486_v14 = vrot.slane %v11115_v15, %v8024_v11  ;;  %v2180_v40 = vrot.slane %v11116_v2, %v8045_v20  ;;  %v2171_v57 = vsel %vm1988_vm2, %v2170_v12, %v2166_v52  ;;  %v2482_v24 = vsel %vm1981_vm1, %v2481_v21, %v2477_v13 }
 0x2c5   : > { %v2176_v26 = vsel %vm1995_vm3, %v2175_v43, %v2171_v57  ;;  %v2491_v19 = vrot.slane %v11117_v10, %v8035_v6  ;;  %v2185_v39 = vrot.slane %v11118_v48, %v8057_v63  ;;  %v2240_v15 = vsel %vm1974_vm0, %v2239_v41, %v2235_v25  ;;  %v11119_v41 = vld [vmem:[#allocation84_spill] sm:$0xff] }
 0x2c6   : > { %v8295_v4 = vpop.xlane.xlu0 %1815  ;;  %v2555_v2 = vrot.slane %v8136_v27, %v8018_v37  ;;  %v2551_v12 = vrot.slane %v8127_v23, %v8009_v47  ;;  %v2249_v52 = vrot.slane %v8164_v3, %v8024_v11  ;;  %v2147_v21 = vsel %vm2065_vm13, %v2146_v16, %v2142_v50  ;;  %v11120_v47 = vld [vmem:[#allocation86_spill] sm:$0xff]  ;;  %v11122_v16 = vld [vmem:[#allocation87_spill] sm:$0xff] }
 0x2c7   : > { %11108 = vst [vmem:[#allocation127_spill] sm:$0xff] %v8295_v4  ;;  %v8303_v58 = vpop.xlane.xlu1 %1817  ;;  %v2245_v43 = vsel %vm1981_vm1, %v2244_v61, %v2240_v15  ;;  %v2560_v13 = vrot.slane %v8184_v22, %v8012_v8  ;;  %v2254_v57 = vrot.slane %v8212_v60, %v8035_v6  ;;  %v2496_v25 = vrot.slane %v11119_v41, %v8045_v20  ;;  %v11123_v8 = vld [vmem:[#allocation89_spill] sm:$0xff] }
 0x2c8   : > { %11111 = vst [vmem:[#allocation128_spill] sm:$0xff] %v8303_v58  ;;  %v2487_v37 = vsel %vm1988_vm2, %v2486_v14, %v2482_v24  ;;  %v2190_v27 = vrot.slane %v11120_v47, %v8054_v0  ;;  %v2181_v23 = vsel %vm2002_vm4, %v2180_v40, %v2176_v26  ;;  %v2501_v15 = vrot.slane %v11122_v16, %v8057_v63 }
 0x2c9   : > { %v2492_v61 = vsel %vm1995_vm3, %v2491_v19, %v2487_v37  ;;  %v2186_v50 = vsel %vm10753_vm5, %v2185_v39, %v2181_v23  ;;  %v2195_v22 = vrot.slane %v11123_v8, %v8079_v34  ;;  %v2556_v14 = vsel %vm1974_vm0, %v2555_v2, %v2551_v12  ;;  %v11125_v2 = vld [vmem:[#allocation88_spill] sm:$0xff] }
 0x2ca   : > { %v8327_v5 = vpop.xlane.xlu0 %1691  ;;  %v2565_v24 = vrot.slane %v8192_v32, %v8024_v11  ;;  %v2259_v26 = vrot.slane %v8220_v18, %v8045_v20  ;;  %v2250_v19 = vsel %vm1988_vm2, %v2249_v52, %v2245_v43  ;;  %v2561_v23 = vsel %vm1981_vm1, %v2560_v13, %v2556_v14  ;;  %v11126_v32 = vld [vmem:[#allocation90_spill] sm:$0xff]  ;;  %v11127_v14 = vld [vmem:[#allocation91_spill] sm:$0xff] }
 0x2cb   : > { %v8335_v59 = vpop.xlane.xlu1 %1693  ;;  %v2255_v37 = vsel %vm1995_vm3, %v2254_v57, %v2250_v19  ;;  %v2570_v40 = vrot.slane %v8238_v35, %v8035_v6  ;;  %v2264_v39 = vrot.slane %v8266_v9, %v8057_v63  ;;  %v2506_v12 = vrot.slane %v11125_v2, %v8054_v0  ;;  %v11128_v6 = vld [vmem:[#allocation93_spill] sm:$0xff] }
 0x2cc   : > { %v2497_v11 = vsel %vm2002_vm4, %v2496_v25, %v2492_v61  ;;  %v2200_v16 = vrot.slane %v11126_v32, %v8064_v42  ;;  %v2191_v52 = vsel %vm2016_vm6, %v2190_v27, %v2186_v50  ;;  %v2511_v19 = vrot.slane %v11127_v14, %v8079_v34  ;;  %v11129_v14 = vld [vmem:[#allocation92_spill] sm:$0xff] }
 0x2cd   : > { %v2502_v13 = vsel %vm10753_vm5, %v2501_v15, %v2497_v11  ;;  %v2196_v57 = vsel %vm2023_vm7, %v2195_v22, %v2191_v52  ;;  %v2205_v2 = vrot.slane %v11128_v6, %v8104_v7  ;;  %v2575_v25 = vrot.slane %v8245_v44, %v8045_v20 }
 0x2ce   : > { %v8356_v10 = vpop.xlane.xlu0 %1819  ;;  %v2566_v27 = vsel %vm1988_vm2, %v2565_v24, %v2561_v23  ;;  %v2269_v61 = vrot.slane %v8273_v33, %v8054_v0  ;;  %v2260_v11 = vsel %vm2002_vm4, %v2259_v26, %v2255_v37  ;;  %v2580_v15 = vrot.slane %v8295_v4, %v8057_v63  ;;  %v11130_v23 = vld [vmem:[#allocation94_spill] sm:$0xff]  ;;  %v11133_v63 = vld [vmem:[#allocation97_spill] sm:$0xff] }
 0x2cf   : > { %11121 = vst [vmem:[#allocation70_spill] sm:$0xff] %v8356_v10  ;;  %v8364_v41 = vpop.xlane.xlu1 %1821  ;;  %v2571_v22 = vsel %vm1995_vm3, %v2570_v40, %v2566_v27  ;;  %v2265_v50 = vsel %vm10753_vm5, %v2264_v39, %v2260_v11  ;;  %v2274_v52 = vrot.slane %v8327_v5, %v8079_v34  ;;  %v2516_v20 = vrot.slane %v11129_v14, %v8064_v42  ;;  %v11132_v27 = vld [vmem:[#allocation95_spill] sm:$0xff] }
 0x2d0   : > { %11124 = vst [vmem:[#allocation85_spill] sm:$0xff] %v8364_v41  ;;  %v2507_v24 = vsel %vm2016_vm6, %v2506_v12, %v2502_v13  ;;  %v2210_v44 = vrot.slane %v11130_v23, %v8099_v49  ;;  %v2201_v26 = vsel %vm2030_vm8, %v2200_v16, %v2196_v57  ;;  %v2521_v11 = vrot.slane %v11132_v27, %v8104_v7 }
 0x2d1   : > { %v2512_v40 = vsel %vm2023_vm7, %v2511_v19, %v2507_v24  ;;  %v2206_v39 = vsel %vm10766_vm9, %v2205_v2, %v2201_v26  ;;  %v2215_v4 = vrot.slane %v11133_v63, %v8117_v36  ;;  %v2585_v12 = vrot.slane %v8303_v58, %v8054_v0  ;;  %v11136_v58 = vld [vmem:[#allocation98_spill] sm:$0xff] }
 0x2d2   : > { %v8384_v43 = vpop.xlane.xlu0 %1695  ;;  %v2576_v13 = vsel %vm2002_vm4, %v2575_v25, %v2571_v22  ;;  %v2279_v16 = vrot.slane %v8335_v59, %v8064_v42  ;;  %v2270_v57 = vsel %vm2016_vm6, %v2269_v61, %v2265_v50  ;;  %v2590_v24 = vrot.slane %v8356_v10, %v8079_v34  ;;  %v11138_v10 = vld [vmem:[#allocation106_spill] sm:$0xff] }
 0x2d3   : > { %v8392_v35 = vpop.xlane.xlu1 %1697  ;;  %v2581_v2 = vsel %vm10753_vm5, %v2580_v15, %v2576_v13  ;;  %v2275_v19 = vsel %vm2023_vm7, %v2274_v52, %v2270_v57  ;;  %v2284_v26 = vrot.slane %v8384_v43, %v8104_v7  ;;  %v11135_v0 = vrot.slane %v11113_v28, %v8229_v56  ;;  %v11137_v52 = vld [vmem:[#allocation96_spill] sm:$0xff] }
 0x2d4   : > { %v2517_v22 = vsel %vm2030_vm8, %v2516_v20, %v2512_v40  ;;  %v2220_v61 = vrot.slane %v11136_v58, %v8107_v31  ;;  %v2211_v50 = vsel %vm10771_vm10, %v2210_v44, %v2206_v39  ;;  %v2526_v13 = vrot.slane %v11137_v52, %v8099_v49 }
 0x2d5   : > { %v2152_v25 = vsel %vm2072_vm14, %v11135_v0, %v2147_v21  ;;  %v2522_v57 = vsel %vm10766_vm9, %v2521_v11, %v2517_v22  ;;  %v2216_v34 = vsel %vm10773_vm11, %v2215_v4, %v2211_v50  ;;  %vm10774_vm5 = vcmask 1042434  }
 0x2d6   : > { %v8412_v37 = vpop.xlane.xlu0 %1823  ;;  %v2225_v0 = vrot.slane %v11138_v10, %v8210_v62  ;;  %v2595_v20 = vrot.slane %v8364_v41, %v8064_v42  ;;  %v2586_v44 = vsel %vm2016_vm6, %v2585_v12, %v2581_v2  ;;  %v2289_v40 = vrot.slane %v8392_v35, %v8099_v49 }
 0x2d7   : > { %11131 = vst [vmem:[#allocation86_spill] sm:$0xff] %v8412_v37  ;;  %v8420_v14 = vpop.xlane.xlu1 %1825  ;;  %v2280_v39 = vsel %vm2030_vm8, %v2279_v16, %v2275_v19  ;;  %v2591_v11 = vsel %vm2023_vm7, %v2590_v24, %v2586_v44  ;;  %v2600_v22 = vrot.slane %v8412_v37, %v8104_v7  ;;  %v2628_v42 = vsel %vm10765_vm15, %v2152_v25, %v8280_v29  ;;  %v11140_v16 = vld [vmem:[#allocation101_spill] sm:$0xff]  ;;  %v11141_v44 = vld [vmem:[#allocation71_spill] sm:$0xff]  ;;  %v11142_v29 = vld [vmem:[#allocation108_spill] sm:$0xff] }
 0x2d8   : > { %11134 = vst [vmem:[#allocation89_spill] sm:$0xff] %v8420_v14  ;;  %v2285_v4 = vsel %vm10766_vm9, %v2284_v26, %v2280_v39  ;;  %v11139_v12 = vrot.slane %v11112_v53, %v8107_v31  ;;  %v2531_v19 = vrot.slane %v11140_v16, %v8117_v36  ;;  %v2221_v24 = vsel %vm2058_vm12, %v2220_v61, %v2216_v34  ;;  %v11144_v37 = vld [vmem:[#allocation103_spill] sm:$0xff] }
 0x2d9   : > { %v2462_v39 = vrot.slane %v11141_v44, %v8210_v62  ;;  %v2527_v7 = vsel %vm10771_vm10, %v2526_v13, %v2522_v57  ;;  %v2230_v25 = vrot.slane %v11142_v29, %v8229_v56  ;;  %v2226_v41 = vsel %vm2065_vm13, %v2225_v0, %v2221_v24  ;;  %v11145_v24 = vld [vmem:[#allocation72_spill] sm:$0xff] }
 0x2da   : > { %v8442_v15 = vpop.xlane.xlu0 %1699  ;;  %v2458_v2 = vsel %vm2058_vm12, %v11139_v12, %v8313_v45  ;;  %v2605_v45 = vrot.slane %v8420_v14, %v8099_v49  ;;  %v2596_v12 = vsel %vm2030_vm8, %v2595_v20, %v2591_v11  ;;  %v2290_v61 = vsel %vm10771_vm10, %v2289_v40, %v2285_v4 }
 0x2db   : > { %v8450_v21 = vpop.xlane.xlu1 %1701  ;;  %v2294_v50 = vrot.slane %v8442_v15, %v8117_v36  ;;  %v2536_v13 = vrot.slane %v11144_v37, %v8107_v31  ;;  %v2601_v57 = vsel %vm10766_vm9, %v2600_v22, %v2596_v12  ;;  %v2467_v49 = vrot.slane %v11145_v24, %v8229_v56 }
 0x2dc   : > { %v2299_v34 = vrot.slane %v8450_v21, %v8107_v31  ;;  %v2532_v20 = vsel %vm10773_vm11, %v2531_v19, %v2527_v7  ;;  %v2541_v11 = vrot.slane %v8066_v51, %v8210_v62  ;;  %vm10921_vm15 = vcmask 1043459  }
 0x2dd   : > { %v2295_v53 = vsel %vm10773_vm11, %v2294_v50, %v2290_v61  ;;  %v2463_v40 = vsel %vm2065_vm13, %v2462_v39, %v2458_v2  ;;  %v2231_v4 = vsel %vm2072_vm14, %v2230_v25, %v2226_v41  ;;  %vm10920_vm9 = vcmask 1044484   ;;  %v11146_v2 = vld [vmem:[#allocation112_spill] sm:$0xff] }
 0x2de   : > { %v8474_v26 = vpop.xlane.xlu0 %1827  ;;  %v2606_v7 = vsel %vm10771_vm10, %v2605_v45, %v2601_v57  ;;  %v2300_v61 = vsel %vm2058_vm12, %v2299_v34, %v2295_v53  ;;  %v2546_v39 = vrot.slane %v11146_v2, %v8229_v56  ;;  %v2537_v41 = vsel %vm2058_vm12, %v2536_v13, %v2532_v20 }
 0x2df   : > { %v8482_v52 = vpop.xlane.xlu1 %1829  ;;  %v2610_v0 = vrot.slane %v8474_v26, %v8117_v36  ;;  %v2630_v37 = vsel %vm10774_vm5, %v2231_v4, %v2628_v42  ;;  %vm10919_vm10 = vcmask 1045509   ;;  %v2468_v34 = vsel %vm2072_vm14, %v2467_v49, %v2463_v40 }
 0x2e0   : > { %11143 = vst [vmem:[#allocation90_spill] sm:$0xff] %v8482_v52  ;;  %v2615_v12 = vrot.slane %v8482_v52, %v8107_v31  ;;  %v2542_v31 = vsel %vm2065_vm13, %v2541_v11, %v2537_v41  ;;  %vm10917_vm5 = vcmask 1047559  }
 0x2e1   : > { %v2611_v25 = vsel %vm10773_vm11, %v2610_v0, %v2606_v7  ;;  %vm10918_vm11 = vcmask 1046534   ;;  %v2547_v20 = vsel %vm2072_vm14, %v2546_v39, %v2542_v31  ;;  %v11148_v31 = vld [vmem:[#allocation30_spill] sm:$0xff] }
 0x2e2   : > { %v8501_v14 = vpop.xlane.xlu0 %1703  ;;  %v2616_v0 = vsel %vm2058_vm12, %v2615_v12, %v2611_v25  ;;  %v11150_v25 = vld [vmem:[#allocation37_spill] sm:$0xff] }
 0x2e3   : > { %v8505_v22 = vpop.xlane.xlu1 %1705  ;;  %v2304_v50 = vrot.slane %v8501_v14, %v8210_v62 }
 0x2e4   : > { %v2309_v19 = vrot.slane %v8505_v22, %v8229_v56 }
 0x2e5   : > { %v2305_v36 = vsel %vm2065_vm13, %v2304_v50, %v2300_v61  ;;  %v6823_v50 = vmov 0   ;;  %v11149_v61 = vld [vmem:[#allocation32_spill] sm:$0xff] }
 0x2e6   : > { %v2310_v45 = vsel %vm2072_vm14, %v2309_v19, %v2305_v36  ;;  %v8523_v57 = vpop.xlane.xlu0 %1831  ;;  %6157 = vset.pattern.permute.xlu0 %v6823_v50  ;;  %6156 = vset.pattern.permute.xlu1 %v6823_v50 }
 0x2e7   : > { %v8525_v52 = vpop.xlane.xlu1 %1833  ;;  %v2620_v53 = vrot.slane %v8523_v57, %v8210_v62  ;;  %v2632_v13 = vsel %vm10921_vm15, %v2310_v45, %v2630_v37 }
 0x2e8   : > { %v2625_v42 = vrot.slane %v8525_v52, %v8229_v56  ;;  %v2634_v36 = vsel %vm10920_vm9, %v8283_v54, %v2632_v13  ;;  %v11147_v54 = vld [vmem:[#allocation12_spill] sm:$0xff]  ;;  %v10775_v13 = vsub.s32 1, %v11057_v1  ;;  %v11423_v56 = vld [vmem:[#allocation105_spill] sm:$0xff]  ;;  %vm11440_vm9 = vcmask 786112  }
 0x2e9   : > { %v2621_v11 = vsel %vm2065_vm13, %v2620_v53, %v2616_v0  ;;  %v2636_v4 = vsel %vm10919_vm10, %v2468_v34, %v2634_v36  ;;  %vm11438_vm10 = vcmask 720512  }
 0x2ea   : > { %v2626_v49 = vsel %vm2072_vm14, %v2625_v42, %v2621_v11  ;;  %v2638_v37 = vsel %vm10918_vm11, %v2547_v20, %v2636_v4  ;;  %v11151_v20 = vld [vmem:[#allocation33_spill] sm:$0xff] }
 0x2eb   : > { %v2640_v40 = vsel %vm10917_vm5, %v2626_v49, %v2638_v37  ;;  %vm11428_vm5 = vcmask 458112  }
 0x2ec   : > { %2642 = vmax.xlane.f32.xlu0 %v2640_v40  ;;  %v11152_v40 = vld [vmem:[#allocation38_spill] sm:$0xff]  ;;  %vm11430_vm11 = vmmov %vm11428_vm5 }
 0x379   : > { %v8542_v12 = vpop.xlane.xlu0 %2642 }
 0x37a   : > { %v8546_v7 = vrot.slane %v8542_v12, %v11147_v54 }
 0x37c   : > { %v2686_v19 = vsub.f32 %v11148_v31, %v8546_v7  ;;  %v2685_v39 = vsub.f32 %v11149_v61, %v8546_v7  ;;  %v2695_v41 = vsub.f32 %v7774_v17, %v8546_v7  ;;  %v2687_v45 = vsub.f32 %v11150_v25, %v8546_v7  ;;  %v11153_v61 = vld [vmem:[#allocation39_spill] sm:$0xff] }
 0x37d   : > { %v2697_v0 = vsub.f32 %v7794_v30, %v8546_v7  ;;  %v2688_v11 = vsub.f32 %v11151_v20, %v8546_v7  ;;  %v8564_v17 = vrot.slane %v8542_v12, %v10775_v13  ;;  %v2699_v49 = vsub.f32 %v11089_v55, %v8546_v7  ;;  %v11159_v20 = vld [vmem:[#allocation51_spill] sm:$0xff] }
 0x37e   : > { %v2815_v53 = vmul.f32 1.442695, %v2686_v19  ;;  %v2813_v34 = vmul.f32 1.442695, %v2685_v39  ;;  %v2833_v42 = vmul.f32 1.442695, %v2695_v41  ;;  %v2689_v30 = vsub.f32 %v11152_v40, %v8546_v7 }
 0x37f   : > { %v2817_v36 = vmul.f32 1.442695, %v2687_v45  ;;  %v2837_v4 = vmul.f32 1.442695, %v2697_v0  ;;  %v2819_v37 = vmul.f32 1.442695, %v2688_v11  ;;  %v2701_v31 = vsub.f32 %v7834_v38, %v8564_v17 }
 0x380   : > { %6415 = vpow2.f32 %v2815_v53  ;;  %v2841_v50 = vmul.f32 1.442695, %v2699_v49  ;;  %v2821_v19 = vmul.f32 1.442695, %v2689_v30  ;;  %v2690_v39 = vsub.f32 %v11153_v61, %v8546_v7  ;;  %v11156_v53 = vld [vmem:[#allocation13_spill] sm:$0xff]  ;;  %v11164_v61 = vld [vmem:[#allocation15_spill] sm:$0xff] }
 0x381   : > { %6417 = vpow2.f32 %v2813_v34  ;;  %v2845_v55 = vmul.f32 1.442695, %v2701_v31  ;;  %v2703_v45 = vsub.f32 %v7854_v46, %v8564_v17  ;;  %v2691_v34 = vsub.f32 %v11156_v53, %v8546_v7  ;;  %v11167_v53 = vld [vmem:[#allocation57_spill] sm:$0xff] }
 0x382   : > { %6419 = vpow2.f32 %v2833_v42  ;;  %v2823_v38 = vmul.f32 1.442695, %v2690_v39  ;;  %v2705_v11 = vsub.f32 %v11159_v20, %v8564_v17  ;;  %v2693_v39 = vsub.f32 %v11164_v61, %v8546_v7  ;;  %v11168_v20 = vld [vmem:[#allocation43_spill] sm:$0xff] }
 0x383   : > { %6421 = vpow2.f32 %v2817_v36  ;;  %v2849_v36 = vmul.f32 1.442695, %v2703_v45  ;;  %v2825_v46 = vmul.f32 1.442695, %v2691_v34  ;;  %v2709_v34 = vsub.f32 %v11167_v53, %v8564_v17 }
 0x384   : > { %6423 = vpow2.f32 %v2837_v4  ;;  %v11160_v4 = vld [vmem:[#allocation42_spill] sm:$0xff]  ;;  %v2853_v30 = vmul.f32 1.442695, %v2705_v11  ;;  %v2694_v11 = vsub.f32 %v11168_v20, %v8546_v7  ;;  %v10780_v20 = vsub.s32 2, %v11057_v1 }
 0x385   : > { %6425 = vpow2.f32 %v2819_v37  ;;  %v2692_v49 = vsub.f32 %v11160_v4, %v8546_v7 }
 0x386   : > { %6427 = vpow2.f32 %v2841_v50  ;;  %v11163_v50 = vld [vmem:[#allocation54_spill] sm:$0xff] }
 0x387   : > { %6429 = vpow2.f32 %v2821_v19  ;;  %v2707_v31 = vsub.f32 %v11163_v50, %v8564_v17  ;;  %v2827_v19 = vmul.f32 1.442695, %v2692_v49  ;;  %v2861_v49 = vmul.f32 1.442695, %v2709_v34  ;;  %v11175_v34 = vld [vmem:[#allocation65_spill] sm:$0xff] }
 0x388   : > { %6431 = vpow2.f32 %v2845_v55 }
 0x389   : > { %6433 = vpow2.f32 %v2823_v38  ;;  %v2857_v38 = vmul.f32 1.442695, %v2707_v31  ;;  %v2831_v31 = vmul.f32 1.442695, %v2694_v11  ;;  %v11176_v11 = vld [vmem:[#allocation45_spill] sm:$0xff] }
 0x38a   : > { %v8574_v41 = vpop.eup %6415  ;;  %6435 = vpow2.f32 %v2849_v36  ;;  %v2829_v36 = vmul.f32 1.442695, %v2693_v39 }
 0x38b   : > { %11154 = vst [vmem:[#allocation93_spill] sm:$0xff] %v8574_v41  ;;  %v8576_v25 = vpop.eup %6417  ;;  %3201 = vperm.xlu0 %6157, %v8574_v41   ;;  %6437 = vpow2.f32 %v2825_v46 }
 0x38c   : > { %11155 = vst [vmem:[#allocation94_spill] sm:$0xff] %v8576_v25  ;;  %3198 = vperm.xlu1 %6156, %v8576_v25   ;;  %v8584_v42 = vpop.eup %6419  ;;  %6439 = vpow2.f32 %v2853_v30  ;;  %v11171_v30 = vld [vmem:[#allocation61_spill] sm:$0xff] }
 0x38d   : > { %11157 = vst [vmem:[#allocation95_spill] sm:$0xff] %v8584_v42  ;;  %v8586_v0 = vpop.eup %6421  ;;  %6441 = vpow2.f32 %v2827_v19  ;;  %v2711_v50 = vsub.f32 %v11171_v30, %v8564_v17  ;;  %v11172_v19 = vld [vmem:[#allocation44_spill] sm:$0xff]  ;;  %v2713_v30 = vsub.f32 %v11175_v34, %v8564_v17  ;;  %v11180_v34 = vld [vmem:[#allocation47_spill] sm:$0xff] }
 0x38e   : > { %11158 = vst [vmem:[#allocation97_spill] sm:$0xff] %v8586_v0  ;;  %v8594_v37 = vpop.eup %6423  ;;  %6443 = vpow2.f32 %v2857_v38  ;;  %v2696_v61 = vsub.f32 %v11172_v19, %v8546_v7  ;;  %v2698_v19 = vsub.f32 %v11176_v11, %v8546_v7  ;;  %v2700_v11 = vsub.f32 %v11180_v34, %v8546_v7 }
 0x38f   : > { %3228 = vperm.xlu0 %6157, %v8584_v42   ;;  %11161 = vst [vmem:[#allocation98_spill] sm:$0xff] %v8594_v37  ;;  %v8596_v40 = vpop.eup %6425  ;;  %6445 = vpow2.f32 %v2829_v36  ;;  %v2865_v38 = vmul.f32 1.442695, %v2711_v50  ;;  %v8643_v42 = vrot.slane %v8542_v12, %v10780_v20  ;;  %v11179_v50 = vld [vmem:[#allocation69_spill] sm:$0xff] }
 0x390   : > { %3204 = vperm.xlu1 %6156, %v8586_v0   ;;  %11162 = vst [vmem:[#allocation106_spill] sm:$0xff] %v8596_v40  ;;  %v8604_v55 = vpop.eup %6427  ;;  %6447 = vpow2.f32 %v2861_v49  ;;  %v2835_v36 = vmul.f32 1.442695, %v2696_v61  ;;  %v2869_v49 = vmul.f32 1.442695, %v2713_v30 }
 0x391   : > { %11165 = vst [vmem:[#allocation101_spill] sm:$0xff] %v8604_v55  ;;  %v8606_v45 = vpop.eup %6429  ;;  %6449 = vpow2.f32 %v2831_v31  ;;  %v2715_v31 = vsub.f32 %v11179_v50, %v8564_v17  ;;  %v2839_v61 = vmul.f32 1.442695, %v2698_v19  ;;  %v2843_v50 = vmul.f32 1.442695, %v2700_v11 }
 0x392   : > { %11166 = vst [vmem:[#allocation71_spill] sm:$0xff] %v8606_v45  ;;  %v8614_v46 = vpop.eup %6431  ;;  %6451 = vpow2.f32 %v2865_v38  ;;  %v11183_v38 = vld [vmem:[#allocation73_spill] sm:$0xff] }
 0x393   : > { %3234 = vperm.xlu0 %6157, %v8594_v37   ;;  %11169 = vst [vmem:[#allocation108_spill] sm:$0xff] %v8614_v46  ;;  %v8616_v4 = vpop.eup %6433  ;;  %6453 = vpow2.f32 %v2835_v36  ;;  %v2873_v20 = vmul.f32 1.442695, %v2715_v31  ;;  %v2717_v30 = vsub.f32 %v11183_v38, %v8643_v42  ;;  %v11184_v36 = vld [vmem:[#allocation48_spill] sm:$0xff] }
 0x394   : > { %3207 = vperm.xlu1 %6156, %v8596_v40   ;;  %11170 = vst [vmem:[#allocation72_spill] sm:$0xff] %v8616_v4  ;;  %v8624_v39 = vpop.eup %6435  ;;  %6455 = vpow2.f32 %v2869_v49  ;;  %v2702_v19 = vsub.f32 %v11184_v36, %v8564_v17  ;;  %v11187_v49 = vld [vmem:[#allocation77_spill] sm:$0xff] }
 0x395   : > { %11173 = vst [vmem:[#allocation112_spill] sm:$0xff] %v8624_v39  ;;  %v8626_v53 = vpop.eup %6437  ;;  %6457 = vpow2.f32 %v2839_v61  ;;  %v2877_v34 = vmul.f32 1.442695, %v2717_v30  ;;  %v2719_v31 = vsub.f32 %v11187_v49, %v8643_v42  ;;  %v11188_v61 = vld [vmem:[#allocation49_spill] sm:$0xff] }
 0x396   : > { %11174 = vst [vmem:[#allocation30_spill] sm:$0xff] %v8626_v53  ;;  %v8635_v13 = vpop.eup %6439  ;;  %6459 = vpow2.f32 %v2873_v20  ;;  %v2847_v38 = vmul.f32 1.442695, %v2702_v19  ;;  %v2704_v11 = vsub.f32 %v11188_v61, %v8564_v17  ;;  %v11191_v20 = vld [vmem:[#allocation81_spill] sm:$0xff] }
 0x397   : > { %3240 = vperm.xlu0 %6157, %v8604_v55   ;;  %11177 = vst [vmem:[#allocation32_spill] sm:$0xff] %v8635_v13  ;;  %v8637_v37 = vpop.eup %6441  ;;  %6461 = vpow2.f32 %v2843_v50  ;;  %v2721_v30 = vsub.f32 %v11191_v20, %v8643_v42  ;;  %v11192_v50 = vld [vmem:[#allocation52_spill] sm:$0xff] }
 0x398   : > { %3210 = vperm.xlu1 %6156, %v8606_v45   ;;  %11178 = vst [vmem:[#allocation37_spill] sm:$0xff] %v8637_v37  ;;  %6463 = vpow2.f32 %v2877_v34  ;;  %v2851_v49 = vmul.f32 1.442695, %v2704_v11  ;;  %v2706_v19 = vsub.f32 %v11192_v50, %v8564_v17  ;;  %v2723_v34 = vsub.f32 %v11118_v48, %v8643_v42 }
 0x399   : > { %6465 = vpow2.f32 %v2847_v38  ;;  %v11195_v38 = vld [vmem:[#allocation55_spill] sm:$0xff] }
 0x39a   : > { %v2708_v11 = vsub.f32 %v11195_v38, %v8564_v17 }
 0x39b   : > { %3246 = vperm.xlu0 %6157, %v8614_v46  }
 0x39c   : > { %3213 = vperm.xlu1 %6156, %v8616_v4   ;;  %v2859_v48 = vmul.f32 1.442695, %v2708_v11 }
 0x39f   : > { %3252 = vperm.xlu0 %6157, %v8624_v39  }
 0x3a0   : > { %3216 = vperm.xlu1 %6156, %v8626_v53   ;;  %v8650_v53 = vpop.eup %6443 }
 0x3a1   : > { %11181 = vst [vmem:[#allocation33_spill] sm:$0xff] %v8650_v53  ;;  %v8652_v4 = vpop.eup %6445 }
 0x3a2   : > { %11182 = vst [vmem:[#allocation38_spill] sm:$0xff] %v8652_v4 }
 0x3a3   : > { %3258 = vperm.xlu0 %6157, %v8635_v13  }
 0x3a4   : > { %3219 = vperm.xlu1 %6156, %v8637_v37   ;;  %v8660_v37 = vpop.eup %6447 }
 0x3a5   : > { %11185 = vst [vmem:[#allocation39_spill] sm:$0xff] %v8660_v37  ;;  %v8662_v7 = vpop.eup %6449 }
 0x3a6   : > { %11186 = vst [vmem:[#allocation13_spill] sm:$0xff] %v8662_v7 }
 0x3a7   : > { %3264 = vperm.xlu0 %6157, %v8650_v53   ;;  %v8670_v53 = vpop.eup %6451 }
 0x3a8   : > { %3222 = vperm.xlu1 %6156, %v8652_v4   ;;  %11189 = vst [vmem:[#allocation51_spill] sm:$0xff] %v8670_v53  ;;  %v8672_v36 = vpop.eup %6453 }
 0x3a9   : > { %11190 = vst [vmem:[#allocation42_spill] sm:$0xff] %v8672_v36 }
 0x3ab   : > { %3270 = vperm.xlu0 %6157, %v8660_v37   ;;  %v8680_v37 = vpop.eup %6455 }
 0x3ac   : > { %3225 = vperm.xlu1 %6156, %v8662_v7   ;;  %v2881_v7 = vmul.f32 1.442695, %v2719_v31  ;;  %11193 = vst [vmem:[#allocation54_spill] sm:$0xff] %v8680_v37  ;;  %v8682_v61 = vpop.eup %6457  ;;  %v2855_v31 = vmul.f32 1.442695, %v2706_v19 }
 0x3ad   : > { %11194 = vst [vmem:[#allocation15_spill] sm:$0xff] %v8682_v61  ;;  %v8690_v20 = vpop.eup %6459 }
 0x3ae   : > { %6467 = vpow2.f32 %v2881_v7  ;;  %11196 = vst [vmem:[#allocation57_spill] sm:$0xff] %v8690_v20  ;;  %v8692_v50 = vpop.eup %6461  ;;  %v2725_v7 = vsub.f32 %v11123_v8, %v8643_v42 }
 0x3af   : > { %3276 = vperm.xlu0 %6157, %v8670_v53   ;;  %6469 = vpow2.f32 %v2851_v49  ;;  %11197 = vst [vmem:[#allocation43_spill] sm:$0xff] %v8692_v50  ;;  %v8700_v19 = vpop.eup %6463 }
 0x3b0   : > { %3231 = vperm.xlu1 %6156, %v8672_v36   ;;  %v2885_v36 = vmul.f32 1.442695, %v2721_v30  ;;  %v11198_v30 = vld [vmem:[#allocation58_spill] sm:$0xff]  ;;  %11199 = vst [vmem:[#allocation61_spill] sm:$0xff] %v8700_v19  ;;  %v8702_v38 = vpop.eup %6465 }
 0x3b1   : > { %v2710_v49 = vsub.f32 %v11198_v30, %v8564_v17  ;;  %11200 = vst [vmem:[#allocation44_spill] sm:$0xff] %v8702_v38 }
 0x3b2   : > { %6471 = vpow2.f32 %v2885_v36  ;;  %v2727_v36 = vsub.f32 %v11128_v6, %v8643_v42  ;;  %v2729_v6 = vsub.f32 %v11133_v63, %v8643_v42 }
 0x3b3   : > { %3282 = vperm.xlu0 %6157, %v8680_v37   ;;  %6473 = vpow2.f32 %v2855_v31  ;;  %v2863_v8 = vmul.f32 1.442695, %v2710_v49 }
 0x3b4   : > { %3237 = vperm.xlu1 %6156, %v8682_v61   ;;  %v2889_v61 = vmul.f32 1.442695, %v2723_v34  ;;  %v11201_v34 = vld [vmem:[#allocation62_spill] sm:$0xff]  ;;  %v2901_v63 = vmul.f32 1.442695, %v2729_v6 }
 0x3b5   : > { %v2712_v31 = vsub.f32 %v11201_v34, %v8564_v17 }
 0x3b6   : > { %6475 = vpow2.f32 %v2889_v61  ;;  %v2897_v61 = vmul.f32 1.442695, %v2727_v36 }
 0x3b7   : > { %3288 = vperm.xlu0 %6157, %v8690_v20   ;;  %6477 = vpow2.f32 %v2859_v48  ;;  %v11204_v48 = vld [vmem:[#allocation66_spill] sm:$0xff] }
 0x3b8   : > { %3243 = vperm.xlu1 %6156, %v8692_v50   ;;  %v2893_v50 = vmul.f32 1.442695, %v2725_v7  ;;  %v8710_v11 = vpop.eup %6467  ;;  %v2867_v7 = vmul.f32 1.442695, %v2712_v31  ;;  %v2714_v49 = vsub.f32 %v11204_v48, %v8564_v17 }
 0x3b9   : > { %11202 = vst [vmem:[#allocation65_spill] sm:$0xff] %v8710_v11  ;;  %v8712_v30 = vpop.eup %6469 }
 0x3ba   : > { %11203 = vst [vmem:[#allocation45_spill] sm:$0xff] %v8712_v30  ;;  %6479 = vpow2.f32 %v2893_v50  ;;  %v2731_v50 = vsub.f32 %v11138_v10, %v8643_v42  ;;  %v2871_v36 = vmul.f32 1.442695, %v2714_v49 }
 0x3bb   : > { %3294 = vperm.xlu0 %6157, %v8700_v19   ;;  %v10791_v19 = vsub.s32 3, %v11057_v1  ;;  %6481 = vpow2.f32 %v2863_v8  ;;  %v2716_v8 = vsub.f32 %v11113_v28, %v8564_v17 }
 0x3bc   : > { %3249 = vperm.xlu1 %6156, %v8702_v38   ;;  %v8721_v34 = vpop.eup %6471  ;;  %6483 = vpow2.f32 %v2897_v61  ;;  %v11209_v61 = vld [vmem:[#allocation114_spill] sm:$0xff] }
 0x3bd   : > { %11205 = vst [vmem:[#allocation69_spill] sm:$0xff] %v8721_v34  ;;  %v8723_v38 = vpop.eup %6473  ;;  %6485 = vpow2.f32 %v2867_v7  ;;  %v2875_v10 = vmul.f32 1.442695, %v2716_v8  ;;  %v11210_v7 = vld [vmem:[#allocation74_spill] sm:$0xff] }
 0x3be   : > { %11206 = vst [vmem:[#allocation47_spill] sm:$0xff] %v8723_v38  ;;  %6487 = vpow2.f32 %v2901_v63  ;;  %v2718_v49 = vsub.f32 %v11210_v7, %v8643_v42  ;;  %v11213_v63 = vld [vmem:[#allocation122_spill] sm:$0xff] }
 0x3bf   : > { %3300 = vperm.xlu0 %6157, %v8710_v11   ;;  %6489 = vpow2.f32 %v2871_v36  ;;  %v11214_v36 = vld [vmem:[#allocation78_spill] sm:$0xff] }
 0x3c0   : > { %3255 = vperm.xlu1 %6156, %v8712_v30   ;;  %v8729_v30 = vrot.slane %v8542_v12, %v10791_v19  ;;  %v8736_v31 = vpop.eup %6475  ;;  %v2905_v19 = vmul.f32 1.442695, %v2731_v50  ;;  %v2720_v8 = vsub.f32 %v11214_v36, %v8643_v42 }
 0x3c1   : > { %11207 = vst [vmem:[#allocation73_spill] sm:$0xff] %v8736_v31  ;;  %v8738_v48 = vpop.eup %6477 }
 0x3c2   : > { %11208 = vst [vmem:[#allocation48_spill] sm:$0xff] %v8738_v48  ;;  %v2733_v6 = vsub.f32 %v11209_v61, %v8729_v30  ;;  %6491 = vpow2.f32 %v2905_v19  ;;  %v2735_v50 = vsub.f32 %v11213_v63, %v8729_v30  ;;  %v2879_v61 = vmul.f32 1.442695, %v2718_v49 }
 0x3c3   : > { %3306 = vperm.xlu0 %6157, %v8721_v34   ;;  %6493 = vpow2.f32 %v2875_v10  ;;  %v2737_v19 = vsub.f32 %v8212_v60, %v8729_v30  ;;  %v11217_v10 = vld [vmem:[#allocation82_spill] sm:$0xff] }
 0x3c4   : > { %3261 = vperm.xlu1 %6156, %v8723_v38   ;;  %v8746_v38 = vpop.eup %6479  ;;  %v2909_v17 = vmul.f32 1.442695, %v2733_v6  ;;  %v2883_v6 = vmul.f32 1.442695, %v2720_v8  ;;  %v2722_v49 = vsub.f32 %v11217_v10, %v8643_v42 }
 0x3c5   : > { %11211 = vst [vmem:[#allocation77_spill] sm:$0xff] %v8746_v38  ;;  %v8748_v28 = vpop.eup %6481 }
 0x3c6   : > { %11212 = vst [vmem:[#allocation49_spill] sm:$0xff] %v8748_v28  ;;  %6495 = vpow2.f32 %v2909_v17  ;;  %v2739_v17 = vsub.f32 %v8266_v9, %v8729_v30  ;;  %v2887_v60 = vmul.f32 1.442695, %v2722_v49 }
 0x3c7   : > { %3312 = vperm.xlu0 %6157, %v8736_v31   ;;  %6497 = vpow2.f32 %v2879_v61 }
 0x3c8   : > { %3267 = vperm.xlu1 %6156, %v8738_v48   ;;  %v8756_v48 = vpop.eup %6483  ;;  %v2921_v10 = vmul.f32 1.442695, %v2739_v17  ;;  %v2728_v17 = vsub.f32 %v11130_v23, %v8643_v42  ;;  %v2730_v23 = vsub.f32 %v11136_v58, %v8643_v42 }
 0x3c9   : > { %11215 = vst [vmem:[#allocation81_spill] sm:$0xff] %v8756_v48  ;;  %v8758_v7 = vpop.eup %6485 }
 0x3ca   : > { %11216 = vst [vmem:[#allocation52_spill] sm:$0xff] %v8758_v7  ;;  %v8766_v63 = vpop.eup %6487  ;;  %v2903_v58 = vmul.f32 1.442695, %v2730_v23 }
 0x3cb   : > { %3318 = vperm.xlu0 %6157, %v8746_v38   ;;  %11218 = vst [vmem:[#allocation55_spill] sm:$0xff] %v8766_v63  ;;  %v8768_v36 = vpop.eup %6489 }
 0x3cc   : > { %3273 = vperm.xlu1 %6156, %v8748_v28   ;;  %v2913_v28 = vmul.f32 1.442695, %v2735_v50  ;;  %11219 = vst [vmem:[#allocation58_spill] sm:$0xff] %v8768_v36  ;;  %v2724_v50 = vsub.f32 %v11120_v47, %v8643_v42  ;;  %v8776_v61 = vpop.eup %6491 }
 0x3cd   : > { %11220 = vst [vmem:[#allocation62_spill] sm:$0xff] %v8776_v61  ;;  %v8778_v8 = vpop.eup %6493 }
 0x3ce   : > { %6499 = vpow2.f32 %v2913_v28  ;;  %11221 = vst [vmem:[#allocation66_spill] sm:$0xff] %v8778_v8  ;;  %v2741_v28 = vsub.f32 %v8327_v5, %v8729_v30  ;;  %v2891_v9 = vmul.f32 1.442695, %v2724_v50  ;;  %v10797_v50 = vsub.s32 4, %v11057_v1 }
 0x3cf   : > { %3324 = vperm.xlu0 %6157, %v8756_v48   ;;  %6501 = vpow2.f32 %v2883_v6 }
 0x3d0   : > { %3279 = vperm.xlu1 %6156, %v8758_v7   ;;  %v2917_v7 = vmul.f32 1.442695, %v2737_v19  ;;  %v2726_v19 = vsub.f32 %v11126_v32, %v8643_v42  ;;  %v8786_v6 = vpop.eup %6495  ;;  %v2925_v49 = vmul.f32 1.442695, %v2741_v28  ;;  %v2899_v28 = vmul.f32 1.442695, %v2728_v17 }
 0x3d1   : > { %11222 = vst [vmem:[#allocation114_spill] sm:$0xff] %v8786_v6  ;;  %v8788_v47 = vpop.eup %6497 }
 0x3d2   : > { %6503 = vpow2.f32 %v2917_v7  ;;  %11223 = vst [vmem:[#allocation74_spill] sm:$0xff] %v8788_v47  ;;  %v2743_v7 = vsub.f32 %v8384_v43, %v8729_v30  ;;  %v2895_v5 = vmul.f32 1.442695, %v2726_v19  ;;  %v2745_v43 = vsub.f32 %v8442_v15, %v8729_v30 }
 0x3d3   : > { %3330 = vperm.xlu0 %6157, %v8766_v63   ;;  %6505 = vpow2.f32 %v2887_v60 }
 0x3d4   : > { %3285 = vperm.xlu1 %6156, %v8768_v36   ;;  %6507 = vpow2.f32 %v2921_v10  ;;  %v2929_v10 = vmul.f32 1.442695, %v2743_v7  ;;  %v2933_v15 = vmul.f32 1.442695, %v2745_v43  ;;  %v2732_v7 = vsub.f32 %v11142_v29, %v8643_v42 }
 0x3d5   : > { %6509 = vpow2.f32 %v2891_v9 }
 0x3d6   : > { %6511 = vpow2.f32 %v2925_v49  ;;  %v2747_v49 = vsub.f32 %v8501_v14, %v8729_v30  ;;  %v2907_v14 = vmul.f32 1.442695, %v2732_v7 }
 0x3d7   : > { %3336 = vperm.xlu0 %6157, %v8776_v61   ;;  %6513 = vpow2.f32 %v2895_v5 }
 0x3d8   : > { %3291 = vperm.xlu1 %6156, %v8778_v8   ;;  %v8796_v60 = vpop.eup %6499  ;;  %6515 = vpow2.f32 %v2929_v10  ;;  %v11230_v10 = vld [vmem:[#allocation34_spill] sm:$0xff] }
 0x3d9   : > { %11224 = vst [vmem:[#allocation122_spill] sm:$0xff] %v8796_v60  ;;  %v8798_v32 = vpop.eup %6501  ;;  %6517 = vpow2.f32 %v2899_v28  ;;  %v11231_v28 = vld [vmem:[#allocation116_spill] sm:$0xff] }
 0x3da   : > { %11225 = vst [vmem:[#allocation78_spill] sm:$0xff] %v8798_v32  ;;  %6519 = vpow2.f32 %v2933_v15  ;;  %v2734_v23 = vsub.f32 %v11231_v28, %v8729_v30  ;;  %v11234_v15 = vld [vmem:[#allocation36_spill] sm:$0xff] }
 0x3db   : > { %3342 = vperm.xlu0 %6157, %v8786_v6   ;;  %6521 = vpow2.f32 %v2903_v58  ;;  %v2736_v58 = vsub.f32 %v8164_v3, %v8729_v30 }
 0x3dc   : > { %3297 = vperm.xlu1 %6156, %v8788_v47   ;;  %v8807_v9 = vpop.eup %6503 }
 0x3dd   : > { %11226 = vst [vmem:[#allocation82_spill] sm:$0xff] %v8807_v9  ;;  %v8809_v19 = vpop.eup %6505 }
 0x3de   : > { %11227 = vst [vmem:[#allocation129_spill] sm:$0xff] %v8809_v19  ;;  %v8822_v5 = vpop.eup %6507 }
 0x3df   : > { %3348 = vperm.xlu0 %6157, %v8796_v60   ;;  %11228 = vst [vmem:[#allocation130_spill] sm:$0xff] %v8822_v5  ;;  %v8824_v17 = vpop.eup %6509 }
 0x3e0   : > { %3303 = vperm.xlu1 %6156, %v8798_v32   ;;  %v8815_v32 = vrot.slane %v8542_v12, %v10797_v50  ;;  %11229 = vst [vmem:[#allocation131_spill] sm:$0xff] %v8824_v17  ;;  %v2937_v50 = vmul.f32 1.442695, %v2747_v49 }
 0x3e2   : > { %v2749_v43 = vsub.f32 %v11230_v10, %v8815_v32  ;;  %6523 = vpow2.f32 %v2937_v50  ;;  %v2751_v49 = vsub.f32 %v11234_v15, %v8815_v32  ;;  %v2911_v10 = vmul.f32 1.442695, %v2734_v23  ;;  %v11237_v50 = vld [vmem:[#allocation40_spill] sm:$0xff] }
 0x3e3   : > { %3354 = vperm.xlu0 %6157, %v8807_v9   ;;  %6525 = vpow2.f32 %v2907_v14  ;;  %v2915_v15 = vmul.f32 1.442695, %v2736_v58  ;;  %v2738_v14 = vsub.f32 %v8220_v18, %v8729_v30 }
 0x3e4   : > { %3309 = vperm.xlu1 %6156, %v8809_v19   ;;  %v8832_v19 = vpop.eup %6511  ;;  %v2941_v42 = vmul.f32 1.442695, %v2749_v43  ;;  %v2753_v43 = vsub.f32 %v11237_v50, %v8815_v32 }
 0x3e5   : > { %11232 = vst [vmem:[#allocation34_spill] sm:$0xff] %v8832_v19  ;;  %v8834_v29 = vpop.eup %6513  ;;  %v2919_v50 = vmul.f32 1.442695, %v2738_v14 }
 0x3e6   : > { %11233 = vst [vmem:[#allocation116_spill] sm:$0xff] %v8834_v29  ;;  %v8842_v7 = vpop.eup %6515  ;;  %6527 = vpow2.f32 %v2941_v42  ;;  %v11240_v42 = vld [vmem:[#allocation16_spill] sm:$0xff] }
 0x3e7   : > { %3360 = vperm.xlu0 %6157, %v8822_v5   ;;  %11235 = vst [vmem:[#allocation36_spill] sm:$0xff] %v8842_v7  ;;  %v8844_v28 = vpop.eup %6517  ;;  %6529 = vpow2.f32 %v2911_v10  ;;  %v2740_v10 = vsub.f32 %v8273_v33, %v8729_v30 }
 0x3e8   : > { %3315 = vperm.xlu1 %6156, %v8824_v17   ;;  %11236 = vst [vmem:[#allocation132_spill] sm:$0xff] %v8844_v28  ;;  %v8852_v23 = vpop.eup %6519 }
 0x3e9   : > { %11238 = vst [vmem:[#allocation40_spill] sm:$0xff] %v8852_v23  ;;  %v8854_v3 = vpop.eup %6521 }
 0x3ea   : > { %11239 = vst [vmem:[#allocation133_spill] sm:$0xff] %v8854_v3 }
 0x3eb   : > { %3366 = vperm.xlu0 %6157, %v8832_v19  }
 0x3ec   : > { %3321 = vperm.xlu1 %6156, %v8834_v29   ;;  %v2945_v29 = vmul.f32 1.442695, %v2751_v49  ;;  %v2755_v49 = vsub.f32 %v11240_v42, %v8815_v32  ;;  %v8862_v58 = vpop.eup %6523  ;;  %v2923_v42 = vmul.f32 1.442695, %v2740_v10 }
 0x3ed   : > { %11241 = vst [vmem:[#allocation16_spill] sm:$0xff] %v8862_v58  ;;  %v8864_v18 = vpop.eup %6525 }
 0x3ee   : > { %6531 = vpow2.f32 %v2945_v29  ;;  %11242 = vst [vmem:[#allocation134_spill] sm:$0xff] %v8864_v18  ;;  %v11243_v29 = vld [vmem:[#allocation18_spill] sm:$0xff] }
 0x3ef   : > { %3372 = vperm.xlu0 %6157, %v8842_v7   ;;  %6533 = vpow2.f32 %v2915_v15  ;;  %v2742_v15 = vsub.f32 %v8335_v59, %v8729_v30 }
 0x3f0   : > { %3327 = vperm.xlu1 %6156, %v8844_v28   ;;  %v2949_v28 = vmul.f32 1.442695, %v2753_v43  ;;  %v2757_v43 = vsub.f32 %v11243_v29, %v8815_v32  ;;  %v8872_v14 = vpop.eup %6527 }
 0x3f1   : > { %11244 = vst [vmem:[#allocation18_spill] sm:$0xff] %v8872_v14  ;;  %v8874_v33 = vpop.eup %6529  ;;  %v2927_v29 = vmul.f32 1.442695, %v2742_v15 }
 0x3f2   : > { %6535 = vpow2.f32 %v2949_v28  ;;  %11245 = vst [vmem:[#allocation135_spill] sm:$0xff] %v8874_v33  ;;  %v11246_v28 = vld [vmem:[#allocation20_spill] sm:$0xff] }
 0x3f3   : > { %3378 = vperm.xlu0 %6157, %v8852_v23   ;;  %6537 = vpow2.f32 %v2919_v50  ;;  %v2744_v50 = vsub.f32 %v8392_v35, %v8729_v30  ;;  %v2746_v35 = vsub.f32 %v8450_v21, %v8729_v30 }
 0x3f4   : > { %3333 = vperm.xlu1 %6156, %v8854_v3   ;;  %v2953_v3 = vmul.f32 1.442695, %v2755_v49  ;;  %v2759_v49 = vsub.f32 %v11246_v28, %v8815_v32 }
 0x3f5   : > { %v2935_v21 = vmul.f32 1.442695, %v2746_v35 }
 0x3f6   : > { %6539 = vpow2.f32 %v2953_v3  ;;  %v2961_v3 = vmul.f32 1.442695, %v2759_v49  ;;  %v11252_v49 = vld [vmem:[#allocation24_spill] sm:$0xff] }
 0x3f7   : > { %3384 = vperm.xlu0 %6157, %v8862_v58   ;;  %6541 = vpow2.f32 %v2923_v42  ;;  %v2931_v42 = vmul.f32 1.442695, %v2744_v50  ;;  %v2748_v50 = vsub.f32 %v8505_v22, %v8729_v30 }
 0x3f8   : > { %3339 = vperm.xlu1 %6156, %v8864_v18   ;;  %v2957_v18 = vmul.f32 1.442695, %v2757_v43  ;;  %v8882_v10 = vpop.eup %6531  ;;  %v11249_v43 = vld [vmem:[#allocation22_spill] sm:$0xff] }
 0x3f9   : > { %11247 = vst [vmem:[#allocation20_spill] sm:$0xff] %v8882_v10  ;;  %v8884_v59 = vpop.eup %6533  ;;  %v2761_v28 = vsub.f32 %v11249_v43, %v8815_v32 }
 0x3fa   : > { %11248 = vst [vmem:[#allocation136_spill] sm:$0xff] %v8884_v59  ;;  %6543 = vpow2.f32 %v2957_v18 }
 0x3fb   : > { %3390 = vperm.xlu0 %6157, %v8872_v14   ;;  %v10807_v14 = vsub.s32 5, %v11057_v1  ;;  %6545 = vpow2.f32 %v2927_v29  ;;  %v2965_v18 = vmul.f32 1.442695, %v2761_v28  ;;  %v2763_v29 = vsub.f32 %v11252_v49, %v8815_v32 }
 0x3fc   : > { %3345 = vperm.xlu1 %6156, %v8874_v33   ;;  %v8893_v15 = vpop.eup %6535  ;;  %6547 = vpow2.f32 %v2961_v3  ;;  %v11255_v3 = vld [vmem:[#allocation26_spill] sm:$0xff]  ;;  %v2939_v49 = vmul.f32 1.442695, %v2748_v50 }
 0x3fd   : > { %11250 = vst [vmem:[#allocation22_spill] sm:$0xff] %v8893_v15  ;;  %v8895_v33 = vpop.eup %6537  ;;  %6549 = vpow2.f32 %v2931_v42  ;;  %v11256_v42 = vld [vmem:[#allocation31_spill] sm:$0xff] }
 0x3fe   : > { %11251 = vst [vmem:[#allocation137_spill] sm:$0xff] %v8895_v33  ;;  %6551 = vpow2.f32 %v2965_v18  ;;  %v2750_v35 = vsub.f32 %v11256_v42, %v8815_v32 }
 0x3ff   : > { %3396 = vperm.xlu0 %6157, %v8882_v10   ;;  %6553 = vpow2.f32 %v2935_v21 }
 0x400   : > { %3351 = vperm.xlu1 %6156, %v8884_v59   ;;  %v8901_v59 = vrot.slane %v8542_v12, %v10807_v14  ;;  %v8908_v43 = vpop.eup %6539  ;;  %v2969_v14 = vmul.f32 1.442695, %v2763_v29  ;;  %v11259_v29 = vld [vmem:[#allocation27_spill] sm:$0xff]  ;;  %v2943_v50 = vmul.f32 1.442695, %v2750_v35 }
 0x401   : > { %11253 = vst [vmem:[#allocation24_spill] sm:$0xff] %v8908_v43 }
 0x402   : > { %v2765_v28 = vsub.f32 %v11255_v3, %v8901_v59  ;;  %6555 = vpow2.f32 %v2969_v14  ;;  %v2767_v21 = vsub.f32 %v11259_v29, %v8901_v59  ;;  %v11260_v3 = vld [vmem:[#allocation35_spill] sm:$0xff]  ;;  %v11264_v29 = vld [vmem:[#allocation41_spill] sm:$0xff] }
 0x403   : > { %3402 = vperm.xlu0 %6157, %v8893_v15   ;;  %v8910_v15 = vpop.eup %6541  ;;  %6557 = vpow2.f32 %v2939_v49  ;;  %v2752_v42 = vsub.f32 %v11260_v3, %v8815_v32  ;;  %v2754_v3 = vsub.f32 %v11264_v29, %v8815_v32 }
 0x404   : > { %3357 = vperm.xlu1 %6156, %v8895_v33   ;;  %11254 = vst [vmem:[#allocation138_spill] sm:$0xff] %v8910_v15  ;;  %v8918_v33 = vpop.eup %6543  ;;  %v2973_v18 = vmul.f32 1.442695, %v2765_v28  ;;  %v2977_v14 = vmul.f32 1.442695, %v2767_v21  ;;  %v11263_v28 = vld [vmem:[#allocation28_spill] sm:$0xff] }
 0x405   : > { %11257 = vst [vmem:[#allocation26_spill] sm:$0xff] %v8918_v33  ;;  %v8922_v30 = vpop.eup %6545  ;;  %v2769_v49 = vsub.f32 %v11263_v28, %v8901_v59  ;;  %v2947_v35 = vmul.f32 1.442695, %v2752_v42  ;;  %v11267_v21 = vld [vmem:[#allocation29_spill] sm:$0xff]  ;;  %v2951_v42 = vmul.f32 1.442695, %v2754_v3 }
 0x406   : > { %11258 = vst [vmem:[#allocation31_spill] sm:$0xff] %v8922_v30  ;;  %6559 = vpow2.f32 %v2973_v18  ;;  %v11268_v28 = vld [vmem:[#allocation14_spill] sm:$0xff] }
 0x407   : > { %3408 = vperm.xlu0 %6157, %v8908_v43   ;;  %6561 = vpow2.f32 %v2943_v50  ;;  %v2981_v18 = vmul.f32 1.442695, %v2769_v49  ;;  %v2771_v50 = vsub.f32 %v11267_v21, %v8901_v59  ;;  %v2756_v29 = vsub.f32 %v11268_v28, %v8815_v32  ;;  %v11271_v49 = vld [vmem:[#allocation59_spill] sm:$0xff]  ;;  %v11272_v21 = vld [vmem:[#allocation17_spill] sm:$0xff] }
 0x408   : > { %3363 = vperm.xlu1 %6156, %v8910_v15   ;;  %v8932_v15 = vpop.eup %6547  ;;  %6563 = vpow2.f32 %v2977_v14  ;;  %v2758_v28 = vsub.f32 %v11272_v21, %v8815_v32 }
 0x409   : > { %11261 = vst [vmem:[#allocation27_spill] sm:$0xff] %v8932_v15  ;;  %v8936_v17 = vpop.eup %6549  ;;  %6565 = vpow2.f32 %v2947_v35  ;;  %v2985_v14 = vmul.f32 1.442695, %v2771_v50  ;;  %v2773_v35 = vsub.f32 %v11271_v49, %v8901_v59  ;;  %v2955_v3 = vmul.f32 1.442695, %v2756_v29  ;;  %v11275_v50 = vld [vmem:[#allocation63_spill] sm:$0xff] }
 0x40a   : > { %v8920_v22 = vpop.permute.xlu0 %3201  ;;  %11262 = vst [vmem:[#allocation35_spill] sm:$0xff] %v8936_v17  ;;  %6567 = vpow2.f32 %v2981_v18  ;;  %v2959_v29 = vmul.f32 1.442695, %v2758_v28  ;;  %v11276_v49 = vld [vmem:[#allocation19_spill] sm:$0xff] }
 0x40b   : > { %v8924_v10 = vpop.permute.xlu1 %3198  ;;  %3414 = vperm.xlu0 %6157, %v8918_v33   ;;  %6569 = vpow2.f32 %v2951_v42  ;;  %v2989_v18 = vmul.f32 1.442695, %v2773_v35  ;;  %v2775_v42 = vsub.f32 %v11275_v50, %v8901_v59  ;;  %v2760_v21 = vsub.f32 %v11276_v49, %v8815_v32  ;;  %v11280_v49 = vld [vmem:[#allocation21_spill] sm:$0xff] }
 0x40c   : > { %3369 = vperm.xlu1 %6156, %v8922_v30   ;;  %v8946_v30 = vpop.eup %6551  ;;  %6571 = vpow2.f32 %v2985_v14  ;;  %v10838_v14 = vsub.s32 6, %v11057_v1 }
 0x40d   : > { %11265 = vst [vmem:[#allocation28_spill] sm:$0xff] %v8946_v30  ;;  %v8950_v23 = vpop.eup %6553  ;;  %6573 = vpow2.f32 %v2955_v3  ;;  %v2993_v35 = vmul.f32 1.442695, %v2775_v42  ;;  %v11279_v3 = vld [vmem:[#allocation67_spill] sm:$0xff]  ;;  %v2963_v50 = vmul.f32 1.442695, %v2760_v21 }
 0x40e   : > { %v8934_v43 = vpop.permute.xlu0 %3228  ;;  %11266 = vst [vmem:[#allocation41_spill] sm:$0xff] %v8950_v23  ;;  %6575 = vpow2.f32 %v2989_v18  ;;  %v2777_v28 = vsub.f32 %v11279_v3, %v8901_v59  ;;  %v9015_v18 = vrot.slane %v8542_v12, %v10838_v14  ;;  %v11283_v3 = vld [vmem:[#allocation23_spill] sm:$0xff] }
 0x40f   : > { %v8938_v58 = vpop.permute.xlu1 %3204  ;;  %3420 = vperm.xlu0 %6157, %v8932_v15   ;;  %6577 = vpow2.f32 %v2959_v29  ;;  %v2779_v29 = vsub.f32 %v11141_v44, %v8901_v59  ;;  %v11286_v44 = vld [vmem:[#allocation75_spill] sm:$0xff] }
 0x410   : > { %3375 = vperm.xlu1 %6156, %v8936_v17   ;;  %v8960_v17 = vpop.eup %6555  ;;  %6579 = vpow2.f32 %v2993_v35  ;;  %v2997_v42 = vmul.f32 1.442695, %v2777_v28 }
 0x411   : > { %11269 = vst [vmem:[#allocation29_spill] sm:$0xff] %v8960_v17  ;;  %v8964_v47 = vpop.eup %6557  ;;  %6581 = vpow2.f32 %v2963_v50  ;;  %v3001_v35 = vmul.f32 1.442695, %v2779_v29  ;;  %v11290_v29 = vld [vmem:[#allocation79_spill] sm:$0xff] }
 0x412   : > { %v8948_v33 = vpop.permute.xlu0 %3234  ;;  %11270 = vst [vmem:[#allocation14_spill] sm:$0xff] %v8964_v47  ;;  %6583 = vpow2.f32 %v2997_v42 }
 0x413   : > { %v8952_v7 = vpop.permute.xlu1 %3207  ;;  %3426 = vperm.xlu0 %6157, %v8946_v30  }
 0x414   : > { %3381 = vperm.xlu1 %6156, %v8950_v23   ;;  %v8974_v23 = vpop.eup %6559 }
 0x415   : > { %11273 = vst [vmem:[#allocation59_spill] sm:$0xff] %v8974_v23  ;;  %v8978_v8 = vpop.eup %6561 }
 0x416   : > { %v8962_v15 = vpop.permute.xlu0 %3240  ;;  %11274 = vst [vmem:[#allocation17_spill] sm:$0xff] %v8978_v8 }
 0x417   : > { %v8966_v19 = vpop.permute.xlu1 %3210  ;;  %3432 = vperm.xlu0 %6157, %v8960_v17  }
 0x418   : > { %3387 = vperm.xlu1 %6156, %v8964_v47   ;;  %v8988_v47 = vpop.eup %6563 }
 0x419   : > { %11277 = vst [vmem:[#allocation63_spill] sm:$0xff] %v8988_v47  ;;  %v8992_v36 = vpop.eup %6565 }
 0x41a   : > { %v8976_v30 = vpop.permute.xlu0 %3246  ;;  %11278 = vst [vmem:[#allocation19_spill] sm:$0xff] %v8992_v36 }
 0x41b   : > { %v8980_v5 = vpop.permute.xlu1 %3213  ;;  %3438 = vperm.xlu0 %6157, %v8974_v23   ;;  %v9003_v23 = vpop.eup %6567 }
 0x41c   : > { %3393 = vperm.xlu1 %6156, %v8978_v8   ;;  %v2762_v8 = vsub.f32 %v11280_v49, %v8815_v32  ;;  %11281 = vst [vmem:[#allocation67_spill] sm:$0xff] %v9003_v23  ;;  %v9007_v6 = vpop.eup %6569  ;;  %v2764_v49 = vsub.f32 %v11283_v3, %v8815_v32  ;;  %v11287_v32 = vld [vmem:[#allocation25_spill] sm:$0xff] }
 0x41d   : > { %11282 = vst [vmem:[#allocation21_spill] sm:$0xff] %v9007_v6  ;;  %v2766_v50 = vsub.f32 %v11287_v32, %v8901_v59 }
 0x41e   : > { %v8990_v17 = vpop.permute.xlu0 %3252  ;;  %v2967_v21 = vmul.f32 1.442695, %v2762_v8  ;;  %v2781_v8 = vsub.f32 %v11286_v44, %v9015_v18  ;;  %v2971_v28 = vmul.f32 1.442695, %v2764_v49  ;;  %v11291_v44 = vld [vmem:[#allocation50_spill] sm:$0xff] }
 0x41f   : > { %v8994_v9 = vpop.permute.xlu1 %3216  ;;  %3444 = vperm.xlu0 %6157, %v8988_v47   ;;  %v2975_v49 = vmul.f32 1.442695, %v2766_v50  ;;  %v2768_v32 = vsub.f32 %v11291_v44, %v8901_v59 }
 0x420   : > { %3399 = vperm.xlu1 %6156, %v8992_v36   ;;  %v9022_v36 = vpop.eup %6571  ;;  %6585 = vpow2.f32 %v2967_v21  ;;  %v3005_v42 = vmul.f32 1.442695, %v2781_v8  ;;  %v2783_v21 = vsub.f32 %v11290_v29, %v9015_v18  ;;  %v11294_v8 = vld [vmem:[#allocation83_spill] sm:$0xff]  ;;  %v11295_v29 = vld [vmem:[#allocation53_spill] sm:$0xff] }
 0x421   : > { %11284 = vst [vmem:[#allocation23_spill] sm:$0xff] %v9022_v36  ;;  %v9026_v61 = vpop.eup %6573  ;;  %6587 = vpow2.f32 %v3001_v35  ;;  %v2979_v50 = vmul.f32 1.442695, %v2768_v32  ;;  %v2770_v44 = vsub.f32 %v11295_v29, %v8901_v59 }
 0x422   : > { %v9005_v60 = vpop.permute.xlu0 %3258  ;;  %11285 = vst [vmem:[#allocation139_spill] sm:$0xff] %v9026_v61  ;;  %v9036_v3 = vpop.eup %6575  ;;  %6589 = vpow2.f32 %v2971_v28  ;;  %v3009_v35 = vmul.f32 1.442695, %v2783_v21  ;;  %v2785_v28 = vsub.f32 %v11294_v8, %v9015_v18  ;;  %v11298_v21 = vld [vmem:[#allocation87_spill] sm:$0xff]  ;;  %v11299_v8 = vld [vmem:[#allocation56_spill] sm:$0xff] }
 0x423   : > { %v9009_v47 = vpop.permute.xlu1 %3219  ;;  %3450 = vperm.xlu0 %6157, %v9003_v23   ;;  %11288 = vst [vmem:[#allocation75_spill] sm:$0xff] %v9036_v3  ;;  %v9040_v63 = vpop.eup %6577  ;;  %6591 = vpow2.f32 %v3005_v42  ;;  %v2983_v32 = vmul.f32 1.442695, %v2770_v44  ;;  %v2772_v29 = vsub.f32 %v11299_v8, %v8901_v59 }
 0x424   : > { %3405 = vperm.xlu1 %6156, %v9007_v6   ;;  %11289 = vst [vmem:[#allocation25_spill] sm:$0xff] %v9040_v63  ;;  %6593 = vpow2.f32 %v2975_v49  ;;  %v3013_v42 = vmul.f32 1.442695, %v2785_v28  ;;  %v2787_v49 = vsub.f32 %v11298_v21, %v9015_v18  ;;  %v11304_v28 = vld [vmem:[#allocation91_spill] sm:$0xff]  ;;  %v11305_v21 = vld [vmem:[#allocation60_spill] sm:$0xff] }
 0x425   : > { %6595 = vpow2.f32 %v3009_v35  ;;  %v2987_v44 = vmul.f32 1.442695, %v2772_v29  ;;  %v2774_v8 = vsub.f32 %v11305_v21, %v8901_v59  ;;  %v11308_v29 = vld [vmem:[#allocation64_spill] sm:$0xff] }
 0x426   : > { %v9024_v23 = vpop.permute.xlu0 %3264  ;;  %6597 = vpow2.f32 %v2979_v50  ;;  %v3017_v35 = vmul.f32 1.442695, %v2787_v49  ;;  %v2789_v50 = vsub.f32 %v11304_v28, %v9015_v18  ;;  %v2791_v49 = vsub.f32 %v11132_v27, %v9015_v18 }
 0x427   : > { %v9028_v14 = vpop.permute.xlu1 %3222  ;;  %3456 = vperm.xlu0 %6157, %v9022_v36   ;;  %6599 = vpow2.f32 %v3013_v42  ;;  %v2776_v28 = vsub.f32 %v11308_v29, %v8901_v59 }
 0x428   : > { %3411 = vperm.xlu1 %6156, %v9026_v61   ;;  %v9050_v61 = vpop.eup %6579  ;;  %6601 = vpow2.f32 %v2983_v32  ;;  %v3021_v42 = vmul.f32 1.442695, %v2789_v50  ;;  %v2991_v32 = vmul.f32 1.442695, %v2774_v8  ;;  %v3025_v27 = vmul.f32 1.442695, %v2791_v49 }
 0x429   : > { %11292 = vst [vmem:[#allocation79_spill] sm:$0xff] %v9050_v61  ;;  %v9054_v38 = vpop.eup %6581  ;;  %6603 = vpow2.f32 %v3017_v35  ;;  %v10867_v35 = vsub.s32 7, %v11057_v1  ;;  %v2793_v50 = vsub.f32 %v11140_v16, %v9015_v18  ;;  %v11311_v8 = vld [vmem:[#allocation68_spill] sm:$0xff]  ;;  %v2795_v49 = vsub.f32 %v8066_v51, %v9015_v18 }
 0x42a   : > { %v9038_v6 = vpop.permute.xlu0 %3270  ;;  %11293 = vst [vmem:[#allocation50_spill] sm:$0xff] %v9054_v38  ;;  %6605 = vpow2.f32 %v2987_v44  ;;  %v2995_v44 = vmul.f32 1.442695, %v2776_v28  ;;  %v2778_v29 = vsub.f32 %v11311_v8, %v8901_v59  ;;  %v2780_v28 = vsub.f32 %v11145_v24, %v8901_v59  ;;  %v11316_v51 = vld [vmem:[#allocation120_spill] sm:$0xff] }
 0x42b   : > { %v9042_v48 = vpop.permute.xlu1 %3225  ;;  %3462 = vperm.xlu0 %6157, %v9036_v3   ;;  %6607 = vpow2.f32 %v3021_v42  ;;  %v9133_v42 = vrot.slane %v8542_v12, %v10867_v35  ;;  %v3029_v16 = vmul.f32 1.442695, %v2793_v50  ;;  %v11317_v24 = vld [vmem:[#allocation76_spill] sm:$0xff] }
 0x42c   : > { %3417 = vperm.xlu1 %6156, %v9040_v63   ;;  %v9064_v63 = vpop.eup %6583  ;;  %6609 = vpow2.f32 %v2991_v32  ;;  %v2999_v32 = vmul.f32 1.442695, %v2778_v29  ;;  %v2782_v59 = vsub.f32 %v11317_v24, %v9015_v18 }
 0x42d   : > { %11296 = vst [vmem:[#allocation83_spill] sm:$0xff] %v9064_v63  ;;  %v9068_v34 = vpop.eup %6585  ;;  %6611 = vpow2.f32 %v3025_v27  ;;  %v3033_v27 = vmul.f32 1.442695, %v2795_v49  ;;  %v2797_v50 = vsub.f32 %v11316_v51, %v9133_v42  ;;  %v11320_v49 = vld [vmem:[#allocation123_spill] sm:$0xff]  ;;  %v11321_v51 = vld [vmem:[#allocation80_spill] sm:$0xff] }
 0x42e   : > { %v9052_v36 = vpop.permute.xlu0 %3276  ;;  %11297 = vst [vmem:[#allocation53_spill] sm:$0xff] %v9068_v34  ;;  %6613 = vpow2.f32 %v2995_v44  ;;  %v3003_v44 = vmul.f32 1.442695, %v2780_v28  ;;  %v3007_v28 = vmul.f32 1.442695, %v2782_v59  ;;  %v2784_v24 = vsub.f32 %v11321_v51, %v9015_v18 }
 0x42f   : > { %v9056_v31 = vpop.permute.xlu1 %3231  ;;  %3468 = vperm.xlu0 %6157, %v9050_v61   ;;  %6615 = vpow2.f32 %v3029_v16  ;;  %v3037_v16 = vmul.f32 1.442695, %v2797_v50  ;;  %v11324_v50 = vld [vmem:[#allocation46_spill] sm:$0xff] }
 0x430   : > { %3423 = vperm.xlu1 %6156, %v9054_v38   ;;  %v9078_v38 = vpop.eup %6587  ;;  %6617 = vpow2.f32 %v2999_v32  ;;  %v2799_v32 = vsub.f32 %v11320_v49, %v9133_v42  ;;  %v3011_v59 = vmul.f32 1.442695, %v2784_v24  ;;  %v11325_v49 = vld [vmem:[#allocation84_spill] sm:$0xff] }
 0x431   : > { %11300 = vst [vmem:[#allocation87_spill] sm:$0xff] %v9078_v38  ;;  %v9082_v20 = vpop.eup %6589  ;;  %6619 = vpow2.f32 %v3033_v27  ;;  %v2786_v51 = vsub.f32 %v11325_v49, %v9015_v18 }
 0x432   : > { %v9066_v3 = vpop.permute.xlu0 %3282  ;;  %11302 = vst [vmem:[#allocation140_spill] sm:$0xff] %v9082_v20  ;;  %6621 = vpow2.f32 %v3003_v44  ;;  %v3041_v27 = vmul.f32 1.442695, %v2799_v32  ;;  %v2801_v44 = vsub.f32 %v11324_v50, %v9133_v42  ;;  %v11329_v32 = vld [vmem:[#allocation127_spill] sm:$0xff]  ;;  %v11330_v50 = vld [vmem:[#allocation88_spill] sm:$0xff] }
 0x433   : > { %v9070_v11 = vpop.permute.xlu1 %3237  ;;  %3474 = vperm.xlu0 %6157, %v9064_v63   ;;  %v3015_v24 = vmul.f32 1.442695, %v2786_v51  ;;  %v2788_v49 = vsub.f32 %v11330_v50, %v9015_v18 }
 0x434   : > { %3429 = vperm.xlu1 %6156, %v9068_v34   ;;  %v9092_v34 = vpop.eup %6591  ;;  %6623 = vpow2.f32 %v3037_v16  ;;  %v3045_v16 = vmul.f32 1.442695, %v2801_v44  ;;  %v11335_v44 = vld [vmem:[#allocation70_spill] sm:$0xff] }
 0x435   : > { %11306 = vst [vmem:[#allocation91_spill] sm:$0xff] %v9092_v34  ;;  %v9096_v53 = vpop.eup %6593  ;;  %6625 = vpow2.f32 %v3007_v28  ;;  %v2803_v28 = vsub.f32 %v11329_v32, %v9133_v42  ;;  %v3019_v51 = vmul.f32 1.442695, %v2788_v49  ;;  %v11336_v32 = vld [vmem:[#allocation92_spill] sm:$0xff] }
 0x436   : > { %v9080_v61 = vpop.permute.xlu0 %3288  ;;  %11307 = vst [vmem:[#allocation60_spill] sm:$0xff] %v9096_v53  ;;  %v9106_v21 = vpop.eup %6595  ;;  %6627 = vpow2.f32 %v3041_v27  ;;  %v2790_v50 = vsub.f32 %v11336_v32, %v9015_v18 }
 0x437   : > { %11301 = vst [vmem:[#allocation56_spill] sm:$0xff] %v9080_v61  ;;  %v9084_v37 = vpop.permute.xlu1 %3243  ;;  %3480 = vperm.xlu0 %6157, %v9078_v38   ;;  %11309 = vst [vmem:[#allocation64_spill] sm:$0xff] %v9106_v21  ;;  %v9110_v38 = vpop.eup %6597  ;;  %6629 = vpow2.f32 %v3011_v59  ;;  %v3049_v27 = vmul.f32 1.442695, %v2803_v28  ;;  %v2805_v59 = vsub.f32 %v11335_v44, %v9133_v42  ;;  %v11339_v28 = vld [vmem:[#allocation86_spill] sm:$0xff]  ;;  %v11340_v44 = vld [vmem:[#allocation96_spill] sm:$0xff] }
 0x438   : > { %11303 = vst [vmem:[#allocation141_spill] sm:$0xff] %v9084_v37  ;;  %3435 = vperm.xlu1 %6156, %v9082_v20   ;;  %11310 = vst [vmem:[#allocation142_spill] sm:$0xff] %v9110_v38  ;;  %v3023_v49 = vmul.f32 1.442695, %v2790_v50  ;;  %v2792_v32 = vsub.f32 %v11340_v44, %v9015_v18  ;;  %v11343_v50 = vld [vmem:[#allocation103_spill] sm:$0xff] }
 0x43a   : > { %v9094_v63 = vpop.permute.xlu0 %3294 }
 0x43b   : > { %v9098_v45 = vpop.permute.xlu1 %3249  ;;  %3486 = vperm.xlu0 %6157, %v9092_v34  }
 0x43c   : > { %3441 = vperm.xlu1 %6156, %v9096_v53   ;;  %v9121_v53 = vpop.eup %6599  ;;  %6631 = vpow2.f32 %v3045_v16  ;;  %v3053_v16 = vmul.f32 1.442695, %v2805_v59  ;;  %v2809_v59 = vsub.f32 %v8474_v26, %v9133_v42  ;;  %v2811_v26 = vsub.f32 %v8523_v57, %v9133_v42 }
 0x43d   : > { %11312 = vst [vmem:[#allocation68_spill] sm:$0xff] %v9121_v53  ;;  %v9125_v40 = vpop.eup %6601  ;;  %6633 = vpow2.f32 %v3015_v24  ;;  %v2807_v24 = vsub.f32 %v11339_v28, %v9133_v42  ;;  %v2794_v28 = vsub.f32 %v11343_v50, %v9015_v18 }
 0x43e   : > { %v9108_v20 = vpop.permute.xlu0 %3300  ;;  %11313 = vst [vmem:[#allocation143_spill] sm:$0xff] %v9125_v40  ;;  %v9140_v8 = vpop.eup %6603  ;;  %6635 = vpow2.f32 %v3049_v27 }
 0x43f   : > { %v9112_v13 = vpop.permute.xlu1 %3255  ;;  %3492 = vperm.xlu0 %6157, %v9106_v21   ;;  %11314 = vst [vmem:[#allocation144_spill] sm:$0xff] %v9140_v8  ;;  %v3057_v27 = vmul.f32 1.442695, %v2807_v24  ;;  %v3031_v24 = vmul.f32 1.442695, %v2794_v28 }
 0x440   : > { %3447 = vperm.xlu1 %6156, %v9110_v38  }
 0x442   : > { %v9123_v34 = vpop.permute.xlu0 %3306 }
 0x443   : > { %v9127_v21 = vpop.permute.xlu1 %3261  ;;  %3498 = vperm.xlu0 %6157, %v9121_v53   ;;  %v9144_v53 = vpop.eup %6605  ;;  %6637 = vpow2.f32 %v3019_v51  ;;  %v3027_v51 = vmul.f32 1.442695, %v2792_v32 }
 0x444   : > { %3453 = vperm.xlu1 %6156, %v9125_v40   ;;  %11315 = vst [vmem:[#allocation145_spill] sm:$0xff] %v9144_v53  ;;  %v9154_v29 = vpop.eup %6607  ;;  %6639 = vpow2.f32 %v3053_v16  ;;  %v3061_v16 = vmul.f32 1.442695, %v2809_v59  ;;  %v11348_v59 = vld [vmem:[#allocation121_spill] sm:$0xff] }
 0x445   : > { %11318 = vst [vmem:[#allocation120_spill] sm:$0xff] %v9154_v29  ;;  %v9158_v40 = vpop.eup %6609  ;;  %6641 = vpow2.f32 %v3023_v49  ;;  %v2796_v49 = vsub.f32 %v11146_v2, %v9015_v18 }
 0x446   : > { %v9142_v38 = vpop.permute.xlu0 %3312  ;;  %11319 = vst [vmem:[#allocation76_spill] sm:$0xff] %v9158_v40 }
 0x447   : > { %v9146_v12 = vpop.permute.xlu1 %3267  ;;  %3504 = vperm.xlu0 %6157, %v9140_v8   ;;  %v3035_v57 = vmul.f32 1.442695, %v2796_v49 }
 0x448   : > { %3459 = vperm.xlu1 %6156, %v9144_v53   ;;  %v9168_v53 = vpop.eup %6611  ;;  %6643 = vpow2.f32 %v3057_v27  ;;  %v3065_v27 = vmul.f32 1.442695, %v2811_v26  ;;  %v11352_v26 = vld [vmem:[#allocation124_spill] sm:$0xff] }
 0x449   : > { %11322 = vst [vmem:[#allocation123_spill] sm:$0xff] %v9168_v53  ;;  %v9172_v0 = vpop.eup %6613  ;;  %6645 = vpow2.f32 %v3027_v51  ;;  %v2798_v51 = vsub.f32 %v11348_v59, %v9133_v42 }
 0x44a   : > { %v9156_v35 = vpop.permute.xlu0 %3318  ;;  %11323 = vst [vmem:[#allocation80_spill] sm:$0xff] %v9172_v0 }
 0x44b   : > { %v9160_v39 = vpop.permute.xlu1 %3273  ;;  %3510 = vperm.xlu0 %6157, %v9154_v29  }
 0x44c   : > { %3465 = vperm.xlu1 %6156, %v9158_v40   ;;  %v9182_v40 = vpop.eup %6615  ;;  %6647 = vpow2.f32 %v3061_v16  ;;  %v3039_v16 = vmul.f32 1.442695, %v2798_v51 }
 0x44d   : > { %11326 = vst [vmem:[#allocation46_spill] sm:$0xff] %v9182_v40  ;;  %v9186_v41 = vpop.eup %6617  ;;  %6649 = vpow2.f32 %v3031_v24  ;;  %v2800_v24 = vsub.f32 %v11352_v26, %v9133_v42 }
 0x44e   : > { %v9170_v8 = vpop.permute.xlu0 %3324  ;;  %11328 = vst [vmem:[#allocation146_spill] sm:$0xff] %v9186_v41 }
 0x44f   : > { %v9174_v46 = vpop.permute.xlu1 %3279  ;;  %3516 = vperm.xlu0 %6157, %v9168_v53  }
 0x450   : > { %3471 = vperm.xlu1 %6156, %v9172_v0   ;;  %v9196_v0 = vpop.eup %6619  ;;  %6651 = vpow2.f32 %v3065_v27  ;;  %v11356_v27 = vld [vmem:[#allocation126_spill] sm:$0xff] }
 0x451   : > { %11331 = vst [vmem:[#allocation127_spill] sm:$0xff] %v9196_v0  ;;  %v9200_v25 = vpop.eup %6621  ;;  %6653 = vpow2.f32 %v3035_v57  ;;  %v2802_v57 = vsub.f32 %v11356_v27, %v9133_v42 }
 0x452   : > { %v9184_v29 = vpop.permute.xlu0 %3330  ;;  %11333 = vst [vmem:[#allocation147_spill] sm:$0xff] %v9200_v25 }
 0x453   : > { %11327 = vst [vmem:[#allocation84_spill] sm:$0xff] %v9184_v29  ;;  %v9188_v55 = vpop.permute.xlu1 %3285  ;;  %3522 = vperm.xlu0 %6157, %v9182_v40   ;;  %v9210_v40 = vpop.eup %6623  ;;  %6655 = vpow2.f32 %v3039_v16  ;;  %v11361_v16 = vld [vmem:[#allocation128_spill] sm:$0xff] }
 0x454   : > { %3477 = vperm.xlu1 %6156, %v9186_v41   ;;  %11337 = vst [vmem:[#allocation70_spill] sm:$0xff] %v9210_v40  ;;  %v9214_v1 = vpop.eup %6625 }
 0x455   : > { %11338 = vst [vmem:[#allocation92_spill] sm:$0xff] %v9214_v1 }
 0x456   : > { %v9198_v53 = vpop.permute.xlu0 %3336 }
 0x457   : > { %11332 = vst [vmem:[#allocation88_spill] sm:$0xff] %v9198_v53  ;;  %v9202_v4 = vpop.permute.xlu1 %3291  ;;  %3528 = vperm.xlu0 %6157, %v9196_v0   ;;  %v9224_v0 = vpop.eup %6627 }
 0x458   : > { %11334 = vst [vmem:[#allocation148_spill] sm:$0xff] %v9202_v4  ;;  %3483 = vperm.xlu1 %6156, %v9200_v25   ;;  %11341 = vst [vmem:[#allocation86_spill] sm:$0xff] %v9224_v0  ;;  %v9228_v53 = vpop.eup %6629 }
 0x459   : > { %11342 = vst [vmem:[#allocation96_spill] sm:$0xff] %v9228_v53  ;;  %v9238_v44 = vpop.eup %6631 }
 0x45a   : > { %v9212_v41 = vpop.permute.xlu0 %3342  ;;  %11344 = vst [vmem:[#allocation103_spill] sm:$0xff] %v9238_v44 }
 0x45b   : > { %v9216_v54 = vpop.permute.xlu1 %3297  ;;  %3534 = vperm.xlu0 %6157, %v9210_v40  }
 0x45c   : > { %3489 = vperm.xlu1 %6156, %v9214_v1   ;;  %v9242_v1 = vpop.eup %6633 }
 0x45d   : > { %11345 = vst [vmem:[#allocation149_spill] sm:$0xff] %v9242_v1  ;;  %v9252_v32 = vpop.eup %6635 }
 0x45e   : > { %v9226_v25 = vpop.permute.xlu0 %3348  ;;  %11346 = vst [vmem:[#allocation150_spill] sm:$0xff] %v9252_v32 }
 0x45f   : > { %v9230_v61 = vpop.permute.xlu1 %3303  ;;  %3540 = vperm.xlu0 %6157, %v9224_v0   ;;  %v9256_v0 = vpop.eup %6637 }
 0x460   : > { %3495 = vperm.xlu1 %6156, %v9228_v53   ;;  %11347 = vst [vmem:[#allocation151_spill] sm:$0xff] %v9256_v0  ;;  %v9264_v2 = vpop.eup %6639 }
 0x461   : > { %11349 = vst [vmem:[#allocation121_spill] sm:$0xff] %v9264_v2  ;;  %v9268_v28 = vpop.eup %6641 }
 0x462   : > { %v9240_v40 = vpop.permute.xlu0 %3354  ;;  %11351 = vst [vmem:[#allocation153_spill] sm:$0xff] %v9268_v28  ;;  %v9276_v49 = vpop.eup %6643 }
 0x463   : > { %v9244_v4 = vpop.permute.xlu1 %3309  ;;  %3546 = vperm.xlu0 %6157, %v9238_v44   ;;  %11353 = vst [vmem:[#allocation124_spill] sm:$0xff] %v9276_v49 }
 0x464   : > { %3501 = vperm.xlu1 %6156, %v9242_v1  }
 0x466   : > { %v9254_v50 = vpop.permute.xlu0 %3360 }
 0x467   : > { %v9258_v53 = vpop.permute.xlu1 %3315  ;;  %3552 = vperm.xlu0 %6157, %v9252_v32   ;;  %v9280_v32 = vpop.eup %6645 }
 0x468   : > { %3507 = vperm.xlu1 %6156, %v9256_v0   ;;  %11355 = vst [vmem:[#allocation155_spill] sm:$0xff] %v9280_v32  ;;  %v9288_v51 = vpop.eup %6647 }
 0x469   : > { %11357 = vst [vmem:[#allocation126_spill] sm:$0xff] %v9288_v51 }
 0x46a   : > { %v9266_v18 = vpop.permute.xlu0 %3366 }
 0x46b   : > { %11350 = vst [vmem:[#allocation152_spill] sm:$0xff] %v9266_v18  ;;  %v9270_v44 = vpop.permute.xlu1 %3321  ;;  %3558 = vperm.xlu0 %6157, %v9264_v2   ;;  %v3043_v2 = vmul.f32 1.442695, %v2800_v24  ;;  %v2804_v24 = vsub.f32 %v11361_v16, %v9133_v42 }
 0x46c   : > { %3513 = vperm.xlu1 %6156, %v9268_v28   ;;  %v9292_v28 = vpop.eup %6649 }
 0x46d   : > { %11359 = vst [vmem:[#allocation157_spill] sm:$0xff] %v9292_v28  ;;  %6657 = vpow2.f32 %v3043_v2  ;;  %v11366_v2 = vld [vmem:[#allocation85_spill] sm:$0xff] }
 0x46e   : > { %v9278_v59 = vpop.permute.xlu0 %3372 }
 0x46f   : > { %11354 = vst [vmem:[#allocation154_spill] sm:$0xff] %v9278_v59  ;;  %v9282_v0 = vpop.permute.xlu1 %3327  ;;  %3564 = vperm.xlu0 %6157, %v9276_v49   ;;  %v3047_v49 = vmul.f32 1.442695, %v2802_v57  ;;  %v2806_v57 = vsub.f32 %v11366_v2, %v9133_v42 }
 0x470   : > { %3519 = vperm.xlu1 %6156, %v9280_v32   ;;  %v9300_v32 = vpop.eup %6651 }
 0x471   : > { %11362 = vst [vmem:[#allocation128_spill] sm:$0xff] %v9300_v32  ;;  %v9304_v59 = vpop.eup %6653  ;;  %6659 = vpow2.f32 %v3047_v49 }
 0x472   : > { %v9290_v26 = vpop.permute.xlu0 %3378  ;;  %11364 = vst [vmem:[#allocation160_spill] sm:$0xff] %v9304_v59  ;;  %v9314_v16 = vpop.eup %6655 }
 0x473   : > { %11358 = vst [vmem:[#allocation156_spill] sm:$0xff] %v9290_v26  ;;  %v9294_v1 = vpop.permute.xlu1 %3333  ;;  %3570 = vperm.xlu0 %6157, %v9288_v51   ;;  %v3051_v51 = vmul.f32 1.442695, %v2804_v24  ;;  %11368 = vst [vmem:[#allocation162_spill] sm:$0xff] %v9314_v16 }
 0x474   : > { %11360 = vst [vmem:[#allocation158_spill] sm:$0xff] %v9294_v1  ;;  %3525 = vperm.xlu1 %6156, %v9292_v28  }
 0x475   : > { %6661 = vpow2.f32 %v3051_v51 }
 0x476   : > { %v9302_v27 = vpop.permute.xlu0 %3384 }
 0x477   : > { %11363 = vst [vmem:[#allocation159_spill] sm:$0xff] %v9302_v27  ;;  %v9306_v26 = vpop.permute.xlu1 %3339  ;;  %3576 = vperm.xlu0 %6157, %v9300_v32   ;;  %v3055_v27 = vmul.f32 1.442695, %v2806_v57  ;;  %v9323_v49 = vpop.eup %6657 }
 0x478   : > { %11365 = vst [vmem:[#allocation161_spill] sm:$0xff] %v9306_v26  ;;  %3531 = vperm.xlu1 %6156, %v9304_v59   ;;  %v11369_v26 = vld [vmem:[#allocation89_spill] sm:$0xff]  ;;  %11371 = vst [vmem:[#allocation163_spill] sm:$0xff] %v9323_v49  ;;  %v11372_v59 = vld [vmem:[#allocation90_spill] sm:$0xff] }
 0x479   : > { %v2808_v32 = vsub.f32 %v11369_v26, %v9133_v42  ;;  %6663 = vpow2.f32 %v3055_v27 }
 0x47a   : > { %v9312_v28 = vpop.permute.xlu0 %3390 }
 0x47b   : > { %11367 = vst [vmem:[#allocation85_spill] sm:$0xff] %v9312_v28  ;;  %v9316_v18 = vpop.permute.xlu1 %3345  ;;  %v3059_v2 = vmul.f32 1.442695, %v2808_v32  ;;  %v2810_v28 = vsub.f32 %v11372_v59, %v9133_v42  ;;  %v9332_v51 = vpop.eup %6659 }
 0x47c   : > { %3537 = vperm.xlu1 %6156, %v9314_v16   ;;  %11374 = vst [vmem:[#allocation164_spill] sm:$0xff] %v9332_v51  ;;  %v2812_v16 = vsub.f32 %v8525_v52, %v9133_v42 }
 0x47d   : > { %6665 = vpow2.f32 %v3059_v2  ;;  %v3063_v26 = vmul.f32 1.442695, %v2810_v28 }
 0x47e   : > { %v9321_v29 = vpop.permute.xlu0 %3396  ;;  %v3067_v59 = vmul.f32 1.442695, %v2812_v16 }
 0x47f   : > { %11370 = vst [vmem:[#allocation89_spill] sm:$0xff] %v9321_v29  ;;  %v9325_v24 = vpop.permute.xlu1 %3351  ;;  %v9341_v27 = vpop.eup %6661  ;;  %6667 = vpow2.f32 %v3063_v26 }
 0x480   : > { %3543 = vperm.xlu1 %6156, %v9323_v49   ;;  %11376 = vst [vmem:[#allocation166_spill] sm:$0xff] %v9341_v27  ;;  %6669 = vpow2.f32 %v3067_v59 }
 0x482   : > { %v9330_v37 = vpop.permute.xlu0 %3402 }
 0x483   : > { %11373 = vst [vmem:[#allocation90_spill] sm:$0xff] %v9330_v37  ;;  %v9334_v57 = vpop.permute.xlu1 %3357  ;;  %v9348_v37 = vpop.eup %6663 }
 0x484   : > { %3549 = vperm.xlu1 %6156, %v9332_v51   ;;  %11378 = vst [vmem:[#allocation168_spill] sm:$0xff] %v9348_v37 }
 0x486   : > { %v9339_v29 = vpop.permute.xlu0 %3408 }
 0x487   : > { %11375 = vst [vmem:[#allocation165_spill] sm:$0xff] %v9339_v29  ;;  %v9343_v32 = vpop.permute.xlu1 %3363  ;;  %v9355_v42 = vpop.eup %6665 }
 0x488   : > { %3555 = vperm.xlu1 %6156, %v9341_v27   ;;  %11381 = vst [vmem:[#allocation171_spill] sm:$0xff] %v9355_v42 }
 0x489   : > { %v9362_v16 = vpop.eup %6667 }
 0x48a   : > { %v9346_v49 = vpop.permute.xlu0 %3414  ;;  %11384 = vst [vmem:[#allocation174_spill] sm:$0xff] %v9362_v16 }
 0x48b   : > { %11377 = vst [vmem:[#allocation167_spill] sm:$0xff] %v9346_v49  ;;  %v9350_v51 = vpop.permute.xlu1 %3369 }
 0x48c   : > { %11379 = vst [vmem:[#allocation169_spill] sm:$0xff] %v9350_v51  ;;  %3561 = vperm.xlu1 %6156, %v9348_v37   ;;  %v9369_v37 = vpop.eup %6669 }
 0x48d   : > { %11387 = vst [vmem:[#allocation177_spill] sm:$0xff] %v9369_v37 }
 0x48e   : > { %v9353_v52 = vpop.permute.xlu0 %3420 }
 0x48f   : > { %11380 = vst [vmem:[#allocation170_spill] sm:$0xff] %v9353_v52  ;;  %v9357_v28 = vpop.permute.xlu1 %3375 }
 0x490   : > { %11382 = vst [vmem:[#allocation172_spill] sm:$0xff] %v9357_v28  ;;  %3567 = vperm.xlu1 %6156, %v9355_v42  }
 0x492   : > { %v9360_v2 = vpop.permute.xlu0 %3426 }
 0x493   : > { %11383 = vst [vmem:[#allocation173_spill] sm:$0xff] %v9360_v2  ;;  %v9364_v26 = vpop.permute.xlu1 %3381 }
 0x494   : > { %11385 = vst [vmem:[#allocation175_spill] sm:$0xff] %v9364_v26  ;;  %3573 = vperm.xlu1 %6156, %v9362_v16  }
 0x496   : > { %v9367_v27 = vpop.permute.xlu0 %3432 }
 0x497   : > { %11386 = vst [vmem:[#allocation176_spill] sm:$0xff] %v9367_v27  ;;  %v9371_v59 = vpop.permute.xlu1 %3387 }
 0x498   : > { %11388 = vst [vmem:[#allocation178_spill] sm:$0xff] %v9371_v59  ;;  %3579 = vperm.xlu1 %6156, %v9369_v37  }
 0x49a   : > { %v9374_v52 = vpop.permute.xlu0 %3438 }
 0x49b   : > { %11389 = vst [vmem:[#allocation179_spill] sm:$0xff] %v9374_v52  ;;  %v9376_v49 = vpop.permute.xlu1 %3393 }
 0x49c   : > { %11390 = vst [vmem:[#allocation180_spill] sm:$0xff] %v9376_v49 }
 0x49e   : > { %v9378_v42 = vpop.permute.xlu0 %3444 }
 0x49f   : > { %11391 = vst [vmem:[#allocation181_spill] sm:$0xff] %v9378_v42  ;;  %v9380_v2 = vpop.permute.xlu1 %3399 }
 0x4a0   : > { %11392 = vst [vmem:[#allocation182_spill] sm:$0xff] %v9380_v2 }
 0x4a2   : > { %v9382_v29 = vpop.permute.xlu0 %3450 }
 0x4a3   : > { %11393 = vst [vmem:[#allocation183_spill] sm:$0xff] %v9382_v29  ;;  %v9384_v26 = vpop.permute.xlu1 %3405 }
 0x4a4   : > { %11394 = vst [vmem:[#allocation184_spill] sm:$0xff] %v9384_v26 }
 0x4a6   : > { %v9386_v16 = vpop.permute.xlu0 %3456 }
 0x4a7   : > { %11395 = vst [vmem:[#allocation185_spill] sm:$0xff] %v9386_v16  ;;  %v9388_v27 = vpop.permute.xlu1 %3411 }
 0x4a8   : > { %11396 = vst [vmem:[#allocation186_spill] sm:$0xff] %v9388_v27 }
 0x4aa   : > { %v9390_v28 = vpop.permute.xlu0 %3462 }
 0x4ab   : > { %11397 = vst [vmem:[#allocation187_spill] sm:$0xff] %v9390_v28  ;;  %v9392_v59 = vpop.permute.xlu1 %3417 }
 0x4ac   : > { %11398 = vst [vmem:[#allocation188_spill] sm:$0xff] %v9392_v59 }
 0x4ae   : > { %v9394_v37 = vpop.permute.xlu0 %3468 }
 0x4af   : > { %11399 = vst [vmem:[#allocation189_spill] sm:$0xff] %v9394_v37  ;;  %v9396_v52 = vpop.permute.xlu1 %3423 }
 0x4b0   : > { %11400 = vst [vmem:[#allocation190_spill] sm:$0xff] %v9396_v52 }
 0x4b2   : > { %v9398_v49 = vpop.permute.xlu0 %3474 }
 0x4b3   : > { %11401 = vst [vmem:[#allocation191_spill] sm:$0xff] %v9398_v49  ;;  %v9400_v42 = vpop.permute.xlu1 %3429 }
 0x4b4   : > { %11402 = vst [vmem:[#allocation192_spill] sm:$0xff] %v9400_v42 }
 0x4b6   : > { %v9402_v2 = vpop.permute.xlu0 %3480 }
 0x4b7   : > { %11403 = vst [vmem:[#allocation193_spill] sm:$0xff] %v9402_v2  ;;  %v9404_v29 = vpop.permute.xlu1 %3435 }
 0x4b8   : > { %11404 = vst [vmem:[#allocation194_spill] sm:$0xff] %v9404_v29 }
 0x4ba   : > { %v9406_v26 = vpop.permute.xlu0 %3486 }
 0x4bb   : > { %11405 = vst [vmem:[#allocation195_spill] sm:$0xff] %v9406_v26  ;;  %v9408_v16 = vpop.permute.xlu1 %3441 }
 0x4bc   : > { %11406 = vst [vmem:[#allocation196_spill] sm:$0xff] %v9408_v16  ;;  %v11417_v16 = vld [vmem:[#allocation102_spill] sm:$0xff] }
 0x4be   : > { %v9412_v28 = vpop.permute.xlu0 %3492 }
 0x4bf   : > { %v9410_v27 = vpop.permute.xlu1 %3447  ;;  %11408 = vst [vmem:[#allocation198_spill] sm:$0xff] %v9412_v28  ;;  %v11418_v28 = vld [vmem:[#allocation99_spill] sm:$0xff] }
 0x4c0   : > { %11407 = vst [vmem:[#allocation197_spill] sm:$0xff] %v9410_v27  ;;  %v3667_v27 = vrot.slane %v9098_v45, %v11417_v16  ;;  %v11421_v45 = vld [vmem:[#allocation104_spill] sm:$0xff] }
 0x4c1   : > { %v3677_v51 = vrot.slane %v9112_v13, %v11421_v45 }
 0x4c2   : > { %v9416_v37 = vpop.permute.xlu0 %3498 }
 0x4c3   : > { %v9414_v59 = vpop.permute.xlu1 %3453  ;;  %11410 = vst [vmem:[#allocation200_spill] sm:$0xff] %v9416_v37  ;;  %v3584_v37 = vrot.slane %v8924_v10, %v11418_v28  ;;  %v3598_v10 = vrot.slane %v8952_v7, %v11421_v45  ;;  %v3756_v7 = vrot.slane %v9230_v61, %v11421_v45  ;;  %v3682_v61 = vrot.slane %v9005_v60, %v11423_v56 }
 0x4c4   : > { %11409 = vst [vmem:[#allocation199_spill] sm:$0xff] %v9414_v59  ;;  %v3588_v59 = vrot.slane %v8920_v22, %v11417_v16 }
 0x4c6   : > { %v9422_v42 = vpop.permute.xlu0 %3504 }
 0x4c7   : > { %v9418_v52 = vpop.permute.xlu1 %3459  ;;  %11413 = vst [vmem:[#allocation203_spill] sm:$0xff] %v9422_v42 }
 0x4c8   : > { %11411 = vst [vmem:[#allocation201_spill] sm:$0xff] %v9418_v52  ;;  %v11419_v52 = vld [vmem:[#allocation100_spill] sm:$0xff] }
 0x4c9   : > { %v3593_v42 = vrot.slane %v8938_v58, %v11419_v52  ;;  %v3742_v58 = vrot.slane %v9094_v63, %v11418_v28 }
 0x4ca   : > { %v9426_v29 = vpop.permute.xlu0 %3510 }
 0x4cb   : > { %v9420_v49 = vpop.permute.xlu1 %3465  ;;  %11415 = vst [vmem:[#allocation205_spill] sm:$0xff] %v9426_v29 }
 0x4cc   : > { %11412 = vst [vmem:[#allocation202_spill] sm:$0xff] %v9420_v49  ;;  %v3663_v49 = vrot.slane %v8976_v30, %v11418_v28  ;;  %v3672_v30 = vrot.slane %v8990_v17, %v11419_v52  ;;  %v11424_v17 = vld [vmem:[#allocation107_spill] sm:$0xff] }
 0x4cd   : > { %v3608_v1 = vrot.slane %v8980_v5, %v11424_v17 }
 0x4ce   : > { %v9447_v22 = vpop.permute.xlu0 %3516 }
 0x4cf   : > { %v9424_v2 = vpop.permute.xlu1 %3471  ;;  %11422 = vst [vmem:[#allocation99_spill] sm:$0xff] %v9447_v22 }
 0x4d0   : > { %11414 = vst [vmem:[#allocation204_spill] sm:$0xff] %v9424_v2  ;;  %v3746_v2 = vrot.slane %v9216_v54, %v11417_v16  ;;  %v3589_v54 = vsel %vm1974_vm0, %v3588_v59, %v3584_v37  ;;  %v3751_v37 = vrot.slane %v9108_v20, %v11419_v52 }
 0x4d3   : > { %v9428_v26 = vpop.permute.xlu1 %3477 }
 0x4d4   : > { %11416 = vst [vmem:[#allocation206_spill] sm:$0xff] %v9428_v26  ;;  %v3668_v26 = vsel %vm1974_vm0, %v3667_v27, %v3663_v49  ;;  %v3594_v49 = vsel %vm1981_vm1, %v3593_v42, %v3589_v54  ;;  %v3747_v27 = vsel %vm1974_vm0, %v3746_v2, %v3742_v58  ;;  %v9481_v58 = vpop.permute.xlu0 %3522 }
 0x4d5   : > { %v3673_v13 = vsel %vm1981_vm1, %v3672_v30, %v3668_v26  ;;  %v3599_v42 = vsel %vm1988_vm2, %v3598_v10, %v3594_v49  ;;  %v11425_v26 = vld [vmem:[#allocation110_spill] sm:$0xff]  ;;  %v11426_v30 = vld [vmem:[#allocation109_spill] sm:$0xff]  ;;  %v3752_v20 = vsel %vm1981_vm1, %v3751_v37, %v3747_v27 }
 0x4d6   : > { %v3678_v63 = vsel %vm1988_vm2, %v3677_v51, %v3673_v13  ;;  %v3613_v2 = vrot.slane %v8994_v9, %v11425_v26  ;;  %v3618_v5 = vrot.slane %v9009_v47, %v11426_v30  ;;  %v11427_v51 = vld [vmem:[#allocation113_spill] sm:$0xff]  ;;  %v3757_v54 = vsel %vm1988_vm2, %v3756_v7, %v3752_v20  ;;  %v11429_v7 = vld [vmem:[#allocation111_spill] sm:$0xff] }
 0x4d7   : > { %v9442_v29 = vpop.permute.xlu1 %3483  ;;  %v3683_v10 = vsel %vm1995_vm3, %v3682_v61, %v3678_v63  ;;  %v3766_v9 = vrot.slane %v9244_v4, %v11424_v17  ;;  %v3761_v47 = vrot.slane %v9123_v34, %v11423_v56  ;;  %v3697_v13 = vrot.slane %v9146_v12, %v11426_v30  ;;  %v11431_v20 = vld [vmem:[#allocation115_spill] sm:$0xff] }
 0x4d8   : > { %11420 = vst [vmem:[#allocation102_spill] sm:$0xff] %v9442_v29  ;;  %v3603_v29 = vrot.slane %v8966_v19, %v11423_v56  ;;  %v3687_v19 = vrot.slane %v9127_v21, %v11424_v17  ;;  %v3623_v21 = vrot.slane %v9028_v14, %v11427_v51  ;;  %v3692_v27 = vrot.slane %v9024_v23, %v11425_v26 }
 0x4d9   : > { %v3628_v4 = vrot.slane %v9042_v48, %v11429_v7  ;;  %v3825_v34 = vrot.slane %v9316_v18, %v11417_v16  ;;  %v3771_v48 = vrot.slane %v9142_v38, %v11425_v26  ;;  %v3707_v61 = vrot.slane %v9160_v39, %v11429_v7 }
 0x4da   : > { %v3604_v59 = vsel %vm1995_vm3, %v3603_v29, %v3599_v42  ;;  %v3688_v49 = vsel %vm2002_vm4, %v3687_v19, %v3683_v10  ;;  %v3776_v42 = vrot.slane %v9258_v53, %v11426_v30  ;;  %v3821_v18 = vrot.slane %v9212_v41, %v11418_v28  ;;  %v11432_v10 = vld [vmem:[#allocation117_spill] sm:$0xff] }
 0x4db   : > { %v9463_v22 = vpop.permute.xlu1 %3489  ;;  %v3609_v29 = vsel %vm2002_vm4, %v3608_v1, %v3604_v59  ;;  %v3762_v1 = vsel %vm1995_vm3, %v3761_v47, %v3757_v54  ;;  %v3693_v19 = vsel %vm11430_vm11, %v3692_v27, %v3688_v49  ;;  %v9520_v59 = vpop.permute.xlu0 %3528  ;;  %v3633_v38 = vrot.slane %v8934_v43, %v11432_v10 }
 0x4dc   : > { %v3614_v14 = vsel %vm11428_vm5, %v3613_v2, %v3609_v29  ;;  %v3767_v12 = vsel %vm2002_vm4, %v3766_v9, %v3762_v1  ;;  %v3698_v2 = vsel %vm2016_vm6, %v3697_v13, %v3693_v19  ;;  %v3826_v39 = vsel %vm1974_vm0, %v3825_v34, %v3821_v18 }
 0x4dd   : > { %v3619_v37 = vsel %vm2016_vm6, %v3618_v5, %v3614_v14  ;;  %v3702_v5 = vrot.slane %v9038_v6, %v11427_v51  ;;  %v3772_v54 = vsel %vm11428_vm5, %v3771_v48, %v3767_v12  ;;  %v3835_v41 = vrot.slane %v9325_v24, %v11421_v45  ;;  %v11434_v14 = vld [vmem:[#allocation119_spill] sm:$0xff] }
 0x4de   : > { %v3624_v63 = vsel %vm2023_vm7, %v3623_v21, %v3619_v37  ;;  %v3638_v21 = vrot.slane %v9056_v31, %v11431_v20  ;;  %v3830_v6 = vrot.slane %v9226_v25, %v11419_v52  ;;  %v3777_v29 = vsel %vm2016_vm6, %v3776_v42, %v3772_v54  ;;  %v11436_v37 = vld [vmem:[#allocation118_spill] sm:$0xff] }
 0x4df   : > { %v9489_v60 = vpop.permute.xlu1 %3495  ;;  %v3629_v53 = vsel %vm2030_vm8, %v3628_v4, %v3624_v63  ;;  %v3703_v9 = vsel %vm2023_vm7, %v3702_v5, %v3698_v2  ;;  %v3786_v31 = vrot.slane %v9270_v44, %v11429_v7  ;;  %vm11433_vm11 = vcmask 720512   ;;  %v9559_v63 = vpop.permute.xlu0 %3534 }
 0x4e0   : > { %v3634_v43 = vsel %vm11433_vm11, %v3633_v38, %v3629_v53  ;;  %v3781_v49 = vrot.slane %v9156_v35, %v11427_v51  ;;  %v3708_v13 = vsel %vm2030_vm8, %v3707_v61, %v3703_v9  ;;  %v3717_v24 = vrot.slane %v9174_v46, %v11431_v20 }
 0x4e1   : > { %v3643_v25 = vrot.slane %v8948_v33, %v11434_v14  ;;  %v3712_v27 = vrot.slane %v9052_v36, %v11432_v10  ;;  %vm11435_vm5 = vcmask 786112   ;;  %v3831_v4 = vsel %vm1981_vm1, %v3830_v6, %v3826_v39  ;;  %v11442_v39 = vld [vmem:[#allocation125_spill] sm:$0xff]  ;;  %v11444_v6 = vld [vmem:[#allocation84_spill] sm:$0xff] }
 0x4e2   : > { %v3639_v44 = vsel %vm11435_vm5, %v3638_v21, %v3634_v43  ;;  %v3648_v1 = vrot.slane %v9070_v11, %v11436_v37  ;;  %v3782_v35 = vsel %vm2023_vm7, %v3781_v49, %v3777_v29  ;;  %v3836_v34 = vsel %vm1988_vm2, %v3835_v41, %v3831_v4  ;;  %v11441_v21 = vld [vmem:[#allocation158_spill] sm:$0xff]  ;;  %v11443_v41 = vld [vmem:[#allocation141_spill] sm:$0xff] }
 0x4e3   : > { %v9511_v23 = vpop.permute.xlu1 %3501  ;;  %v3845_v46 = vrot.slane %v9334_v57, %v11424_v17  ;;  %v3713_v33 = vsel %vm11433_vm11, %v3712_v27, %v3708_v13  ;;  %v3840_v36 = vrot.slane %v9240_v40, %v11423_v56  ;;  %v3787_v19 = vsel %vm2030_vm8, %v3786_v31, %v3782_v35  ;;  %v11445_v31 = vld [vmem:[#allocation148_spill] sm:$0xff]  ;;  %v9600_v49 = vpop.permute.xlu0 %3540  ;;  %v11449_v4 = vld [vmem:[#allocation169_spill] sm:$0xff] }
 0x4e4   : > { %v3796_v12 = vrot.slane %v9282_v0, %v11431_v20  ;;  %v3791_v42 = vrot.slane %v9170_v8, %v11432_v10  ;;  %v3718_v48 = vsel %vm11435_vm5, %v3717_v24, %v3713_v33  ;;  %v3727_v57 = vrot.slane %v9188_v55, %v11436_v37 }
 0x4e5   : > { %v3653_v2 = vrot.slane %v8962_v15, %v8210_v62  ;;  %v3722_v40 = vrot.slane %v9066_v3, %v11434_v14  ;;  %vm11437_vm11 = vcmask 851712   ;;  %v3841_v0 = vsel %vm1995_vm3, %v3840_v36, %v3836_v34  ;;  %v11450_v34 = vld [vmem:[#allocation152_spill] sm:$0xff]  ;;  %v11451_v36 = vld [vmem:[#allocation161_spill] sm:$0xff] }
 0x4e6   : > { %v3644_v61 = vsel %vm11437_vm11, %v3643_v25, %v3639_v44  ;;  %v3792_v5 = vsel %vm11438_vm10, %v3791_v42, %v3787_v19  ;;  %v3846_v8 = vsel %vm2002_vm4, %v3845_v46, %v3841_v0  ;;  %v3855_v53 = vrot.slane %v9343_v32, %v11426_v30  ;;  %vm11439_vm5 = vmmov %vm11437_vm11  ;;  %v11454_v0 = vld [vmem:[#allocation156_spill] sm:$0xff] }
 0x4e7   : > { %v9539_v47 = vpop.permute.xlu1 %3507  ;;  %v3649_v18 = vsel %vm2058_vm12, %v3648_v1, %v3644_v61  ;;  %v3723_v55 = vsel %vm11439_vm5, %v3722_v40, %v3718_v48  ;;  %v3850_v15 = vrot.slane %v9254_v50, %v11425_v26  ;;  %v3797_v3 = vsel %vm11440_vm9, %v3796_v12, %v3792_v5  ;;  %v11446_v50 = vld [vmem:[#allocation56_spill] sm:$0xff]  ;;  %vm11448_vm10 = vmmov %vm11439_vm5  ;;  %v11453_v40 = vld [vmem:[#allocation154_spill] sm:$0xff] }
 0x4e8   : > { %v3806_v38 = vrot.slane %v11441_v21, %v11436_v37  ;;  %v3658_v9 = vrot.slane %v11443_v41, %v11442_v39  ;;  %v3801_v29 = vrot.slane %v11444_v6, %v11434_v14  ;;  %v3728_v32 = vsel %vm2058_vm12, %v3727_v57, %v3723_v55  ;;  %v11452_v48 = vld [vmem:[#allocation88_spill] sm:$0xff]  ;;  %v11455_v5 = vld [vmem:[#allocation159_spill] sm:$0xff] }
 0x4e9   : > { %v3737_v43 = vrot.slane %v11445_v31, %v11442_v39  ;;  %v3732_v13 = vrot.slane %v11446_v50, %v8210_v62  ;;  %vm11447_vm9 = vcmask 458112   ;;  %v3654_v25 = vsel %vm2065_vm13, %v3653_v2, %v3649_v18  ;;  %v11456_v55 = vld [vmem:[#allocation180_spill] sm:$0xff]  ;;  %v11459_v31 = vld [vmem:[#allocation85_spill] sm:$0xff] }
 0x4ea   : > { %v3851_v24 = vsel %vm11447_vm9, %v3850_v15, %v3846_v8  ;;  %v3802_v27 = vsel %vm11448_vm10, %v3801_v29, %v3797_v3  ;;  %v3865_v1 = vrot.slane %v11449_v4, %v11429_v7  ;;  %v3860_v46 = vrot.slane %v11450_v34, %v11427_v51  ;;  %v9641_v29 = vpop.permute.xlu0 %3546  ;;  %v11460_v50 = vld [vmem:[#allocation89_spill] sm:$0xff]  ;;  %vm11474_vm9 = vmmov %vm11448_vm10 }
 0x4eb   : > { %v9567_v11 = vpop.permute.xlu1 %3513  ;;  %v3856_v44 = vsel %vm2016_vm6, %v3855_v53, %v3851_v24  ;;  %v3733_v35 = vsel %vm2065_vm13, %v3732_v13, %v3728_v32  ;;  %v3807_v33 = vsel %vm2058_vm12, %v3806_v38, %v3802_v27  ;;  %v3816_v19 = vrot.slane %v11451_v36, %v11442_v39  ;;  %v11457_v38 = vld [vmem:[#allocation172_spill] sm:$0xff]  ;;  %v11461_v27 = vld [vmem:[#allocation90_spill] sm:$0xff]  ;;  %v11462_v4 = vld [vmem:[#allocation165_spill] sm:$0xff] }
 0x4ec   : > { %v9619_v42 = vsel %vm2072_vm14, %v3658_v9, %v3654_v25  ;;  %v3811_v57 = vrot.slane %v11452_v48, %v8210_v62  ;;  %v9624_v2 = vsel %vm2072_vm14, %v3737_v43, %v3733_v35  ;;  %v3870_v61 = vrot.slane %v11453_v40, %v11432_v10  ;;  %v11458_v9 = vld [vmem:[#allocation196_spill] sm:$0xff]  ;;  %v11463_v35 = vld [vmem:[#allocation167_spill] sm:$0xff] }
 0x4ed   : > { %v3880_v18 = vrot.slane %v11454_v0, %v11434_v14  ;;  %v3890_v8 = vrot.slane %v11455_v5, %v8210_v62  ;;  %v3861_v53 = vsel %vm2023_vm7, %v3860_v46, %v3856_v44  ;;  %v3904_v15 = vrot.slane %v11456_v55, %v11417_v16  ;;  %v11464_v46 = vld [vmem:[#allocation179_spill] sm:$0xff]  ;;  %v11468_v0 = vld [vmem:[#allocation170_spill] sm:$0xff] }
 0x4ee   : > { %v3812_v3 = vsel %vm2065_vm13, %v3811_v57, %v3807_v33  ;;  %v3866_v21 = vsel %vm2030_vm8, %v3865_v1, %v3861_v53  ;;  %v3875_v41 = vrot.slane %v11457_v38, %v11431_v20  ;;  %v3983_v6 = vrot.slane %v11458_v9, %v11417_v16  ;;  %v11467_v57 = vld [vmem:[#allocation195_spill] sm:$0xff]  ;;  %v11470_v38 = vld [vmem:[#allocation197_spill] sm:$0xff] }
 0x4ef   : > { %v9591_v54 = vpop.permute.xlu1 %3519  ;;  %v9644_v32 = vsel %vm2072_vm14, %v3816_v19, %v3812_v3  ;;  %v3900_v43 = vrot.slane %v11459_v31, %v11418_v28  ;;  %v3909_v13 = vrot.slane %v11460_v50, %v11419_v52  ;;  %v4062_v24 = vrot.slane %v9463_v22, %v11417_v16  ;;  %v11466_v22 = vld [vmem:[#allocation182_spill] sm:$0xff] }
 0x4f0   : > { %v3919_v44 = vrot.slane %v11461_v27, %v11423_v56  ;;  %v3929_v1 = vrot.slane %v11462_v4, %v11425_v26  ;;  %v3939_v34 = vrot.slane %v11463_v35, %v11427_v51  ;;  %v3979_v33 = vrot.slane %v11464_v46, %v11418_v28  ;;  %v11494_v35 = vld [vmem:[#allocation204_spill] sm:$0xff] }
 0x4f1   : > { %vm11465_vm11 = vcmask 720512   ;;  %v3905_v19 = vsel %vm1974_vm0, %v3904_v15, %v3900_v43  ;;  %v3914_v48 = vrot.slane %v11466_v22, %v11421_v45  ;;  %v4058_v40 = vrot.slane %v11467_v57, %v11418_v28  ;;  %v11472_v15 = vld [vmem:[#allocation181_spill] sm:$0xff] }
 0x4f2   : > { %v3871_v36 = vsel %vm11465_vm11, %v3870_v61, %v3866_v21  ;;  %v3949_v53 = vrot.slane %v11468_v0, %v11432_v10  ;;  %vm11469_vm5 = vcmask 786112   ;;  %v3984_v3 = vsel %vm1974_vm0, %v3983_v6, %v3979_v33  ;;  %v11471_v61 = vld [vmem:[#allocation173_spill] sm:$0xff]  ;;  %v3553_v33 = vpop.permute.xlu0 %3552  ;;  %v11502_v0 = vld [vmem:[#allocation206_spill] sm:$0xff] }
 0x4f3   : > { %v9616_v12 = vpop.permute.xlu1 %3525  ;;  %v3876_v55 = vsel %vm11469_vm5, %v3875_v41, %v3871_v36  ;;  %v3993_v9 = vrot.slane %v11470_v38, %v11421_v45  ;;  %v3959_v21 = vrot.slane %v11471_v61, %v11434_v14  ;;  %v3988_v31 = vrot.slane %v11472_v15, %v11419_v52  ;;  %v11473_v41 = vld [vmem:[#allocation198_spill] sm:$0xff] }
 0x4f4   : > { %v4063_v43 = vsel %vm1974_vm0, %v4062_v24, %v4058_v40  ;;  %v4072_v50 = vrot.slane %v9489_v60, %v11421_v45  ;;  %v3910_v4 = vsel %vm1981_vm1, %v3909_v13, %v3905_v19  ;;  %v4067_v6 = vrot.slane %v11473_v41, %v11419_v52  ;;  %v11475_v24 = vld [vmem:[#allocation184_spill] sm:$0xff]  ;;  %v11476_v19 = vld [vmem:[#allocation199_spill] sm:$0xff]  ;;  %v11510_v61 = vld [vmem:[#allocation102_spill] sm:$0xff] }
 0x4f5   : > { %v4137_v46 = vrot.slane %v9559_v63, %v11418_v28  ;;  %v3881_v22 = vsel %vm11474_vm9, %v3880_v18, %v3876_v55  ;;  %v3915_v57 = vsel %vm1988_vm2, %v3914_v48, %v3910_v4  ;;  %v3924_v40 = vrot.slane %v11475_v24, %v11424_v17 }
 0x4f6   : > { %v3989_v60 = vsel %vm1981_vm1, %v3988_v31, %v3984_v3  ;;  %v4003_v38 = vrot.slane %v11476_v19, %v11424_v17  ;;  %v4068_v15 = vsel %vm1981_vm1, %v4067_v6, %v4063_v43  ;;  %v4146_v18 = vrot.slane %v9600_v49, %v11419_v52  ;;  %v11479_v43 = vld [vmem:[#allocation200_spill] sm:$0xff]  ;;  %v11480_v49 = vld [vmem:[#allocation186_spill] sm:$0xff]  ;;  %v11481_v19 = vld [vmem:[#allocation201_spill] sm:$0xff] }
 0x4f7   : > { %v9652_v25 = vpop.permute.xlu1 %3531  ;;  %v3994_v13 = vsel %vm1988_vm2, %v3993_v9, %v3989_v60  ;;  %v4073_v48 = vsel %vm1988_vm2, %v4072_v50, %v4068_v15  ;;  %v4082_v55 = vrot.slane %v9511_v23, %v11424_v17  ;;  %v11478_v9 = vld [vmem:[#allocation175_spill] sm:$0xff]  ;;  %v3920_v4 = vsel %vm1995_vm3, %v3919_v44, %v3915_v57  ;;  %v3559_v57 = vpop.permute.xlu0 %3558 }
 0x4f8   : > { %v3885_v31 = vrot.slane %v11478_v9, %v11436_v37  ;;  %v4077_v6 = vrot.slane %v11479_v43, %v11423_v56  ;;  %v3934_v24 = vrot.slane %v11480_v49, %v11426_v30  ;;  %v4013_v15 = vrot.slane %v11481_v19, %v11426_v30 }
 0x4f9   : > { %v4156_v9 = vrot.slane %v9641_v29, %v11423_v56  ;;  %vm11483_vm10 = vcmask 458112  }
 0x4fa   : > { %v4078_v44 = vsel %vm1995_vm3, %v4077_v6, %v4073_v48  ;;  %v11484_v48 = vld [vmem:[#allocation203_spill] sm:$0xff]  ;;  %vm11486_vm11 = vmmov %vm11483_vm10 }
 0x4fb   : > { %v3538_v27 = vpop.permute.xlu1 %3537  ;;  %vm11488_vm5 = vmmov %vm11483_vm10 }
 0x4fc   : > { %v4141_v36 = vrot.slane %v3538_v27, %v11417_v16  ;;  %v11477_v27 = vld [vmem:[#allocation183_spill] sm:$0xff]  ;;  %vm11493_vm9 = vmmov %vm11488_vm5 }
 0x4fd   : > { %v3998_v41 = vrot.slane %v11477_v27, %v11423_v56 }
 0x4fe   : > { %v4142_v63 = vsel %vm1974_vm0, %v4141_v36, %v4137_v46  ;;  %v3925_v36 = vsel %vm2002_vm4, %v3924_v40, %v3920_v4  ;;  %v4087_v4 = vrot.slane %v11484_v48, %v11425_v26 }
 0x4ff   : > { %v3544_v3 = vpop.permute.xlu1 %3543  ;;  %v3999_v50 = vsel %vm1995_vm3, %v3998_v41, %v3994_v13  ;;  %v4147_v23 = vsel %vm1981_vm1, %v4146_v18, %v4142_v63  ;;  %v4083_v13 = vsel %vm2002_vm4, %v4082_v55, %v4078_v44  ;;  %v4092_v63 = vrot.slane %v9539_v47, %v11426_v30 }
 0x500   : > { %v4151_v46 = vrot.slane %v3544_v3, %v11421_v45  ;;  %v4004_v60 = vsel %vm2002_vm4, %v4003_v38, %v3999_v50  ;;  %v11482_v3 = vld [vmem:[#allocation185_spill] sm:$0xff]  ;;  %v3886_v41 = vsel %vm2058_vm12, %v3885_v31, %v3881_v22  ;;  %v3930_v18 = vsel %vm11483_vm10, %v3929_v1, %v3925_v36  ;;  %v11487_v22 = vld [vmem:[#allocation202_spill] sm:$0xff]  ;;  %v11489_v50 = vld [vmem:[#allocation187_spill] sm:$0xff] }
 0x501   : > { %v4008_v40 = vrot.slane %v11482_v3, %v11425_v26  ;;  %v3935_v6 = vsel %vm2016_vm6, %v3934_v24, %v3930_v18  ;;  %v4023_v31 = vrot.slane %v11487_v22, %v11429_v7  ;;  %v4088_v1 = vsel %vm11488_vm5, %v4087_v4, %v4083_v13  ;;  %v3565_v13 = vpop.permute.xlu0 %3564 }
 0x502   : > { %v4152_v27 = vsel %vm1988_vm2, %v4151_v46, %v4147_v23  ;;  %v11485_v46 = vld [vmem:[#allocation188_spill] sm:$0xff]  ;;  %v4018_v23 = vrot.slane %v11489_v50, %v11427_v51  ;;  %v4166_v24 = vrot.slane %v3553_v33, %v11425_v26  ;;  %v4093_v19 = vsel %vm2016_vm6, %v4092_v63, %v4088_v1 }
 0x503   : > { %v3550_v38 = vpop.permute.xlu1 %3549  ;;  %v3944_v29 = vrot.slane %v11485_v46, %v11429_v7  ;;  %v4009_v55 = vsel %vm11486_vm11, %v4008_v40, %v4004_v60  ;;  %v4157_v49 = vsel %vm1995_vm3, %v4156_v9, %v4152_v27  ;;  %v4102_v60 = vrot.slane %v9567_v11, %v11429_v7  ;;  %v11491_v40 = vld [vmem:[#allocation205_spill] sm:$0xff] }
 0x504   : > { %v4161_v43 = vrot.slane %v3550_v38, %v11424_v17  ;;  %v4014_v47 = vsel %vm2016_vm6, %v4013_v15, %v4009_v55  ;;  %v11490_v15 = vld [vmem:[#allocation176_spill] sm:$0xff]  ;;  %v3940_v3 = vsel %vm2023_vm7, %v3939_v34, %v3935_v6  ;;  %v4097_v9 = vrot.slane %v11491_v40, %v11427_v51  ;;  %v11492_v38 = vld [vmem:[#allocation190_spill] sm:$0xff]  ;;  %v11495_v46 = vld [vmem:[#allocation189_spill] sm:$0xff] }
 0x505   : > { %v3969_v27 = vrot.slane %v11490_v15, %v8210_v62  ;;  %v3945_v63 = vsel %vm2030_vm8, %v3944_v29, %v3940_v3  ;;  %v3954_v11 = vrot.slane %v11492_v38, %v11431_v20  ;;  %v4019_v18 = vsel %vm2023_vm7, %v4018_v23, %v4014_v47  ;;  %v11504_v15 = vld [vmem:[#allocation191_spill] sm:$0xff]  ;;  %v11506_v38 = vld [vmem:[#allocation178_spill] sm:$0xff] }
 0x506   : > { %v4162_v36 = vsel %vm2002_vm4, %v4161_v43, %v4157_v49  ;;  %v4024_v4 = vsel %vm2030_vm8, %v4023_v31, %v4019_v18  ;;  %v4033_v34 = vrot.slane %v11494_v35, %v11431_v20  ;;  %v4098_v43 = vsel %vm2023_vm7, %v4097_v9, %v4093_v19  ;;  %v11508_v35 = vld [vmem:[#allocation194_spill] sm:$0xff] }
 0x507   : > { %v3556_v44 = vpop.permute.xlu1 %3555  ;;  %v4167_v48 = vsel %vm11493_vm9, %v4166_v24, %v4162_v36  ;;  %v4028_v55 = vrot.slane %v11495_v46, %v11432_v10  ;;  %v4176_v29 = vrot.slane %v3559_v57, %v11427_v51  ;;  %v4103_v49 = vsel %vm2030_vm8, %v4102_v60, %v4098_v43  ;;  %v11497_v36 = vld [vmem:[#allocation99_spill] sm:$0xff]  ;;  %v3571_v60 = vpop.permute.xlu0 %3570 }
 0x508   : > { %v4171_v33 = vrot.slane %v3556_v44, %v11426_v30  ;;  %v4112_v47 = vrot.slane %v9591_v54, %v11431_v20  ;;  %v3891_v31 = vsel %vm2065_vm13, %v3890_v8, %v3886_v41  ;;  %vm11496_vm10 = vcmask 720512   ;;  %v11499_v54 = vld [vmem:[#allocation192_spill] sm:$0xff] }
 0x509   : > { %v3950_v1 = vsel %vm11496_vm10, %v3949_v53, %v3945_v63  ;;  %v4107_v50 = vrot.slane %v11497_v36, %v11432_v10  ;;  %vm11498_vm11 = vcmask 786112   ;;  %v3964_v24 = vrot.slane %v11499_v54, %v11436_v37  ;;  %vm11500_vm5 = vmmov %vm11496_vm10 }
 0x50a   : > { %v4172_v6 = vsel %vm2016_vm6, %v4171_v33, %v4167_v48  ;;  %v3955_v23 = vsel %vm11498_vm11, %v3954_v11, %v3950_v1  ;;  %v4029_v19 = vsel %vm11500_vm5, %v4028_v55, %v4024_v4  ;;  %vm11501_vm9 = vmmov %vm11498_vm11  ;;  %v4043_v41 = vrot.slane %v11502_v0, %v11436_v37  ;;  %v11513_v55 = vld [vmem:[#allocation193_spill] sm:$0xff] }
 0x50b   : > { %v3562_v22 = vpop.permute.xlu1 %3561  ;;  %v4177_v5 = vsel %vm2023_vm7, %v4176_v29, %v4172_v6  ;;  %v4034_v8 = vsel %vm11501_vm9, %v4033_v34, %v4029_v19  ;;  %vm11503_vm10 = vmmov %vm11500_vm5  ;;  %v4038_v3 = vrot.slane %v11504_v15, %v11434_v14  ;;  %v4186_v40 = vrot.slane %v3565_v13, %v11432_v10 }
 0x50c   : > { %v4181_v57 = vrot.slane %v3562_v22, %v11429_v7  ;;  %v4108_v53 = vsel %vm11503_vm10, %v4107_v50, %v4103_v49  ;;  %vm11505_vm11 = vmmov %vm11501_vm9  ;;  %v4122_v33 = vrot.slane %v9616_v12, %v11436_v37  ;;  %v3895_v11 = vrot.slane %v11506_v38, %v11442_v39  ;;  %v11522_v38 = vld [vmem:[#allocation11_spill] sm:$0xff] }
 0x50d   : > { %v4113_v9 = vsel %vm11505_vm11, %v4112_v47, %v4108_v53  ;;  %vm11507_vm5 = vcmask 851712   ;;  %v4117_v48 = vrot.slane %v9481_v58, %v11434_v14  ;;  %v3974_v34 = vrot.slane %v11508_v35, %v11442_v39  ;;  %v11525_v35 = vld [vmem:[#allocation94_spill] sm:$0xff] }
 0x50e   : > { %v4182_v44 = vsel %vm2030_vm8, %v4181_v57, %v4177_v5  ;;  %v3960_v18 = vsel %vm11507_vm5, %v3959_v21, %v3955_v23  ;;  %vm11509_vm9 = vmmov %vm11507_vm5  ;;  %v4053_v46 = vrot.slane %v11510_v61, %v11442_v39  ;;  %v4048_v29 = vrot.slane %v11513_v55, %v8210_v62  ;;  %v3577_v23 = vpop.permute.xlu0 %3576  ;;  %v11529_v55 = vld [vmem:[#allocation97_spill] sm:$0xff] }
 0x50f   : > { %v3568_v63 = vpop.permute.xlu1 %3567  ;;  %v3965_v13 = vsel %vm2058_vm12, %v3964_v24, %v3960_v18  ;;  %v4039_v12 = vsel %vm11509_vm9, %v4038_v3, %v4034_v8  ;;  %v4187_v43 = vsel %vm11503_vm10, %v4186_v40, %v4182_v44  ;;  %vm11511_vm11 = vmmov %vm11507_vm5  ;;  %vm11512_vm5 = vcmask 786112  }
 0x510   : > { %v4191_v4 = vrot.slane %v3568_v63, %v11431_v20  ;;  %v4044_v6 = vsel %vm2058_vm12, %v4043_v41, %v4039_v12  ;;  %v4118_v21 = vsel %vm11511_vm11, %v4117_v48, %v4113_v9  ;;  %v4196_v49 = vrot.slane %v3571_v60, %v11434_v14  ;;  %vm11515_vm10 = vmmov %vm11511_vm11  ;;  %v11526_v12 = vld [vmem:[#allocation101_spill] sm:$0xff] }
 0x511   : > { %v4123_v47 = vsel %vm2058_vm12, %v4122_v33, %v4118_v21  ;;  %v4132_v22 = vrot.slane %v9652_v25, %v11442_v39  ;;  %v3896_v36 = vsel %vm2072_vm14, %v3895_v11, %v3891_v31  ;;  %v3970_v50 = vsel %vm2065_vm13, %v3969_v27, %v3965_v13  ;;  %v11521_v33 = vld [vmem:[#allocation12_spill] sm:$0xff] }
 0x512   : > { %v4192_v58 = vsel %vm11512_vm5, %v4191_v4, %v4187_v43  ;;  %v4127_v57 = vrot.slane %v9520_v59, %v8210_v62  ;;  %vm11514_vm9 = vcmask 1041409   ;;  %v3975_v19 = vsel %vm2072_vm14, %v3974_v34, %v3970_v50  ;;  %v11524_v4 = vld [vmem:[#allocation38_spill] sm:$0xff]  ;;  %v11528_v21 = vld [vmem:[#allocation108_spill] sm:$0xff] }
 0x513   : > { %v3574_v1 = vpop.permute.xlu1 %3573  ;;  %v4213_v24 = vsel %vm11514_vm9, %v9624_v2, %v9619_v42  ;;  %v4049_v5 = vsel %vm2065_vm13, %v4048_v29, %v4044_v6  ;;  %v4197_v25 = vsel %vm11515_vm10, %v4196_v49, %v4192_v58  ;;  %vm11516_vm11 = vcmask 1042434   ;;  %v11527_v6 = vld [vmem:[#allocation93_spill] sm:$0xff]  ;;  %v11530_v49 = vld [vmem:[#allocation112_spill] sm:$0xff] }
 0x514   : > { %v4201_v54 = vrot.slane %v3574_v1, %v11436_v37  ;;  %v4214_v31 = vsel %vm11516_vm11, %v9644_v32, %v4213_v24  ;;  %v4054_v27 = vsel %vm2072_vm14, %v4053_v46, %v4049_v5  ;;  %v4128_v8 = vsel %vm2065_vm13, %v4127_v57, %v4123_v47  ;;  %v11533_v57 = vld [vmem:[#allocation71_spill] sm:$0xff] }
 0x515   : > { %v4215_v0 = vsel %vm10921_vm15, %v3896_v36, %v4214_v31  ;;  %v4206_v41 = vrot.slane %v3577_v23, %v8210_v62  ;;  %v4133_v2 = vsel %vm2072_vm14, %v4132_v22, %v4128_v8  ;;  %vm11517_vm5 = vcmask 1044484   ;;  %v11531_v22 = vld [vmem:[#allocation106_spill] sm:$0xff]  ;;  %v11532_v36 = vld [vmem:[#allocation32_spill] sm:$0xff] }
 0x516   : > { %v4202_v59 = vsel %vm2058_vm12, %v4201_v54, %v4197_v25  ;;  %v4216_v60 = vsel %vm11517_vm5, %v3975_v19, %v4215_v0  ;;  %vm11518_vm9 = vcmask 1045509   ;;  %vm11519_vm10 = vcmask 1046534   ;;  %v11534_v54 = vld [vmem:[#allocation33_spill] sm:$0xff]  ;;  %v11535_v19 = vld [vmem:[#allocation72_spill] sm:$0xff]  ;;  %v11538_v8 = vld [vmem:[#allocation30_spill] sm:$0xff] }
 0x517   : > { %v3580_v42 = vpop.permute.xlu1 %3579  ;;  %v4207_v44 = vsel %vm2065_vm13, %v4206_v41, %v4202_v59  ;;  %v4217_v32 = vsel %vm11518_vm9, %v4054_v27, %v4216_v60  ;;  %vm11520_vm11 = vcmask 1047559   ;;  %v11523_v11 = vsub.s32 1, %v11522_v38  ;;  %v11537_v27 = vld [vmem:[#allocation39_spill] sm:$0xff]  ;;  %v11541_v60 = vld [vmem:[#allocation54_spill] sm:$0xff] }
 0x518   : > { %v4211_v53 = vrot.slane %v3580_v42, %v11442_v39  ;;  %v4218_v3 = vsel %vm11519_vm10, %v4133_v2, %v4217_v32  ;;  %v11536_v25 = vsub.s32 2, %v11522_v38  ;;  %v11539_v41 = vld [vmem:[#allocation51_spill] sm:$0xff]  ;;  %v11540_v2 = vld [vmem:[#allocation37_spill] sm:$0xff]  ;;  %vm11630_vm5 = vcmask 458112  }
 0x519   : > { %v11542_v32 = vld [vmem:[#allocation13_spill] sm:$0xff]  ;;  %vm11635_vm9 = vcmask 720512   ;;  %vm11636_vm10 = vcmask 786112  }
 0x51a   : > { %v4212_v15 = vsel %vm2072_vm14, %v4211_v53, %v4207_v44 }
 0x51b   : > { %v4219_v40 = vsel %vm11520_vm11, %v4212_v15, %v4218_v3  ;;  %v11543_v3 = vld [vmem:[#allocation57_spill] sm:$0xff]  ;;  %vm11639_vm11 = vcmask 851712  }
 0x51c   : > { %4221 = vadd.xlane.f32.xlu0 %v4219_v40 }
 0x5a9   : > { %v9851_v9 = vpop.xlane.xlu0 %4221 }
 0x5aa   : > { %v4227_v63 = vrot.slane %v9851_v9, %v11521_v33  ;;  %v4231_v18 = vrot.slane %v9851_v9, %v11523_v11  ;;  %v4235_v31 = vrot.slane %v9851_v9, %v11536_v25  ;;  %v11544_v33 = vld [vmem:[#allocation95_spill] sm:$0xff] }
 0x5ab   : > { %v11558_v25 = vld [vmem:[#allocation55_spill] sm:$0xff] }
 0x5ac   : > { %6671 = vrcp.f32 %v4227_v63 }
 0x5ad   : > { %6673 = vrcp.f32 %v4231_v18  ;;  %v11545_v18 = vld [vmem:[#allocation61_spill] sm:$0xff] }
 0x5ae   : > { %6675 = vrcp.f32 %v4235_v31 }
 0x5b6   : > { %v6672_v48 = vpop.eup %6671 }
 0x5b7   : > { %v4273_v13 = vmul.f32 %v6672_v48, %v11524_v4  ;;  %v4265_v34 = vmul.f32 %v6672_v48, %v11525_v35  ;;  %v4279_v43 = vmul.f32 %v6672_v48, %v11526_v12  ;;  %v4266_v61 = vmul.f32 %v6672_v48, %v11527_v6  ;;  %v9862_v46 = vpop.eup %6673 }
 0x5b8   : > { %v4282_v58 = vmul.f32 %v9862_v46, %v11528_v21  ;;  %v4267_v29 = vmul.f32 %v6672_v48, %v11529_v55  ;;  %v4284_v47 = vmul.f32 %v9862_v46, %v11530_v49  ;;  %v4268_v1 = vmul.f32 %v6672_v48, %v11531_v22  ;;  %v9891_v11 = vpop.eup %6675 }
 0x5b9   : > { %4553 = vperm.xlu0 %6157, %v4273_v13   ;;  %4529 = vperm.xlu1 %6156, %v4265_v34   ;;  %v4286_v50 = vmul.f32 %v9862_v46, %v11532_v36  ;;  %v4269_v23 = vmul.f32 %v6672_v48, %v11533_v57  ;;  %v4288_v24 = vmul.f32 %v9862_v46, %v11534_v54  ;;  %v11546_v13 = vld [vmem:[#allocation42_spill] sm:$0xff]  ;;  %v11547_v34 = vld [vmem:[#allocation65_spill] sm:$0xff] }
 0x5ba   : > { %v4270_v5 = vmul.f32 %v6672_v48, %v11535_v19  ;;  %v4290_v59 = vmul.f32 %v9862_v46, %v11537_v27  ;;  %v4271_v0 = vmul.f32 %v6672_v48, %v11538_v8  ;;  %v4292_v42 = vmul.f32 %v9862_v46, %v11539_v41  ;;  %v11559_v27 = vld [vmem:[#allocation47_spill] sm:$0xff]  ;;  %v11560_v8 = vld [vmem:[#allocation62_spill] sm:$0xff]  ;;  %v11561_v41 = vld [vmem:[#allocation48_spill] sm:$0xff] }
 0x5bb   : > { %v4272_v53 = vmul.f32 %v6672_v48, %v11540_v2  ;;  %v4294_v44 = vmul.f32 %v9862_v46, %v11541_v60  ;;  %v4274_v15 = vmul.f32 %v6672_v48, %v11542_v32  ;;  %v4296_v40 = vmul.f32 %v9862_v46, %v11543_v3 }
 0x5bc   : > { %v4275_v63 = vmul.f32 %v6672_v48, %v11544_v33  ;;  %v4299_v4 = vmul.f32 %v9891_v11, %v11545_v18  ;;  %v4276_v35 = vmul.f32 %v6672_v48, %v11546_v13  ;;  %v4301_v12 = vmul.f32 %v9891_v11, %v11547_v34 }
 0x5bd   : > { %4571 = vperm.xlu0 %6157, %v4279_v43   ;;  %4532 = vperm.xlu1 %6156, %v4266_v61   ;;  %v11548_v43 = vld [vmem:[#allocation98_spill] sm:$0xff]  ;;  %v11549_v61 = vld [vmem:[#allocation69_spill] sm:$0xff]  ;;  %v4311_v31 = vmul.f32 %v9891_v11, %v11558_v25 }
 0x5be   : > { %v4277_v6 = vmul.f32 %v6672_v48, %v11548_v43  ;;  %v4303_v21 = vmul.f32 %v9891_v11, %v11549_v61 }
 0x5c1   : > { %4577 = vperm.xlu0 %6157, %v4282_v58   ;;  %4535 = vperm.xlu1 %6156, %v4267_v29   ;;  %v11550_v58 = vld [vmem:[#allocation15_spill] sm:$0xff]  ;;  %v11551_v29 = vld [vmem:[#allocation73_spill] sm:$0xff] }
 0x5c2   : > { %v4278_v55 = vmul.f32 %v6672_v48, %v11550_v58  ;;  %v4305_v49 = vmul.f32 %v9891_v11, %v11551_v29 }
 0x5c5   : > { %4583 = vperm.xlu0 %6157, %v4284_v47   ;;  %4538 = vperm.xlu1 %6156, %v4268_v1   ;;  %v11552_v47 = vld [vmem:[#allocation43_spill] sm:$0xff]  ;;  %v11553_v1 = vsub.s32 3, %v11522_v38 }
 0x5c6   : > { %v4280_v22 = vmul.f32 %v6672_v48, %v11552_v47 }
 0x5c7   : > { %v4239_v36 = vrot.slane %v9851_v9, %v11553_v1  ;;  %v11575_v1 = vld [vmem:[#allocation40_spill] sm:$0xff] }
 0x5c9   : > { %4589 = vperm.xlu0 %6157, %v4286_v50   ;;  %4541 = vperm.xlu1 %6156, %v4269_v23   ;;  %v11554_v50 = vld [vmem:[#allocation77_spill] sm:$0xff]  ;;  %v11555_v23 = vld [vmem:[#allocation44_spill] sm:$0xff]  ;;  %6677 = vrcp.f32 %v4239_v36 }
 0x5ca   : > { %v4307_v57 = vmul.f32 %v9891_v11, %v11554_v50  ;;  %v4283_v54 = vmul.f32 %v9862_v46, %v11555_v23  ;;  %v11576_v50 = vld [vmem:[#allocation129_spill] sm:$0xff]  ;;  %v11577_v23 = vld [vmem:[#allocation16_spill] sm:$0xff] }
 0x5cd   : > { %4595 = vperm.xlu0 %6157, %v4288_v24   ;;  %4544 = vperm.xlu1 %6156, %v4270_v5   ;;  %v11556_v24 = vld [vmem:[#allocation81_spill] sm:$0xff] }
 0x5ce   : > { %v4309_v19 = vmul.f32 %v9891_v11, %v11556_v24  ;;  %v11557_v5 = vld [vmem:[#allocation45_spill] sm:$0xff]  ;;  %v11578_v24 = vld [vmem:[#allocation131_spill] sm:$0xff] }
 0x5cf   : > { %v4285_v48 = vmul.f32 %v9862_v46, %v11557_v5 }
 0x5d1   : > { %4601 = vperm.xlu0 %6157, %v4290_v59   ;;  %4547 = vperm.xlu1 %6156, %v4271_v0   ;;  %v4287_v59 = vmul.f32 %v9862_v46, %v11559_v27  ;;  %v4313_v0 = vmul.f32 %v9891_v11, %v11560_v8 }
 0x5d3   : > { %v9924_v2 = vpop.eup %6677 }
 0x5d4   : > { %v4328_v36 = vmul.f32 %v9924_v2, %v11575_v1 }
 0x5d5   : > { %4607 = vperm.xlu0 %6157, %v4292_v42   ;;  %4550 = vperm.xlu1 %6156, %v4272_v53   ;;  %v4289_v42 = vmul.f32 %v9862_v46, %v11561_v41  ;;  %v11562_v53 = vld [vmem:[#allocation114_spill] sm:$0xff] }
 0x5d6   : > { %v4316_v60 = vmul.f32 %v9924_v2, %v11562_v53 }
 0x5d9   : > { %4613 = vperm.xlu0 %6157, %v4294_v44   ;;  %4556 = vperm.xlu1 %6156, %v4274_v15   ;;  %v11563_v44 = vld [vmem:[#allocation49_spill] sm:$0xff]  ;;  %v11564_v15 = vld [vmem:[#allocation122_spill] sm:$0xff] }
 0x5da   : > { %v4291_v32 = vmul.f32 %v9862_v46, %v11563_v44  ;;  %v4318_v3 = vmul.f32 %v9924_v2, %v11564_v15 }
 0x5dd   : > { %4619 = vperm.xlu0 %6157, %v4296_v40   ;;  %4559 = vperm.xlu1 %6156, %v4275_v63   ;;  %v11565_v40 = vld [vmem:[#allocation52_spill] sm:$0xff]  ;;  %v11566_v63 = vld [vmem:[#allocation82_spill] sm:$0xff] }
 0x5de   : > { %v4293_v33 = vmul.f32 %v9862_v46, %v11565_v40  ;;  %v4320_v18 = vmul.f32 %v9924_v2, %v11566_v63 }
 0x5e1   : > { %4625 = vperm.xlu0 %6157, %v4299_v4   ;;  %4562 = vperm.xlu1 %6156, %v4276_v35   ;;  %v11567_v4 = vld [vmem:[#allocation58_spill] sm:$0xff] }
 0x5e2   : > { %v4295_v13 = vmul.f32 %v9862_v46, %v11567_v4  ;;  %v11568_v35 = vld [vmem:[#allocation130_spill] sm:$0xff] }
 0x5e3   : > { %v4322_v34 = vmul.f32 %v9924_v2, %v11568_v35 }
 0x5e5   : > { %4631 = vperm.xlu0 %6157, %v4301_v12   ;;  %4565 = vperm.xlu1 %6156, %v4277_v6   ;;  %v11569_v12 = vld [vmem:[#allocation66_spill] sm:$0xff]  ;;  %v11570_v6 = vsub.s32 4, %v11522_v38 }
 0x5e6   : > { %v4297_v43 = vmul.f32 %v9862_v46, %v11569_v12 }
 0x5e7   : > { %v4243_v61 = vrot.slane %v9851_v9, %v11570_v6  ;;  %v11592_v6 = vld [vmem:[#allocation28_spill] sm:$0xff] }
 0x5e9   : > { %4637 = vperm.xlu0 %6157, %v4303_v21   ;;  %4568 = vperm.xlu1 %6156, %v4278_v55   ;;  %v11571_v21 = vld [vmem:[#allocation34_spill] sm:$0xff]  ;;  %6679 = vrcp.f32 %v4243_v61 }
 0x5ea   : > { %v4324_v58 = vmul.f32 %v9924_v2, %v11571_v21  ;;  %v11572_v55 = vld [vmem:[#allocation74_spill] sm:$0xff]  ;;  %v11593_v21 = vld [vmem:[#allocation137_spill] sm:$0xff] }
 0x5eb   : > { %v4300_v29 = vmul.f32 %v9891_v11, %v11572_v55 }
 0x5ed   : > { %4643 = vperm.xlu0 %6157, %v4305_v49   ;;  %4574 = vperm.xlu1 %6156, %v4280_v22   ;;  %v11573_v49 = vld [vmem:[#allocation36_spill] sm:$0xff]  ;;  %v11574_v22 = vld [vmem:[#allocation78_spill] sm:$0xff] }
 0x5ee   : > { %v4326_v47 = vmul.f32 %v9924_v2, %v11573_v49  ;;  %v4302_v46 = vmul.f32 %v9891_v11, %v11574_v22  ;;  %v11594_v49 = vld [vmem:[#allocation29_spill] sm:$0xff]  ;;  %v11595_v22 = vld [vmem:[#allocation138_spill] sm:$0xff] }
 0x5f1   : > { %4649 = vperm.xlu0 %6157, %v4307_v57   ;;  %4580 = vperm.xlu1 %6156, %v4283_v54   ;;  %v4304_v57 = vmul.f32 %v9891_v11, %v11576_v50  ;;  %v4330_v54 = vmul.f32 %v9924_v2, %v11577_v23 }
 0x5f3   : > { %v9961_v5 = vpop.eup %6679 }
 0x5f4   : > { %v4345_v61 = vmul.f32 %v9961_v5, %v11592_v6 }
 0x5f5   : > { %4655 = vperm.xlu0 %6157, %v4309_v19   ;;  %4586 = vperm.xlu1 %6156, %v4285_v48   ;;  %v4306_v19 = vmul.f32 %v9891_v11, %v11578_v24  ;;  %v11579_v48 = vld [vmem:[#allocation18_spill] sm:$0xff] }
 0x5f6   : > { %v4333_v25 = vmul.f32 %v9961_v5, %v11579_v48 }
 0x5f9   : > { %4661 = vperm.xlu0 %6157, %v4311_v31   ;;  %4592 = vperm.xlu1 %6156, %v4287_v59   ;;  %v11580_v31 = vld [vmem:[#allocation116_spill] sm:$0xff] }
 0x5fa   : > { %v4308_v27 = vmul.f32 %v9891_v11, %v11580_v31  ;;  %v11581_v59 = vld [vmem:[#allocation20_spill] sm:$0xff] }
 0x5fb   : > { %v4335_v8 = vmul.f32 %v9961_v5, %v11581_v59 }
 0x5fd   : > { %4667 = vperm.xlu0 %6157, %v4313_v0   ;;  %4598 = vperm.xlu1 %6156, %v4289_v42   ;;  %v11582_v0 = vld [vmem:[#allocation132_spill] sm:$0xff]  ;;  %v11583_v42 = vld [vmem:[#allocation22_spill] sm:$0xff] }
 0x5fe   : > { %v4310_v41 = vmul.f32 %v9891_v11, %v11582_v0  ;;  %v4337_v53 = vmul.f32 %v9961_v5, %v11583_v42 }
 0x601   : > { %4673 = vperm.xlu0 %6157, %v4316_v60   ;;  %4604 = vperm.xlu1 %6156, %v4291_v32   ;;  %v11584_v60 = vld [vmem:[#allocation133_spill] sm:$0xff]  ;;  %v11585_v32 = vld [vmem:[#allocation24_spill] sm:$0xff] }
 0x602   : > { %v4312_v44 = vmul.f32 %v9891_v11, %v11584_v60  ;;  %v4339_v15 = vmul.f32 %v9961_v5, %v11585_v32 }
 0x605   : > { %4679 = vperm.xlu0 %6157, %v4318_v3   ;;  %4610 = vperm.xlu1 %6156, %v4293_v33   ;;  %v11586_v3 = vld [vmem:[#allocation134_spill] sm:$0xff]  ;;  %v11587_v33 = vsub.s32 5, %v11522_v38 }
 0x606   : > { %v4314_v40 = vmul.f32 %v9891_v11, %v11586_v3 }
 0x607   : > { %v4247_v63 = vrot.slane %v9851_v9, %v11587_v33 }
 0x609   : > { %4685 = vperm.xlu0 %6157, %v4320_v18   ;;  %4616 = vperm.xlu1 %6156, %v4295_v13   ;;  %v11588_v18 = vld [vmem:[#allocation26_spill] sm:$0xff]  ;;  %v11589_v13 = vld [vmem:[#allocation135_spill] sm:$0xff]  ;;  %6681 = vrcp.f32 %v4247_v63 }
 0x60a   : > { %v4341_v4 = vmul.f32 %v9961_v5, %v11588_v18  ;;  %v4317_v35 = vmul.f32 %v9924_v2, %v11589_v13 }
 0x60d   : > { %4691 = vperm.xlu0 %6157, %v4322_v34   ;;  %4622 = vperm.xlu1 %6156, %v4297_v43   ;;  %v11590_v34 = vld [vmem:[#allocation27_spill] sm:$0xff]  ;;  %v11591_v43 = vld [vmem:[#allocation136_spill] sm:$0xff] }
 0x60e   : > { %v4343_v12 = vmul.f32 %v9961_v5, %v11590_v34  ;;  %v4319_v11 = vmul.f32 %v9924_v2, %v11591_v43 }
 0x611   : > { %4697 = vperm.xlu0 %6157, %v4324_v58   ;;  %4628 = vperm.xlu1 %6156, %v4300_v29   ;;  %v4321_v58 = vmul.f32 %v9924_v2, %v11593_v21  ;;  %v11608_v21 = vld [vmem:[#allocation19_spill] sm:$0xff] }
 0x613   : > { %v10002_v1 = vpop.eup %6681 }
 0x615   : > { %4703 = vperm.xlu0 %6157, %v4326_v47   ;;  %4634 = vperm.xlu1 %6156, %v4302_v46   ;;  %v4347_v47 = vmul.f32 %v9961_v5, %v11594_v49  ;;  %v4323_v46 = vmul.f32 %v9924_v2, %v11595_v22  ;;  %v11609_v22 = vld [vmem:[#allocation83_spill] sm:$0xff] }
 0x619   : > { %4709 = vperm.xlu0 %6157, %v4328_v36   ;;  %4640 = vperm.xlu1 %6156, %v4304_v57   ;;  %v11596_v57 = vld [vmem:[#allocation59_spill] sm:$0xff] }
 0x61a   : > { %v4350_v23 = vmul.f32 %v10002_v1, %v11596_v57  ;;  %v11610_v57 = vld [vmem:[#allocation21_spill] sm:$0xff] }
 0x61d   : > { %4715 = vperm.xlu0 %6157, %v4330_v54   ;;  %4646 = vperm.xlu1 %6156, %v4306_v19   ;;  %v11597_v54 = vld [vmem:[#allocation31_spill] sm:$0xff] }
 0x61e   : > { %v4325_v24 = vmul.f32 %v9924_v2, %v11597_v54 }
 0x621   : > { %4721 = vperm.xlu0 %6157, %v4333_v25   ;;  %4652 = vperm.xlu1 %6156, %v4308_v27   ;;  %v11598_v25 = vld [vmem:[#allocation63_spill] sm:$0xff] }
 0x622   : > { %v4352_v31 = vmul.f32 %v10002_v1, %v11598_v25  ;;  %v11599_v27 = vld [vmem:[#allocation35_spill] sm:$0xff] }
 0x623   : > { %v4327_v59 = vmul.f32 %v9924_v2, %v11599_v27  ;;  %v11611_v25 = vld [vmem:[#allocation87_spill] sm:$0xff] }
 0x624   : > { %v11612_v27 = vld [vmem:[#allocation139_spill] sm:$0xff] }
 0x625   : > { %4727 = vperm.xlu0 %6157, %v4335_v8   ;;  %4658 = vperm.xlu1 %6156, %v4310_v41   ;;  %v11600_v41 = vld [vmem:[#allocation67_spill] sm:$0xff] }
 0x626   : > { %v4354_v42 = vmul.f32 %v10002_v1, %v11600_v41 }
 0x629   : > { %4733 = vperm.xlu0 %6157, %v4337_v53   ;;  %4664 = vperm.xlu1 %6156, %v4312_v44   ;;  %v11601_v53 = vld [vmem:[#allocation41_spill] sm:$0xff] }
 0x62a   : > { %v4329_v60 = vmul.f32 %v9924_v2, %v11601_v53 }
 0x62d   : > { %4739 = vperm.xlu0 %6157, %v4339_v15   ;;  %4670 = vperm.xlu1 %6156, %v4314_v40   ;;  %v11602_v15 = vld [vmem:[#allocation23_spill] sm:$0xff]  ;;  %v11603_v40 = vld [vmem:[#allocation14_spill] sm:$0xff] }
 0x62e   : > { %v4356_v3 = vmul.f32 %v10002_v1, %v11602_v15  ;;  %v4331_v33 = vmul.f32 %v9924_v2, %v11603_v40  ;;  %v11607_v2 = vld [vmem:[#allocation79_spill] sm:$0xff] }
 0x631   : > { %4745 = vperm.xlu0 %6157, %v4341_v4   ;;  %4676 = vperm.xlu1 %6156, %v4317_v35   ;;  %v11604_v4 = vsub.s32 6, %v11522_v38  ;;  %v11605_v35 = vld [vmem:[#allocation75_spill] sm:$0xff] }
 0x632   : > { %v4358_v34 = vmul.f32 %v10002_v1, %v11605_v35 }
 0x633   : > { %v4251_v13 = vrot.slane %v9851_v9, %v11604_v4 }
 0x635   : > { %4751 = vperm.xlu0 %6157, %v4343_v12   ;;  %4682 = vperm.xlu1 %6156, %v4319_v11   ;;  %v11606_v12 = vld [vmem:[#allocation17_spill] sm:$0xff]  ;;  %6683 = vrcp.f32 %v4251_v13  ;;  %v11615_v13 = vld [vmem:[#allocation64_spill] sm:$0xff] }
 0x636   : > { %v4334_v43 = vmul.f32 %v9961_v5, %v11606_v12 }
 0x638   : > { %v9994_v55 = vpop.permute.xlu0 %4553  ;;  %v9996_v29 = vpop.permute.xlu1 %4529 }
 0x639   : > { %4757 = vperm.xlu0 %6157, %v4345_v61   ;;  %4688 = vperm.xlu1 %6156, %v4321_v58   ;;  %v4360_v61 = vmul.f32 %v10002_v1, %v11607_v2  ;;  %v4336_v58 = vmul.f32 %v9961_v5, %v11608_v21 }
 0x63c   : > { %v10004_v36 = vpop.permute.xlu0 %4571  ;;  %v10006_v50 = vpop.permute.xlu1 %4532 }
 0x63d   : > { %4763 = vperm.xlu0 %6157, %v4347_v47   ;;  %4694 = vperm.xlu1 %6156, %v4323_v46   ;;  %v4362_v46 = vmul.f32 %v10002_v1, %v11609_v22 }
 0x63f   : > { %v10071_v41 = vpop.eup %6683 }
 0x640   : > { %v10012_v19 = vpop.permute.xlu0 %4577  ;;  %v10014_v48 = vpop.permute.xlu1 %4535  ;;  %v4369_v35 = vmul.f32 %v10071_v41, %v11615_v13 }
 0x641   : > { %4769 = vperm.xlu0 %6157, %v4350_v23   ;;  %4700 = vperm.xlu1 %6156, %v4325_v24   ;;  %v4338_v23 = vmul.f32 %v9961_v5, %v11610_v57 }
 0x644   : > { %v10020_v8 = vpop.permute.xlu0 %4583  ;;  %v10022_v0 = vpop.permute.xlu1 %4538 }
 0x645   : > { %4775 = vperm.xlu0 %6157, %v4352_v31   ;;  %4706 = vperm.xlu1 %6156, %v4327_v59   ;;  %v4364_v31 = vmul.f32 %v10002_v1, %v11611_v25  ;;  %v4340_v59 = vmul.f32 %v9961_v5, %v11612_v27 }
 0x648   : > { %v10028_v44 = vpop.permute.xlu0 %4589  ;;  %v10030_v32 = vpop.permute.xlu1 %4541 }
 0x649   : > { %4781 = vperm.xlu0 %6157, %v4354_v42   ;;  %4712 = vperm.xlu1 %6156, %v4329_v60   ;;  %v11613_v60 = vld [vmem:[#allocation91_spill] sm:$0xff] }
 0x64a   : > { %v4367_v15 = vmul.f32 %v10071_v41, %v11613_v60 }
 0x64c   : > { %v10036_v63 = vpop.permute.xlu0 %4595  ;;  %v10038_v18 = vpop.permute.xlu1 %4544 }
 0x64d   : > { %4787 = vperm.xlu0 %6157, %v4356_v3   ;;  %4718 = vperm.xlu1 %6156, %v4331_v33   ;;  %v11614_v3 = vld [vmem:[#allocation25_spill] sm:$0xff] }
 0x64e   : > { %v4342_v40 = vmul.f32 %v9961_v5, %v11614_v3 }
 0x650   : > { %v10047_v11 = vpop.permute.xlu0 %4601  ;;  %v10049_v6 = vpop.permute.xlu1 %4547 }
 0x651   : > { %4793 = vperm.xlu0 %6157, %v4358_v34   ;;  %4724 = vperm.xlu1 %6156, %v4334_v43   ;;  %v11616_v34 = vld [vmem:[#allocation50_spill] sm:$0xff] }
 0x652   : > { %v4344_v12 = vmul.f32 %v9961_v5, %v11616_v34 }
 0x654   : > { %v10055_v49 = vpop.permute.xlu0 %4607  ;;  %v10057_v47 = vpop.permute.xlu1 %4550 }
 0x655   : > { %4799 = vperm.xlu0 %6157, %v4360_v61   ;;  %4730 = vperm.xlu1 %6156, %v4336_v58   ;;  %v11617_v61 = vsub.s32 7, %v11522_v38  ;;  %v11618_v58 = vld [vmem:[#allocation68_spill] sm:$0xff] }
 0x656   : > { %v4371_v22 = vmul.f32 %v10071_v41, %v11618_v58 }
 0x657   : > { %v4255_v21 = vrot.slane %v9851_v9, %v11617_v61 }
 0x658   : > { %v10063_v54 = vpop.permute.xlu0 %4613  ;;  %v10065_v24 = vpop.permute.xlu1 %4556 }
 0x659   : > { %4805 = vperm.xlu0 %6157, %v4362_v46   ;;  %4736 = vperm.xlu1 %6156, %v4338_v23   ;;  %v11619_v46 = vld [vmem:[#allocation53_spill] sm:$0xff]  ;;  %6685 = vrcp.f32 %v4255_v21  ;;  %v11624_v21 = vld [vmem:[#allocation123_spill] sm:$0xff] }
 0x65a   : > { %v4346_v57 = vmul.f32 %v9961_v5, %v11619_v46  ;;  %v4377_v58 = vmul.f32 %v10071_v41, %v11624_v21 }
 0x65c   : > { %v10073_v42 = vpop.permute.xlu0 %4619  ;;  %v10075_v53 = vpop.permute.xlu1 %4559 }
 0x65d   : > { %4811 = vperm.xlu0 %6157, %v4364_v31   ;;  %4742 = vperm.xlu1 %6156, %v4340_v59   ;;  %v11620_v31 = vld [vmem:[#allocation144_spill] sm:$0xff] }
 0x65e   : > { %v4373_v27 = vmul.f32 %v10071_v41, %v11620_v31  ;;  %v11621_v59 = vld [vmem:[#allocation140_spill] sm:$0xff]  ;;  %v5003_v31 = vrot.slane %v10020_v8, %v11419_v52  ;;  %v5013_v8 = vrot.slane %v10028_v44, %v11423_v56  ;;  %v5023_v44 = vrot.slane %v10036_v63, %v11425_v26 }
 0x65f   : > { %v4348_v38 = vmul.f32 %v9961_v5, %v11621_v59  ;;  %v5033_v63 = vrot.slane %v10047_v11, %v11427_v51  ;;  %v5043_v11 = vrot.slane %v10055_v49, %v11432_v10  ;;  %v5053_v49 = vrot.slane %v10063_v54, %v11434_v14 }
 0x660   : > { %v10081_v33 = vpop.permute.xlu0 %4625  ;;  %v10083_v4 = vpop.permute.xlu1 %4562  ;;  %v5063_v54 = vrot.slane %v10073_v42, %v8210_v62 }
 0x661   : > { %4817 = vperm.xlu0 %6157, %v4367_v15   ;;  %4748 = vperm.xlu1 %6156, %v4342_v40   ;;  %v11622_v15 = vld [vmem:[#allocation120_spill] sm:$0xff] }
 0x662   : > { %v4375_v3 = vmul.f32 %v10071_v41, %v11622_v15  ;;  %v11623_v40 = vld [vmem:[#allocation60_spill] sm:$0xff] }
 0x663   : > { %v4351_v13 = vmul.f32 %v10002_v1, %v11623_v40 }
 0x664   : > { %v10089_v43 = vpop.permute.xlu0 %4631  ;;  %v10091_v2 = vpop.permute.xlu1 %4565 }
 0x665   : > { %4823 = vperm.xlu0 %6157, %v4369_v35   ;;  %4754 = vperm.xlu1 %6156, %v4344_v12   ;;  %v4994_v12 = vrot.slane %v10012_v19, %v11418_v28 }
 0x668   : > { %v10100_v23 = vpop.permute.xlu0 %4637  ;;  %v10102_v25 = vpop.permute.xlu1 %4568 }
 0x669   : > { %4829 = vperm.xlu0 %6157, %v4371_v22   ;;  %4760 = vperm.xlu1 %6156, %v4346_v57   ;;  %v11625_v22 = vld [vmem:[#allocation142_spill] sm:$0xff]  ;;  %v10126_v57 = vpop.eup %6685 }
 0x66a   : > { %v4353_v46 = vmul.f32 %v10002_v1, %v11625_v22  ;;  %v11628_v22 = vld [vmem:[#allocation163_spill] sm:$0xff] }
 0x66c   : > { %v10108_v9 = vpop.permute.xlu0 %4643  ;;  %v10110_v60 = vpop.permute.xlu1 %4574 }
 0x66d   : > { %4835 = vperm.xlu0 %6157, %v4373_v27   ;;  %4766 = vperm.xlu1 %6156, %v4348_v38  }
 0x670   : > { %v10116_v35 = vpop.permute.xlu0 %4649  ;;  %v4581_v34 = vpop.permute.xlu1 %4580 }
 0x671   : > { %v4998_v5 = vrot.slane %v4581_v34, %v11417_v16  ;;  %4841 = vperm.xlu0 %6157, %v4375_v3   ;;  %4772 = vperm.xlu1 %6156, %v4351_v13   ;;  %v11626_v3 = vld [vmem:[#allocation162_spill] sm:$0xff]  ;;  %v11627_v13 = vld [vmem:[#allocation143_spill] sm:$0xff] }
 0x672   : > { %v4385_v40 = vmul.f32 %v10126_v57, %v11626_v3  ;;  %v4355_v34 = vmul.f32 %v10002_v1, %v11627_v13  ;;  %v11631_v13 = vld [vmem:[#allocation164_spill] sm:$0xff] }
 0x673   : > { %v4999_v61 = vsel %vm1974_vm0, %v4998_v5, %v4994_v12 }
 0x674   : > { %v10130_v27 = vpop.permute.xlu0 %4655  ;;  %v4587_v19 = vpop.permute.xlu1 %4586  ;;  %v5004_v38 = vsel %vm1981_vm1, %v5003_v31, %v4999_v61  ;;  %v11629_v31 = vld [vmem:[#allocation145_spill] sm:$0xff] }
 0x675   : > { %v5008_v59 = vrot.slane %v4587_v19, %v11421_v45  ;;  %4847 = vperm.xlu0 %6157, %v4377_v58   ;;  %4778 = vperm.xlu1 %6156, %v4353_v46   ;;  %v4387_v46 = vmul.f32 %v10126_v57, %v11628_v22  ;;  %v4357_v19 = vmul.f32 %v10002_v1, %v11629_v31  ;;  %v11633_v31 = vld [vmem:[#allocation166_spill] sm:$0xff] }
 0x677   : > { %v5009_v15 = vsel %vm1988_vm2, %v5008_v59, %v5004_v38 }
 0x678   : > { %v10141_v12 = vpop.permute.xlu0 %4661  ;;  %v4593_v5 = vpop.permute.xlu1 %4592  ;;  %v5014_v61 = vsel %vm1995_vm3, %v5013_v8, %v5009_v15  ;;  %v11632_v8 = vld [vmem:[#allocation76_spill] sm:$0xff] }
 0x679   : > { %v5018_v21 = vrot.slane %v4593_v5, %v11424_v17  ;;  %4868 = vperm.xlu0 %6157, %v4385_v40   ;;  %4784 = vperm.xlu1 %6156, %v4355_v34   ;;  %v4389_v34 = vmul.f32 %v10126_v57, %v11631_v13  ;;  %v4359_v5 = vmul.f32 %v10002_v1, %v11632_v8  ;;  %v11637_v8 = vld [vmem:[#allocation168_spill] sm:$0xff] }
 0x67b   : > { %v5019_v58 = vsel %vm2002_vm4, %v5018_v21, %v5014_v61 }
 0x67c   : > { %v10152_v59 = vpop.permute.xlu0 %4667  ;;  %v4599_v38 = vpop.permute.xlu1 %4598  ;;  %v5024_v15 = vsel %vm11630_vm5, %v5023_v44, %v5019_v58  ;;  %v11634_v44 = vld [vmem:[#allocation80_spill] sm:$0xff] }
 0x67d   : > { %v5028_v3 = vrot.slane %v4599_v38, %v11426_v30  ;;  %4874 = vperm.xlu0 %6157, %v4387_v46   ;;  %4790 = vperm.xlu1 %6156, %v4357_v19   ;;  %v4391_v19 = vmul.f32 %v10126_v57, %v11633_v31  ;;  %v4361_v38 = vmul.f32 %v10002_v1, %v11634_v44  ;;  %v11640_v44 = vld [vmem:[#allocation124_spill] sm:$0xff] }
 0x67f   : > { %v5029_v40 = vsel %vm2016_vm6, %v5028_v3, %v5024_v15 }
 0x680   : > { %v10163_v21 = vpop.permute.xlu0 %4673  ;;  %v4605_v61 = vpop.permute.xlu1 %4604  ;;  %v5034_v58 = vsel %vm2023_vm7, %v5033_v63, %v5029_v40  ;;  %v11638_v63 = vld [vmem:[#allocation146_spill] sm:$0xff] }
 0x681   : > { %v5038_v22 = vrot.slane %v4605_v61, %v11429_v7  ;;  %4880 = vperm.xlu0 %6157, %v4389_v34   ;;  %4796 = vperm.xlu1 %6156, %v4359_v5   ;;  %v4393_v5 = vmul.f32 %v10126_v57, %v11637_v8  ;;  %v4363_v61 = vmul.f32 %v10002_v1, %v11638_v63  ;;  %v11642_v63 = vld [vmem:[#allocation171_spill] sm:$0xff] }
 0x683   : > { %v5039_v46 = vsel %vm2030_vm8, %v5038_v22, %v5034_v58 }
 0x684   : > { %v10174_v3 = vpop.permute.xlu0 %4679  ;;  %v4611_v15 = vpop.permute.xlu1 %4610  ;;  %v5044_v40 = vsel %vm11635_vm9, %v5043_v11, %v5039_v46  ;;  %v11641_v11 = vld [vmem:[#allocation147_spill] sm:$0xff]  ;;  %vm11651_vm9 = vmmov %vm11630_vm5 }
 0x685   : > { %v5048_v13 = vrot.slane %v4611_v15, %v11431_v20  ;;  %4886 = vperm.xlu0 %6157, %v4391_v19   ;;  %4802 = vperm.xlu1 %6156, %v4361_v38   ;;  %v4394_v38 = vmul.f32 %v10126_v57, %v11640_v44  ;;  %v4365_v15 = vmul.f32 %v10002_v1, %v11641_v11 }
 0x687   : > { %v5049_v34 = vsel %vm11636_vm10, %v5048_v13, %v5044_v40  ;;  %vm11653_vm10 = vcmask 720512  }
 0x688   : > { %v10185_v22 = vpop.permute.xlu0 %4685  ;;  %v4617_v58 = vpop.permute.xlu1 %4616  ;;  %v5054_v46 = vsel %vm11639_vm11, %v5053_v49, %v5049_v34  ;;  %v11643_v49 = vld [vmem:[#allocation92_spill] sm:$0xff]  ;;  %vm11654_vm11 = vmmov %vm11653_vm10 }
 0x689   : > { %v5058_v31 = vrot.slane %v4617_v58, %v11436_v37  ;;  %4892 = vperm.xlu0 %6157, %v4393_v5   ;;  %4808 = vperm.xlu1 %6156, %v4363_v61   ;;  %v4395_v61 = vmul.f32 %v10126_v57, %v11642_v63  ;;  %v4368_v1 = vmul.f32 %v10071_v41, %v11643_v49 }
 0x68b   : > { %v5059_v19 = vsel %vm2058_vm12, %v5058_v31, %v5054_v46  ;;  %v5073_v31 = vrot.slane %v10081_v33, %v11418_v28 }
 0x68c   : > { %v10196_v13 = vpop.permute.xlu0 %4691  ;;  %v4623_v40 = vpop.permute.xlu1 %4622  ;;  %v5064_v34 = vsel %vm2065_vm13, %v5063_v54, %v5059_v19  ;;  %v5082_v19 = vrot.slane %v10089_v43, %v11419_v52  ;;  %v5092_v43 = vrot.slane %v10100_v23, %v11423_v56 }
 0x68d   : > { %v5068_v8 = vrot.slane %v4623_v40, %v11442_v39  ;;  %4895 = vperm.xlu0 %6157, %v4394_v38   ;;  %4814 = vperm.xlu1 %6156, %v4365_v15   ;;  %v11644_v38 = vld [vmem:[#allocation126_spill] sm:$0xff]  ;;  %v11645_v15 = vld [vmem:[#allocation96_spill] sm:$0xff] }
 0x68e   : > { %v4396_v11 = vmul.f32 %v10126_v57, %v11644_v38  ;;  %v4370_v54 = vmul.f32 %v10071_v41, %v11645_v15  ;;  %v4924_v38 = vrot.slane %v10014_v48, %v11419_v52  ;;  %v4929_v15 = vrot.slane %v10022_v0, %v11421_v45 }
 0x68f   : > { %v10201_v5 = vsel %vm2072_vm14, %v5068_v8, %v5064_v34 }
 0x690   : > { %v10207_v58 = vpop.permute.xlu0 %4697  ;;  %v4629_v42 = vpop.permute.xlu1 %4628 }
 0x691   : > { %v5077_v46 = vrot.slane %v4629_v42, %v11417_v16  ;;  %4898 = vperm.xlu0 %6157, %v4395_v61   ;;  %4820 = vperm.xlu1 %6156, %v4368_v1   ;;  %v11646_v61 = vld [vmem:[#allocation174_spill] sm:$0xff]  ;;  %v11647_v1 = vld [vmem:[#allocation149_spill] sm:$0xff] }
 0x692   : > { %v4397_v49 = vmul.f32 %v10126_v57, %v11646_v61  ;;  %v4372_v42 = vmul.f32 %v10071_v41, %v11647_v1 }
 0x693   : > { %v5078_v44 = vsel %vm1974_vm0, %v5077_v46, %v5073_v31  ;;  %v4919_v31 = vrot.slane %v10006_v50, %v11417_v16  ;;  %v5102_v50 = vrot.slane %v10108_v9, %v11425_v26 }
 0x694   : > { %v10219_v40 = vpop.permute.xlu0 %4703  ;;  %v5083_v8 = vsel %vm1981_vm1, %v5082_v19, %v5078_v44  ;;  %v4635_v33 = vpop.permute.xlu1 %4634 }
 0x695   : > { %v5087_v34 = vrot.slane %v4635_v33, %v11421_v45  ;;  %4901 = vperm.xlu0 %6157, %v4396_v11   ;;  %4826 = vperm.xlu1 %6156, %v4370_v54   ;;  %v4915_v11 = vrot.slane %v9996_v29, %v11418_v28  ;;  %v4934_v54 = vrot.slane %v10030_v32, %v11423_v56  ;;  %v11648_v33 = vld [vmem:[#allocation128_spill] sm:$0xff] }
 0x696   : > { %v4398_v48 = vmul.f32 %v10126_v57, %v11648_v33  ;;  %v4939_v29 = vrot.slane %v10038_v18, %v11424_v17  ;;  %v5112_v18 = vrot.slane %v10116_v35, %v11427_v51  ;;  %v5122_v33 = vrot.slane %v10130_v27, %v11432_v10 }
 0x697   : > { %v5088_v63 = vsel %vm1988_vm2, %v5087_v34, %v5083_v8  ;;  %v11649_v34 = vld [vmem:[#allocation151_spill] sm:$0xff] }
 0x698   : > { %v10232_v46 = vpop.permute.xlu0 %4709  ;;  %v5093_v19 = vsel %vm1995_vm3, %v5092_v43, %v5088_v63  ;;  %v4641_v44 = vpop.permute.xlu1 %4640  ;;  %v4374_v43 = vmul.f32 %v10071_v41, %v11649_v34  ;;  %v4920_v63 = vsel %vm1974_vm0, %v4919_v31, %v4915_v11  ;;  %v4949_v31 = vrot.slane %v10057_v47, %v11426_v30 }
 0x699   : > { %v5097_v23 = vrot.slane %v4641_v44, %v11424_v17  ;;  %4904 = vperm.xlu0 %6157, %v4397_v49   ;;  %4832 = vperm.xlu1 %6156, %v4372_v42   ;;  %v4925_v32 = vsel %vm1981_vm1, %v4924_v38, %v4920_v63  ;;  %v4944_v49 = vrot.slane %v10049_v6, %v11425_v26  ;;  %v11650_v38 = vld [vmem:[#allocation153_spill] sm:$0xff]  ;;  %v11652_v63 = vld [vmem:[#allocation70_spill] sm:$0xff] }
 0x69a   : > { %v4930_v42 = vsel %vm1988_vm2, %v4929_v15, %v4925_v32  ;;  %v4964_v34 = vrot.slane %v10075_v53, %v11432_v10 }
 0x69b   : > { %v5098_v8 = vsel %vm2002_vm4, %v5097_v23, %v5093_v19  ;;  %v4935_v19 = vsel %vm1995_vm3, %v4934_v54, %v4930_v42  ;;  %v4376_v23 = vmul.f32 %v10071_v41, %v11650_v38  ;;  %v4959_v54 = vrot.slane %v10065_v24, %v11429_v7 }
 0x69c   : > { %v10254_v0 = vpop.permute.xlu0 %4715  ;;  %v5103_v9 = vsel %vm11630_vm5, %v5102_v50, %v5098_v8  ;;  %v4647_v61 = vpop.permute.xlu1 %4646  ;;  %v4940_v6 = vsel %vm2002_vm4, %v4939_v29, %v4935_v19  ;;  %v4384_v29 = vmul.f32 %v10126_v57, %v11652_v63  ;;  %vm11655_vm5 = vcmask 786112  }
 0x69d   : > { %v5107_v1 = vrot.slane %v4647_v61, %v11426_v30  ;;  %4907 = vperm.xlu0 %6157, %v4398_v48   ;;  %4838 = vperm.xlu1 %6156, %v4374_v43   ;;  %v4945_v8 = vsel %vm11651_vm9, %v4944_v49, %v4940_v6  ;;  %v4954_v48 = vrot.slane %v9994_v55, %v11427_v51  ;;  %vm11657_vm9 = vmmov %vm11655_vm5 }
 0x69e   : > { %v4950_v35 = vsel %vm2016_vm6, %v4949_v31, %v4945_v8  ;;  %v4974_v55 = vrot.slane %v10091_v2, %v11434_v14  ;;  %v4984_v8 = vrot.slane %v10004_v36, %v8210_v62 }
 0x69f   : > { %v5108_v44 = vsel %vm2016_vm6, %v5107_v1, %v5103_v9  ;;  %v4969_v9 = vrot.slane %v10083_v4, %v11431_v20  ;;  %v4955_v27 = vsel %vm2023_vm7, %v4954_v48, %v4950_v35  ;;  %v4979_v1 = vrot.slane %v10102_v25, %v11436_v37  ;;  %v11660_v35 = vld [vmem:[#allocation103_spill] sm:$0xff] }
 0x6a0   : > { %v10271_v11 = vpop.permute.xlu0 %4721  ;;  %v5113_v50 = vsel %vm2023_vm7, %v5112_v18, %v5108_v44  ;;  %v4653_v15 = vpop.permute.xlu1 %4652  ;;  %v4960_v49 = vsel %vm2030_vm8, %v4959_v54, %v4955_v27  ;;  %v5132_v4 = vrot.slane %v10141_v12, %v11434_v14  ;;  %v11656_v18 = vld [vmem:[#allocation86_spill] sm:$0xff]  ;;  %v4388_v54 = vmul.f32 %v10126_v57, %v11660_v35 }
 0x6a1   : > { %v5117_v47 = vrot.slane %v4653_v15, %v11429_v7  ;;  %4844 = vperm.xlu1 %6156, %v4376_v23   ;;  %v4965_v42 = vsel %vm11654_vm11, %v4964_v34, %v4960_v49  ;;  %v4386_v19 = vmul.f32 %v10126_v57, %v11656_v18  ;;  %v5142_v15 = vrot.slane %v10152_v59, %v8210_v62 }
 0x6a2   : > { %v4970_v2 = vsel %vm11657_vm9, %v4969_v9, %v4965_v42  ;;  %vm11663_vm11 = vcmask 1042434   ;;  %vm11670_vm9 = vcmask 720512  }
 0x6a3   : > { %v5118_v43 = vsel %vm2030_vm8, %v5117_v47, %v5113_v50  ;;  %v4989_v50 = vrot.slane %v10110_v60, %v11442_v39 }
 0x6a4   : > { %v10290_v61 = vpop.permute.xlu0 %4727  ;;  %v5123_v24 = vsel %vm11653_vm10, %v5122_v33, %v5118_v43  ;;  %v4659_v32 = vpop.permute.xlu1 %4658  ;;  %vm11658_vm10 = vcmask 851712  }
 0x6a5   : > { %v5127_v53 = vrot.slane %v4659_v32, %v11431_v20  ;;  %4865 = vperm.xlu1 %6156, %v4384_v29   ;;  %vm11659_vm15 = vmmov %vm11658_vm10  ;;  %v11662_v29 = vld [vmem:[#allocation150_spill] sm:$0xff] }
 0x6a6   : > { %v4975_v6 = vsel %vm11659_vm15, %v4974_v55, %v4970_v2  ;;  %vm11661_vm15 = vcmask 1041409   ;;  %v4390_v9 = vmul.f32 %v10126_v57, %v11662_v29  ;;  %v5152_v55 = vrot.slane %v10163_v21, %v11418_v28 }
 0x6a7   : > { %v5128_v31 = vsel %vm11655_vm5, %v5127_v53, %v5123_v24  ;;  %v4980_v12 = vsel %vm2058_vm12, %v4979_v1, %v4975_v6  ;;  %v11664_v1 = vld [vmem:[#allocation121_spill] sm:$0xff]  ;;  %v5171_v21 = vrot.slane %v10185_v22, %v11423_v56  ;;  %vm11667_vm5 = vcmask 458112  }
 0x6a8   : > { %v10307_v44 = vpop.permute.xlu0 %4733  ;;  %v5133_v38 = vsel %vm11658_vm10, %v5132_v4, %v5128_v31  ;;  %v4665_v23 = vpop.permute.xlu1 %4664  ;;  %v4985_v43 = vsel %vm2065_vm13, %v4984_v8, %v4980_v12  ;;  %v4392_v4 = vmul.f32 %v10126_v57, %v11664_v1  ;;  %v11666_v8 = vld [vmem:[#allocation46_spill] sm:$0xff]  ;;  %vm11671_vm10 = vcmask 786112  }
 0x6a9   : > { %v5137_v25 = vrot.slane %v4665_v23, %v11436_v37  ;;  %4871 = vperm.xlu1 %6156, %v4386_v19   ;;  %v4990_v59 = vsel %vm2072_vm14, %v4989_v50, %v4985_v43  ;;  %v5181_v50 = vrot.slane %v10196_v13, %v11425_v26  ;;  %v4379_v22 = vmul.f32 %v10071_v41, %v11666_v8 }
 0x6aa   : > { %v5544_v36 = vsel %vm11661_vm15, %v10201_v5, %v4990_v59  ;;  %v5161_v5 = vrot.slane %v10174_v3, %v11419_v52  ;;  %vm11673_vm15 = vcmask 851712  }
 0x6ab   : > { %v5138_v47 = vsel %vm2058_vm12, %v5137_v25, %v5133_v38  ;;  %v11665_v38 = vld [vmem:[#allocation155_spill] sm:$0xff] }
 0x6ac   : > { %v10322_v33 = vpop.permute.xlu0 %4739  ;;  %v5143_v48 = vsel %vm2065_vm13, %v5142_v15, %v5138_v47  ;;  %v4671_v34 = vpop.permute.xlu1 %4670  ;;  %v4378_v3 = vmul.f32 %v10071_v41, %v11665_v38  ;;  %v5221_v38 = vrot.slane %v10254_v0, %v8210_v62  ;;  %v5231_v0 = vrot.slane %v10271_v11, %v11418_v28 }
 0x6ad   : > { %v5147_v60 = vrot.slane %v4671_v34, %v11442_v39  ;;  %4877 = vperm.xlu1 %6156, %v4388_v54   ;;  %v5191_v34 = vrot.slane %v10207_v58, %v11427_v51 }
 0x6af   : > { %v5148_v63 = vsel %vm2072_vm14, %v5147_v60, %v5143_v48  ;;  %v11668_v60 = vld [vmem:[#allocation157_spill] sm:$0xff] }
 0x6b0   : > { %v10334_v24 = vsel %vm11663_vm11, %v5148_v63, %v5544_v36  ;;  %v10336_v32 = vpop.permute.xlu0 %4745  ;;  %v4677_v27 = vpop.permute.xlu1 %4676  ;;  %v4380_v13 = vmul.f32 %v10071_v41, %v11668_v60  ;;  %vm11675_vm11 = vcmask 1043459  }
 0x6b1   : > { %v5156_v53 = vrot.slane %v4677_v27, %v11417_v16  ;;  %4883 = vperm.xlu1 %6156, %v4390_v9   ;;  %v5201_v9 = vrot.slane %v10219_v40, %v11432_v10 }
 0x6b3   : > { %v5157_v49 = vsel %vm1974_vm0, %v5156_v53, %v5152_v55  ;;  %v11669_v55 = vld [vmem:[#allocation127_spill] sm:$0xff] }
 0x6b4   : > { %v10346_v42 = vpop.permute.xlu0 %4751  ;;  %v5162_v31 = vsel %vm1981_vm1, %v5161_v5, %v5157_v49  ;;  %v4683_v18 = vpop.permute.xlu1 %4682  ;;  %v4381_v58 = vmul.f32 %v10071_v41, %v11669_v55 }
 0x6b5   : > { %v5166_v19 = vrot.slane %v4683_v18, %v11421_v45  ;;  %4889 = vperm.xlu1 %6156, %v4392_v4   ;;  %v5211_v4 = vrot.slane %v10232_v46, %v11434_v14  ;;  %v11672_v18 = vld [vmem:[#allocation160_spill] sm:$0xff] }
 0x6b6   : > { %v4382_v40 = vmul.f32 %v10071_v41, %v11672_v18 }
 0x6b7   : > { %v5167_v2 = vsel %vm1988_vm2, %v5166_v19, %v5162_v31 }
 0x6b8   : > { %v10355_v23 = vpop.permute.xlu0 %4757  ;;  %v5172_v6 = vsel %vm1995_vm3, %v5171_v21, %v5167_v2  ;;  %v4689_v25 = vpop.permute.xlu1 %4688 }
 0x6b9   : > { %v5176_v12 = vrot.slane %v4689_v25, %v11424_v17  ;;  %4850 = vperm.xlu1 %6156, %v4378_v3   ;;  %v11674_v25 = vld [vmem:[#allocation177_spill] sm:$0xff] }
 0x6ba   : > { %v4399_v46 = vmul.f32 %v10126_v57, %v11674_v25  ;;  %v5240_v57 = vrot.slane %v10290_v61, %v11419_v52  ;;  %v5260_v61 = vrot.slane %v10322_v33, %v11425_v26  ;;  %v5280_v33 = vrot.slane %v10346_v42, %v11432_v10 }
 0x6bb   : > { %v5177_v15 = vsel %vm2002_vm4, %v5176_v12, %v5172_v6 }
 0x6bc   : > { %v10364_v47 = vpop.permute.xlu0 %4763  ;;  %v5182_v35 = vsel %vm11667_vm5, %v5181_v50, %v5177_v15  ;;  %v4695_v54 = vpop.permute.xlu1 %4694 }
 0x6bd   : > { %v5186_v48 = vrot.slane %v4695_v54, %v11426_v30  ;;  %4853 = vperm.xlu1 %6156, %v4379_v22   ;;  %v5300_v42 = vrot.slane %v10364_v47, %v8210_v62 }
 0x6bf   : > { %v5187_v43 = vsel %vm2016_vm6, %v5186_v48, %v5182_v35 }
 0x6c0   : > { %v10373_v59 = vpop.permute.xlu0 %4769  ;;  %v5192_v36 = vsel %vm2023_vm7, %v5191_v34, %v5187_v43  ;;  %v4701_v63 = vpop.permute.xlu1 %4700 }
 0x6c1   : > { %v5196_v29 = vrot.slane %v4701_v63, %v11429_v7  ;;  %4856 = vperm.xlu1 %6156, %v4380_v13  }
 0x6c3   : > { %v5197_v27 = vsel %vm2030_vm8, %v5196_v29, %v5192_v36 }
 0x6c4   : > { %v5202_v53 = vsel %vm11670_vm9, %v5201_v9, %v5197_v27  ;;  %v4707_v5 = vpop.permute.xlu1 %4706  ;;  %v10383_v49 = vpop.permute.xlu0 %4775 }
 0x6c5   : > { %v5206_v1 = vrot.slane %v4707_v5, %v11431_v20  ;;  %4859 = vperm.xlu1 %6156, %v4381_v58   ;;  %v5319_v47 = vrot.slane %v10383_v49, %v11419_v52 }
 0x6c7   : > { %v5207_v31 = vsel %vm11671_vm10, %v5206_v1, %v5202_v53 }
 0x6c8   : > { %v5212_v19 = vsel %vm11673_vm15, %v5211_v4, %v5207_v31  ;;  %v4713_v21 = vpop.permute.xlu1 %4712  ;;  %v10395_v3 = vpop.permute.xlu0 %4781 }
 0x6c9   : > { %v5216_v2 = vrot.slane %v4713_v21, %v11436_v37  ;;  %4862 = vperm.xlu1 %6156, %v4382_v40  }
 0x6cb   : > { %v5217_v6 = vsel %vm2058_vm12, %v5216_v2, %v5212_v19 }
 0x6cc   : > { %v5222_v12 = vsel %vm2065_vm13, %v5221_v38, %v5217_v6  ;;  %v4719_v50 = vpop.permute.xlu1 %4718  ;;  %v10407_v35 = vpop.permute.xlu0 %4787 }
 0x6cd   : > { %v5226_v41 = vrot.slane %v4719_v50, %v11442_v39  ;;  %4910 = vperm.xlu1 %6156, %v4399_v46   ;;  %v5339_v49 = vrot.slane %v10407_v35, %v11425_v26 }
 0x6cf   : > { %v5227_v15 = vsel %vm2072_vm14, %v5226_v41, %v5222_v12 }
 0x6d0   : > { %v5546_v8 = vsel %vm11675_vm11, %v5227_v15, %v10334_v24  ;;  %v4725_v22 = vpop.permute.xlu1 %4724  ;;  %v5250_v24 = vrot.slane %v10307_v44, %v11423_v56  ;;  %v4794_v13 = vpop.permute.xlu0 %4793  ;;  %v5270_v44 = vrot.slane %v10336_v32, %v11427_v51  ;;  %v5290_v32 = vrot.slane %v10355_v23, %v11434_v14 }
 0x6d1   : > { %v5235_v54 = vrot.slane %v4725_v22, %v11417_v16  ;;  %vm11676_vm11 = vcmask 1044484  }
 0x6d3   : > { %v5236_v48 = vsel %vm1974_vm0, %v5235_v54, %v5231_v0 }
 0x6d4   : > { %v5241_v34 = vsel %vm1981_vm1, %v5240_v57, %v5236_v48  ;;  %v4731_v43 = vpop.permute.xlu1 %4730  ;;  %v4800_v58 = vpop.permute.xlu0 %4799  ;;  %v5310_v48 = vrot.slane %v10373_v59, %v11418_v28 }
 0x6d5   : > { %v5245_v60 = vrot.slane %v4731_v43, %v11421_v45 }
 0x6d7   : > { %v5246_v11 = vsel %vm1988_vm2, %v5245_v60, %v5241_v34 }
 0x6d8   : > { %v5251_v36 = vsel %vm1995_vm3, %v5250_v24, %v5246_v11  ;;  %v4737_v63 = vpop.permute.xlu1 %4736  ;;  %v4806_v18 = vpop.permute.xlu0 %4805 }
 0x6d9   : > { %v5255_v29 = vrot.slane %v4737_v63, %v11424_v17 }
 0x6db   : > { %v5256_v9 = vsel %vm2002_vm4, %v5255_v29, %v5251_v36 }
 0x6dc   : > { %v5261_v27 = vsel %vm11667_vm5, %v5260_v61, %v5256_v9  ;;  %v4743_v55 = vpop.permute.xlu1 %4742  ;;  %v4812_v46 = vpop.permute.xlu0 %4811 }
 0x6dd   : > { %v5265_v53 = vrot.slane %v4743_v55, %v11426_v30 }
 0x6df   : > { %v5266_v5 = vsel %vm2016_vm6, %v5265_v53, %v5261_v27 }
 0x6e0   : > { %v5271_v1 = vsel %vm2023_vm7, %v5270_v44, %v5266_v5  ;;  %v4749_v4 = vpop.permute.xlu1 %4748  ;;  %v10445_v0 = vpop.permute.xlu0 %4817 }
 0x6e1   : > { %v5275_v31 = vrot.slane %v4749_v4, %v11429_v7 }
 0x6e3   : > { %v5276_v40 = vsel %vm2030_vm8, %v5275_v31, %v5271_v1 }
 0x6e4   : > { %v5281_v19 = vsel %vm11670_vm9, %v5280_v33, %v5276_v40  ;;  %v4755_v21 = vpop.permute.xlu1 %4754  ;;  %v10456_v11 = vpop.permute.xlu0 %4823  ;;  %v5359_v33 = vrot.slane %v4800_v58, %v11432_v10 }
 0x6e5   : > { %v5285_v2 = vrot.slane %v4755_v21, %v11431_v20 }
 0x6e7   : > { %v5286_v38 = vsel %vm11671_vm10, %v5285_v2, %v5281_v19 }
 0x6e8   : > { %v5291_v6 = vsel %vm11673_vm15, %v5290_v32, %v5286_v38  ;;  %v4761_v25 = vpop.permute.xlu1 %4760  ;;  %v10466_v9 = vpop.permute.xlu0 %4829 }
 0x6e9   : > { %v5295_v12 = vrot.slane %v4761_v25, %v11436_v37 }
 0x6eb   : > { %v5296_v50 = vsel %vm2058_vm12, %v5295_v12, %v5291_v6 }
 0x6ec   : > { %v5301_v41 = vsel %vm2065_vm13, %v5300_v42, %v5296_v50  ;;  %v4767_v15 = vpop.permute.xlu1 %4766  ;;  %v10474_v31 = vpop.permute.xlu0 %4835  ;;  %v5379_v42 = vrot.slane %v4812_v46, %v8210_v62 }
 0x6ed   : > { %v5305_v22 = vrot.slane %v4767_v15, %v11442_v39 }
 0x6ef   : > { %v5306_v23 = vsel %vm2072_vm14, %v5305_v22, %v5301_v41 }
 0x6f0   : > { %v5547_v54 = vsel %vm11676_vm11, %v5306_v23, %v5546_v8  ;;  %v4773_v57 = vpop.permute.xlu1 %4772  ;;  %v5329_v8 = vrot.slane %v10395_v3, %v11423_v56  ;;  %v5349_v3 = vrot.slane %v4794_v13, %v11427_v51  ;;  %v5369_v13 = vrot.slane %v4806_v18, %v11434_v14  ;;  %v10482_v32 = vpop.permute.xlu0 %4841 }
 0x6f1   : > { %v5314_v34 = vrot.slane %v4773_v57, %v11417_v16  ;;  %vm11677_vm11 = vcmask 1045509  }
 0x6f3   : > { %v5315_v43 = vsel %vm1974_vm0, %v5314_v34, %v5310_v48 }
 0x6f4   : > { %v5320_v60 = vsel %vm1981_vm1, %v5319_v47, %v5315_v43  ;;  %v4779_v24 = vpop.permute.xlu1 %4778  ;;  %v10489_v41 = vpop.permute.xlu0 %4847 }
 0x6f5   : > { %v5324_v36 = vrot.slane %v4779_v24, %v11421_v45 }
 0x6f7   : > { %v5325_v63 = vsel %vm1988_vm2, %v5324_v36, %v5320_v60 }
 0x6f8   : > { %v5330_v59 = vsel %vm1995_vm3, %v5329_v8, %v5325_v63  ;;  %v4785_v29 = vpop.permute.xlu1 %4784  ;;  %v4869_v48 = vpop.permute.xlu0 %4868 }
 0x6f9   : > { %v5334_v61 = vrot.slane %v4785_v29, %v11424_v17 }
 0x6fb   : > { %v5335_v27 = vsel %vm2002_vm4, %v5334_v61, %v5330_v59 }
 0x6fc   : > { %v5340_v55 = vsel %vm11667_vm5, %v5339_v49, %v5335_v27  ;;  %v4791_v53 = vpop.permute.xlu1 %4790  ;;  %v4875_v43 = vpop.permute.xlu0 %4874 }
 0x6fd   : > { %v5344_v44 = vrot.slane %v4791_v53, %v11426_v30 }
 0x6ff   : > { %v5345_v5 = vsel %vm2016_vm6, %v5344_v44, %v5340_v55 }
 0x700   : > { %v5350_v1 = vsel %vm2023_vm7, %v5349_v3, %v5345_v5  ;;  %v4797_v4 = vpop.permute.xlu1 %4796  ;;  %v4881_v24 = vpop.permute.xlu0 %4880  ;;  %v5482_v5 = vrot.slane %v4875_v43, %v11421_v45 }
 0x701   : > { %v5354_v35 = vrot.slane %v4797_v4, %v11429_v7  ;;  %v5389_v4 = vrot.slane %v10445_v0, %v11418_v28 }
 0x703   : > { %v5355_v40 = vsel %vm2030_vm8, %v5354_v35, %v5350_v1 }
 0x704   : > { %v5360_v19 = vsel %vm11670_vm9, %v5359_v33, %v5355_v40  ;;  %v4803_v21 = vpop.permute.xlu1 %4802  ;;  %v4887_v8 = vpop.permute.xlu0 %4886 }
 0x705   : > { %v5364_v2 = vrot.slane %v4803_v21, %v11431_v20 }
 0x707   : > { %v5365_v38 = vsel %vm11671_vm10, %v5364_v2, %v5360_v19  ;;  %v5398_v2 = vrot.slane %v10456_v11, %v11419_v52 }
 0x708   : > { %v5370_v6 = vsel %vm11673_vm15, %v5369_v13, %v5365_v38  ;;  %v4809_v25 = vpop.permute.xlu1 %4808  ;;  %v4893_v59 = vpop.permute.xlu0 %4892  ;;  %v5492_v13 = vrot.slane %v4881_v24, %v11424_v17  ;;  %v5428_v24 = vrot.slane %v10482_v32, %v11427_v51 }
 0x709   : > { %v5374_v12 = vrot.slane %v4809_v25, %v11436_v37 }
 0x70b   : > { %v5375_v58 = vsel %vm2058_vm12, %v5374_v12, %v5370_v6 }
 0x70c   : > { %v4815_v50 = vpop.permute.xlu1 %4814  ;;  %v5380_v18 = vsel %vm2065_vm13, %v5379_v42, %v5375_v58  ;;  %v4896_v1 = vpop.permute.xlu0 %4895  ;;  %v5408_v42 = vrot.slane %v10466_v9, %v11423_v56 }
 0x70d   : > { %v5384_v15 = vrot.slane %v4815_v50, %v11442_v39 }
 0x70f   : > { %v5385_v22 = vsel %vm2072_vm14, %v5384_v15, %v5380_v18 }
 0x710   : > { %v10495_v23 = vsel %vm11677_vm11, %v5385_v22, %v5547_v54  ;;  %v4821_v57 = vpop.permute.xlu1 %4820  ;;  %v5472_v54 = vrot.slane %v4869_v48, %v11417_v16  ;;  %v4899_v38 = vpop.permute.xlu0 %4898  ;;  %v5512_v48 = vrot.slane %v4893_v59, %v11429_v7 }
 0x711   : > { %v5393_v55 = vrot.slane %v4821_v57, %v11417_v16  ;;  %v5418_v57 = vrot.slane %v10474_v31, %v11425_v26  ;;  %v5522_v31 = vrot.slane %v4899_v38, %v11431_v20 }
 0x713   : > { %v5394_v33 = vsel %vm1974_vm0, %v5393_v55, %v5389_v4 }
 0x714   : > { %v4827_v34 = vpop.permute.xlu1 %4826  ;;  %v5399_v6 = vsel %vm1981_vm1, %v5398_v2, %v5394_v33 }
 0x715   : > { %v5403_v40 = vrot.slane %v4827_v34, %v11421_v45  ;;  %v4902_v34 = vpop.permute.xlu0 %4901 }
 0x717   : > { %v5404_v0 = vsel %vm1988_vm2, %v5403_v40, %v5399_v6 }
 0x718   : > { %v4833_v47 = vpop.permute.xlu1 %4832  ;;  %v5409_v11 = vsel %vm1995_vm3, %v5408_v42, %v5404_v0 }
 0x719   : > { %v5413_v25 = vrot.slane %v4833_v47, %v11424_v17  ;;  %v5517_v47 = vrot.slane %v4896_v1, %v11432_v10 }
 0x71b   : > { %v5414_v15 = vsel %vm2002_vm4, %v5413_v25, %v5409_v11 }
 0x71c   : > { %v4839_v60 = vpop.permute.xlu1 %4838 }
 0x71d   : > { %v5423_v18 = vrot.slane %v4839_v60, %v11426_v30 }
 0x720   : > { %v4845_v46 = vpop.permute.xlu1 %4844 }
 0x724   : > { %v4866_v36 = vpop.permute.xlu1 %4865 }
 0x725   : > { %v5468_v29 = vrot.slane %v4866_v36, %v11418_v28  ;;  %v4905_v36 = vpop.permute.xlu0 %4904 }
 0x727   : > { %v5473_v27 = vsel %vm1974_vm0, %v5472_v54, %v5468_v29  ;;  %vm11678_vm0 = vmmov %vm11667_vm5  ;;  %vm11686_vm5 = vcmask 1046534  }
 0x728   : > { %v4872_v63 = vpop.permute.xlu1 %4871 }
 0x729   : > { %v5477_v61 = vrot.slane %v4872_v63, %v11419_v52  ;;  %v5502_v52 = vrot.slane %v4887_v8, %v11426_v30  ;;  %v5433_v30 = vrot.slane %v4845_v46, %v11429_v7 }
 0x72b   : > { %v5478_v53 = vsel %vm1981_vm1, %v5477_v61, %v5473_v27  ;;  %vm11679_vm1 = vmmov %vm11678_vm0  ;;  %v5438_v61 = vrot.slane %v10489_v41, %v11432_v10  ;;  %v5532_v10 = vrot.slane %v4905_v36, %v11436_v37  ;;  %v4908_v41 = vpop.permute.xlu0 %4907 }
 0x72c   : > { %v4878_v49 = vpop.permute.xlu1 %4877  ;;  %v5483_v35 = vsel %vm1988_vm2, %v5482_v5, %v5478_v53  ;;  %vm11680_vm2 = vmmov %vm11670_vm9  ;;  %v5537_v1 = vrot.slane %v4908_v41, %v8210_v62 }
 0x72d   : > { %v5487_v44 = vrot.slane %v4878_v49, %v11423_v56  ;;  %v5419_v56 = vsel %vm11679_vm1, %v5418_v57, %v5414_v15 }
 0x72e   : > { %v5424_v43 = vsel %vm2016_vm6, %v5423_v18, %v5419_v56 }
 0x72f   : > { %v5488_v19 = vsel %vm1995_vm3, %v5487_v44, %v5483_v35  ;;  %v5429_v8 = vsel %vm2023_vm7, %v5428_v24, %v5424_v43  ;;  %vm11681_vm3 = vmmov %vm11671_vm10 }
 0x730   : > { %v4884_v3 = vpop.permute.xlu1 %4883  ;;  %v5493_v28 = vsel %vm2002_vm4, %v5492_v13, %v5488_v19  ;;  %v5434_v63 = vsel %vm2030_vm8, %v5433_v30, %v5429_v8  ;;  %vm11682_vm4 = vmmov %vm11680_vm2 }
 0x731   : > { %v5497_v16 = vrot.slane %v4884_v3, %v11425_v26  ;;  %v5439_v49 = vsel %vm11682_vm4, %v5438_v61, %v5434_v63 }
 0x733   : > { %v5498_v45 = vsel %vm11678_vm0, %v5497_v16, %v5493_v28 }
 0x734   : > { %v4890_v21 = vpop.permute.xlu1 %4889  ;;  %v5503_v50 = vsel %vm2016_vm6, %v5502_v52, %v5498_v45  ;;  %vm11683_vm6 = vmmov %vm11681_vm3 }
 0x735   : > { %v5507_v12 = vrot.slane %v4890_v21, %v11427_v51  ;;  %v5527_v51 = vrot.slane %v4902_v34, %v11434_v14 }
 0x737   : > { %v5508_v17 = vsel %vm2023_vm7, %v5507_v12, %v5503_v50  ;;  %vm11684_vm7 = vmmov %vm11673_vm15 }
 0x738   : > { %v4851_v58 = vpop.permute.xlu1 %4850  ;;  %v5513_v9 = vsel %vm2030_vm8, %v5512_v48, %v5508_v17  ;;  %vm11685_vm8 = vmmov %vm11684_vm7 }
 0x739   : > { %v5518_v26 = vsel %vm11680_vm2, %v5517_v47, %v5513_v9  ;;  %v5443_v59 = vrot.slane %v4851_v58, %v11431_v20 }
 0x73a   : > { %v5523_v7 = vsel %vm11681_vm3, %v5522_v31, %v5518_v26 }
 0x73b   : > { %v5444_v20 = vsel %vm11683_vm6, %v5443_v59, %v5439_v49  ;;  %v5528_v55 = vsel %vm11684_vm7, %v5527_v51, %v5523_v7 }
 0x73c   : > { %v4854_v22 = vpop.permute.xlu1 %4853  ;;  %v5533_v5 = vsel %vm2058_vm12, %v5532_v10, %v5528_v55 }
 0x73d   : > { %v5448_v46 = vrot.slane %v4854_v22, %v11434_v14  ;;  %v5538_v33 = vsel %vm2065_vm13, %v5537_v1, %v5533_v5 }
 0x73f   : > { %v5449_v53 = vsel %vm11685_vm8, %v5448_v46, %v5444_v20 }
 0x740   : > { %v4857_v60 = vpop.permute.xlu1 %4856 }
 0x741   : > { %v5453_v32 = vrot.slane %v4857_v60, %v11436_v37 }
 0x743   : > { %v5454_v44 = vsel %vm2058_vm12, %v5453_v32, %v5449_v53  ;;  %vm11687_vm12 = vcmask 1047559  }
 0x744   : > { %v4860_v29 = vpop.permute.xlu1 %4859 }
 0x745   : > { %v5458_v54 = vrot.slane %v4860_v29, %v8210_v62 }
 0x747   : > { %v5459_v3 = vsel %vm2065_vm13, %v5458_v54, %v5454_v44 }
 0x748   : > { %v4863_v27 = vpop.permute.xlu1 %4862 }
 0x749   : > { %v5463_v14 = vrot.slane %v4863_v27, %v11442_v39 }
 0x74b   : > { %v5464_v4 = vsel %vm2072_vm14, %v5463_v14, %v5459_v3 }
 0x74c   : > { %v4911_v35 = vpop.permute.xlu1 %4910  ;;  %v5549_v40 = vsel %vm11686_vm5, %v5464_v4, %v10495_v23 }
 0x74d   : > { %v5542_v37 = vrot.slane %v4911_v35, %v11442_v39 }
 0x74f   : > { %v5543_v19 = vsel %vm2072_vm14, %v5542_v37, %v5538_v33 }
 0x750   : > { %v5550_v62 = vsel %vm11687_vm12, %v5543_v19, %v5549_v40 }
 0x751   : > { %5552 = vst [vmem:[%s242_s11] sm:$0xff] %v5550_v62 }
 0x752   : > { %6759 = shalt.err (!%p6756_p0)
}
 0x753   : > { %s6760_s5 = scalar_lea.hbm %s10572_s23, 128  ;;  %s6764_s6 = scalar_lea.hbm %s10620_s4, 1024 }
 0x754   : > { %p6761_p3 = scmp.ne.s32.totalorder %s10572_s23, %s6760_s5  ;;  %p6765_p6 = scmp.lt.u32.totalorder %s10572_s23, %s10620_s4 }
 0x755   : > { %p6766_p7 = scmp.lt.u32.totalorder %s6764_s6, %s6760_s5  ;;  %p6768_p9 = scmp.lt.u32.totalorder %s6760_s5, %s10572_s23 }
 0x756   : > { %p6762_p11 = pnand %p6761_p3, %p11688_p10 }
 0x757   : > { %p6767_p8 = por %p6766_p7, %p6765_p6 }
 0x758   : > { %p6763_p13 = pneg %p6762_p11 }
 0x759   : > { %p6769_p5 = por %p6768_p9, %p6767_p8 }
 0x75b   : > { %p6770_p1 = pnand %p6769_p5, %p6763_p13 }
 0x75d   : > { %6773 = shalt.err (!%p6770_p1)
}
 0x75e   : > { %6101 = dma.vmem_to_hbm [thread:$0]  (%p11688_p10), %s10574_s12, 128, %s10572_s23, %s5554_s19  }
 0x75f PF: > { %p6118_p2 = scmp.ge.s32.totalorder %s6816_s18, 2  ;;  %s5579_s30 = sand.u32 1, %s6804_s15  }
 0x760   : > { %p11689_p4 = scmp.ne.s32.totalorder %s10925_s28, 0  ;;  %s5580_s7 = scalar_lea.sflag [#allocation4], %s5579_s30 }
 0x762   : > { %p6112_p12 = pnand %p6118_p2, %p11689_p4 }
 0x764   : > { %6799 = dma.done.wait (!%p6112_p12), %s5580_s7, 128  }
 0x765   : > { %6801 = vsyncadd (!%p6112_p12), %s5580_s7, 4294967168  ;;  %p18_p0 = scmp.ge.s32.totalorder %s6875_s21, 10   ;;  %s11690_s15 = smov %s6808_s16 }
 0x766   : > { %s11691_s16 = smov %s6812_s17  ;;  %s11692_s17 = smov %s6887_s24 }
 0x767   : > { %s11693_s18 = smov %s6875_s21  ;;  %20 = sbr.rel (!%p18_p0) target bundleno = 6 (0x6), region = 88 }
 0x76e   :  { %5585 = vsyncpa [#allocation3], 1 }
 0x76f   :  { %5587 = vsyncpa [#allocation3 + $0x1], 1 }
 0x770   :  { %5588 = vsyncpa [#allocation6], 1 }
 0x771   :  { %5589 = vsyncpa [#allocation4], 1 }
 0x772   :  { %5591 = vsyncpa [#allocation4 + $0x1], 1 }

</bundles_post_ra>
